<compile_context>
chip_gen: v6e
topology: v6e:2x2x1
jax: 0.10.0
libtpu: 0.0.40
codegen_flags: <defaults>
</compile_context>

<pallas_src>
import functools

import jax
import jax.numpy as jnp
from jax.experimental import pallas as pl
from jax.experimental.pallas import tpu as pltpu


# ----------------------------------------------------------------------------
# Fused Pallas kernel: grid = (batch_blocks, num_layers)
# ----------------------------------------------------------------------------
def _fused_decoder_kernel(tgt_bias_ref, src_bias_ref, inp_ref, src_ref,
                          w_qkv_self_ref, b_qkv_self_ref, wo_self_ref, bo_self_ref,
                          wq_x_ref, bq_x_ref, wkv_x_ref, bkv_x_ref,
                          wo_x_ref, bo_x_ref,
                          w_ff1_ref, b_ff1_ref, w_ff2_ref, b_ff2_ref,
                          ln_g_ref, ln_b_ref,
                          out_ref, x_scratch,
                          *, num_heads, head_dim, rows, tgt_len, src_len,
                          hidden, concat_slots):
    layer = pl.program_id(1)
    n_layers = pl.num_programs(1)
    nt = rows * tgt_len
    ns = rows * src_len

    # Layer 0: load the (batch-block of the) input activation into the VMEM
    # scratch that is carried across the layer grid axis.
    @pl.when(layer == 0)
    def _init():
        x_scratch[...] = inp_ref[...].reshape(nt, hidden)

    x = x_scratch[...]                                   # (rows*T, H) f32
    src = src_ref[...].reshape(ns, hidden)
    src_bf = src.astype(jnp.bfloat16)

    ln_g = ln_g_ref[0]                                   # (3, 1, H) f32
    ln_b = ln_b_ref[0]

    def layer_norm(v, idx):
        g = ln_g[idx]                                    # (1, H)
        b = ln_b[idx]
        mu = jnp.mean(v, axis=-1, keepdims=True)
        var = jnp.mean(jnp.square(v - mu), axis=-1, keepdims=True)
        return (v - mu) * jax.lax.rsqrt(var + 1e-5) * g + b

    def softmax_rows(s):
        s = s - jnp.max(s, axis=-1, keepdims=True)
        p = jnp.exp(s)
        # approximate reciprocal runs on the EUP slot, off the VALU path
        return p * pl.reciprocal(jnp.sum(p, axis=-1, keepdims=True), approx=True)

    def mha(q_all, k_all, v_all, wo_ref, bo_ref, bias_ref, q_len, kv_len):
        # q_all: (rows*q_len, H) f32; k_all/v_all: (rows*kv_len, H) f32.
        # Per-head context is folded through Wo[head] and summed -> no concat.
        q_all = q_all.astype(jnp.bfloat16)
        k_all = k_all.astype(jnp.bfloat16)
        v_all = v_all.astype(jnp.bfloat16)
        wo = wo_ref[0]                                   # (H, H) bf16
        bo = bo_ref[0]                                   # (1, H) f32
        row_outs = []
        for r in range(rows):                            # static, small
            key_bias = bias_ref[r]                       # (1, kv_len) f32
            q_r = q_all[r * q_len:(r + 1) * q_len]
            k_r = k_all[r * kv_len:(r + 1) * kv_len]
            v_r = v_all[r * kv_len:(r + 1) * kv_len]
            acc = jnp.zeros((q_len, hidden), jnp.float32)
            for h in range(num_heads):                   # static, small
                sl = slice(h * head_dim, (h + 1) * head_dim)
                # (q_len, dh) x (kv_len, dh) contracted on dh -> (q_len, kv_len)
                s = jax.lax.dot_general(q_r[:, sl], k_r[:, sl],
                                        (((1,), (1,)), ((), ())),
                                        preferred_element_type=jnp.float32)
                p = softmax_rows(s + key_bias)           # f32
                ctx = jnp.dot(p.astype(jnp.bfloat16), v_r[:, sl],
                              preferred_element_type=jnp.float32)
                acc = acc + jnp.dot(ctx.astype(jnp.bfloat16), wo[sl, :],
                                    preferred_element_type=jnp.float32)
            row_outs.append(acc + bo)
        if rows == 1:
            return row_outs[0]
        return jnp.concatenate(row_outs, axis=0)         # sublane-axis concat

    # ---- 1) self attention (non-causal) + residual + LayerNorm -------------
    x_bf = x.astype(jnp.bfloat16)
    qkv = jnp.dot(x_bf, w_qkv_self_ref[0],
                  preferred_element_type=jnp.float32) + b_qkv_self_ref[0]
    q = qkv[:, :hidden]
    k = qkv[:, hidden:2 * hidden]
    v = qkv[:, 2 * hidden:]
    sa = mha(q, k, v, wo_self_ref, bo_self_ref, tgt_bias_ref, tgt_len, tgt_len)
    x1 = layer_norm(sa + x, 0)

    # ---- 2) cross attention over src + residual + LayerNorm ----------------
    x1_bf = x1.astype(jnp.bfloat16)
    qx = jnp.dot(x1_bf, wq_x_ref[0],
                 preferred_element_type=jnp.float32) + bq_x_ref[0]
    kvx = jnp.dot(src_bf, wkv_x_ref[0],
                  preferred_element_type=jnp.float32) + bkv_x_ref[0]
    kx = kvx[:, :hidden]
    vx = kvx[:, hidden:]
    ca = mha(qx, kx, vx, wo_x_ref, bo_x_ref, src_bias_ref, tgt_len, src_len)
    x2 = layer_norm(ca + x1, 1)

    # ---- 3) feed-forward (Linear->ReLU->Linear) + LayerNorm, NO residual ----
    x2_bf = x2.astype(jnp.bfloat16)
    hdn = jnp.maximum(
        jnp.dot(x2_bf, w_ff1_ref[0], preferred_element_type=jnp.float32)
        + b_ff1_ref[0], 0.0)
    ff = jnp.dot(hdn.astype(jnp.bfloat16), w_ff2_ref[0],
                 preferred_element_type=jnp.float32) + b_ff2_ref[0]
    x_new = layer_norm(ff, 2)

    # carry to the next layer
    x_scratch[...] = x_new

    # last layer: emit the output (optionally the adjacent-slot concat, done
    # here as lane-dense stores instead of an extra XLA pass).
    @pl.when(layer == n_layers - 1)
    def _store():
        xb = x_new.reshape(rows, tgt_len, hidden)
        if concat_slots:
            out_ref[:, :, :hidden] = xb[:, :tgt_len - 1, :]
            out_ref[:, :, hidden:] = xb[:, 1:, :]
        else:
            out_ref[...] = xb


# ----------------------------------------------------------------------------
# Wrapper: one pallas_call for the whole decoder stack
# ----------------------------------------------------------------------------
def _pick_rows_per_block(batch, tgt_len, target=256, max_rows=16):
    limit = max(1, min(max_rows, target // max(tgt_len, 1)))
    best = 1
    for r in range(1, batch + 1):
        if batch % r == 0 and r <= limit:
            best = r
    return best


def insertion_decoder_pallas(inp, src, tgt_bias, src_bias, packed, *, num_heads,
                             concat_slots=True, rows_per_block=None,
                             vmem_limit_bytes=48 * 1024 * 1024):
    B, T, H = inp.shape
    S = src.shape[1]
    L = packed[0].shape[0]
    head_dim = H // num_heads
    if rows_per_block is None:
        rows_per_block = _pick_rows_per_block(B, T)
    assert B % rows_per_block == 0
    nb = B // rows_per_block

    kernel = functools.partial(
        _fused_decoder_kernel, num_heads=num_heads, head_dim=head_dim,
        rows=rows_per_block, tgt_len=T, src_len=S, hidden=H,
        concat_slots=concat_slots)

    def data_spec(tail):
        nd = len(tail)
        return pl.BlockSpec((rows_per_block,) + tail,
                            lambda b, l, _nd=nd: (b,) + (0,) * _nd)

    def layer_spec(arr):
        tail = arr.shape[1:]
        nd = len(tail)
        return pl.BlockSpec((1,) + tail,
                            lambda b, l, _nd=nd: (l,) + (0,) * _nd)

    in_specs = [
        data_spec((1, T)),      # tgt key-padding bias
        data_spec((1, S)),      # src key-padding bias
        data_spec((T, H)),      # inp (this batch block, fetched once per block)
        data_spec((S, H)),      # src
    ] + [layer_spec(w) for w in packed]

    if concat_slots:
        out_shape = jax.ShapeDtypeStruct((B, T - 1, 2 * H), jnp.float32)
        out_spec = pl.BlockSpec((rows_per_block, T - 1, 2 * H),
                                lambda b, l: (b, 0, 0))
    else:
        out_shape = jax.ShapeDtypeStruct((B, T, H), jnp.float32)
        out_spec = pl.BlockSpec((rows_per_block, T, H), lambda b, l: (b, 0, 0))

    return pl.pallas_call(
        kernel,
        out_shape=out_shape,
        grid=(nb, L),
        in_specs=in_specs,
        out_specs=out_spec,
        scratch_shapes=[pltpu.VMEM((rows_per_block * T, H), jnp.float32)],
        compiler_params=pltpu.CompilerParams(
            dimension_semantics=("parallel", "arbitrary"),
            vmem_limit_bytes=vmem_limit_bytes),
    )(tgt_bias, src_bias, inp, src, *packed)


# ----------------------------------------------------------------------------
# Parameter handling
# ----------------------------------------------------------------------------
def init_params(key, hidden, ff_hidden, num_layers):
    # Same y = x @ W + b convention as before. (PyTorch nn.MultiheadAttention
    # stores in_proj_weight as (3H, H) applied as x @ W^T -> transpose and
    # de-interleave when importing real checkpoints.)
    params = []
    scale = 0.05
    for layer in range(num_layers):
        ks = jax.random.split(jax.random.fold_in(key, layer), 8)
        w_self = jax.random.normal(ks[0], (4, hidden, hidden), jnp.float32) * scale
        b_self = jax.random.normal(ks[1], (4, 1, hidden), jnp.float32) * scale
        w_cross = jax.random.normal(ks[2], (4, hidden, hidden), jnp.float32) * scale
        b_cross = jax.random.normal(ks[3], (4, 1, hidden), jnp.float32) * scale
        w_ff1 = jax.random.normal(ks[4], (hidden, ff_hidden), jnp.float32) * scale
        b_ff1 = jax.random.normal(ks[5], (1, ff_hidden), jnp.float32) * scale
        w_ff2 = jax.random.normal(ks[6], (ff_hidden, hidden), jnp.float32) * scale
        b_ff2 = jax.random.normal(ks[7], (1, hidden), jnp.float32) * scale
        ln_g = jnp.ones((3, 1, hidden), jnp.float32)   # [self_attn, attn, ffn]
        ln_b = jnp.zeros((3, 1, hidden), jnp.float32)
        params.append((w_self, b_self, w_cross, b_cross,
                       w_ff1, b_ff1, w_ff2, b_ff2, ln_g, ln_b))
    return params


def pack_params(params, *, num_heads):
    """Stack per-layer params with a leading layer axis, fuse QKV / KV weight
    matrices, fold the 1/sqrt(head_dim) scale into Wq/bq, and cast the weight
    matrices to bf16 (biases / LayerNorm stay f32)."""
    hidden = params[0][0].shape[1]
    head_dim = hidden // num_heads
    scale = 1.0 / (float(head_dim) ** 0.5)

    lists = [[] for _ in range(16)]
    for (w_s, b_s, w_c, b_c, w_f1, b_f1, w_f2, b_f2, ln_g, ln_b) in params:
        w_qkv_self = jnp.concatenate([w_s[0] * scale, w_s[1], w_s[2]], axis=1)
        b_qkv_self = jnp.concatenate([b_s[0] * scale, b_s[1], b_s[2]], axis=1)
        wkv_x = jnp.concatenate([w_c[1], w_c[2]], axis=1)
        bkv_x = jnp.concatenate([b_c[1], b_c[2]], axis=1)
        entries = (w_qkv_self, b_qkv_self, w_s[3], b_s[3],
                   w_c[0] * scale, b_c[0] * scale, wkv_x, bkv_x,
                   w_c[3], b_c[3], w_f1, b_f1, w_f2, b_f2, ln_g, ln_b)
        for lst, e in zip(lists, entries):
            lst.append(e)

    stacked = [jnp.stack(lst, axis=0) for lst in lists]
    # weight matrices -> bf16 (indices of the matmul operands)
    weight_idx = {0, 2, 4, 6, 8, 10, 12}
    packed = tuple(a.astype(jnp.bfloat16) if i in weight_idx else a
                   for i, a in enumerate(stacked))
    return packed


# ----------------------------------------------------------------------------
# Glue (plain JAX): positional features, mask -> bias, slot mask
# ----------------------------------------------------------------------------
def add_positional_features(x, min_timescale=1.0, max_timescale=1.0e4):
    _, T, H = x.shape
    timestep = jnp.arange(T, dtype=jnp.float32)
    num_timescales = H // 2
    log_inc = jnp.log(max_timescale / min_timescale) / max(num_timescales - 1, 1)
    inv = min_timescale * jnp.exp(
        jnp.arange(num_timescales, dtype=jnp.float32) * -log_inc)
    scaled = timestep[:, None] * inv[None, :]
    sinus = jnp.concatenate([jnp.sin(scaled), jnp.cos(scaled)], axis=1)
    if H % 2 != 0:
        sinus = jnp.concatenate([sinus, jnp.zeros((T, 1), jnp.float32)], axis=1)
    return x + sinus[None, :, :]


def _mask_to_bias(mask, B, L):
    if mask is None:
        return jnp.zeros((B, 1, L), jnp.float32)
    return (1.0 - mask.astype(jnp.float32))[:, None, :] * -1e9


def insertion_decoder_forward(tgt_hidden, tgt_mask, src_hidden, src_mask, params,
                              *, num_heads, use_positional_embedding=True,
                              concat_adjacent_repr_for_slots=True):
    inp = add_positional_features(tgt_hidden) if use_positional_embedding else tgt_hidden
    B, T, _ = inp.shape
    S = src_hidden.shape[1]
    tgt_bias = _mask_to_bias(tgt_mask, B, T)
    src_bias = _mask_to_bias(src_mask, B, S)
    packed = pack_params(params, num_heads=num_heads)

    out = insertion_decoder_pallas(
        inp, src_hidden, tgt_bias, src_bias, packed, num_heads=num_heads,
        concat_slots=concat_adjacent_repr_for_slots)

    if not concat_adjacent_repr_for_slots:
        return out, tgt_mask

    output_mask = None if tgt_mask is None else (
        (tgt_mask[:, :-1] + tgt_mask[:, 1:]) == 2).astype(jnp.int32)
    return out, output_mask


if __name__ == "__main__":
    B, T, S, H = 2, 8, 8, 32
    NUM_HEADS, NUM_LAYERS, FF_HIDDEN = 4, 2, 32

    key = jax.random.PRNGKey(0)
    k1, k2, k3 = jax.random.split(key, 3)
    tgt_hidden = jax.random.normal(k1, (B, T, H), jnp.float32)
    src_hidden = jax.random.normal(k2, (B, S, H), jnp.float32)
    tgt_mask = jnp.array([[1] * T, [1] * (T - 2) + [0, 0]], dtype=jnp.int32)
    src_mask = jnp.array([[1] * S, [1] * (S - 1) + [0]], dtype=jnp.int32)

    params = init_params(k3, H, FF_HIDDEN, NUM_LAYERS)

    out, out_mask = insertion_decoder_forward(
        tgt_hidden, tgt_mask, src_hidden, src_mask, params,
        num_heads=NUM_HEADS, use_positional_embedding=True,
        concat_adjacent_repr_for_slots=True)

    out = jax.block_until_ready(out)
    out_mask = jax.block_until_ready(out_mask)

    assert out.shape == (B, T - 1, 2 * H), out.shape
    assert out_mask.shape == (B, T - 1), out_mask.shape
    assert bool(jnp.all(jnp.isfinite(out)))
    print("KERNEL_OK")
</pallas_src>

<mosaic_0001>
module attributes {stable_mosaic.version = 11 : i64} {
  func.func @_fused_decoder_kernel(%arg0: i32, %arg1: i32, %arg2: memref<2x1x8xf32, #tpu.memory_space<vmem>>, %arg3: memref<2x1x8xf32, #tpu.memory_space<vmem>>, %arg4: memref<2x8x32xf32, #tpu.memory_space<vmem>>, %arg5: memref<2x8x32xf32, #tpu.memory_space<vmem>>, %arg6: memref<1x32x96xbf16, #tpu.memory_space<vmem>>, %arg7: memref<1x1x96xf32, #tpu.memory_space<vmem>>, %arg8: memref<1x32x32xbf16, #tpu.memory_space<vmem>>, %arg9: memref<1x1x32xf32, #tpu.memory_space<vmem>>, %arg10: memref<1x32x32xbf16, #tpu.memory_space<vmem>>, %arg11: memref<1x1x32xf32, #tpu.memory_space<vmem>>, %arg12: memref<1x32x64xbf16, #tpu.memory_space<vmem>>, %arg13: memref<1x1x64xf32, #tpu.memory_space<vmem>>, %arg14: memref<1x32x32xbf16, #tpu.memory_space<vmem>>, %arg15: memref<1x1x32xf32, #tpu.memory_space<vmem>>, %arg16: memref<1x32x32xbf16, #tpu.memory_space<vmem>>, %arg17: memref<1x1x32xf32, #tpu.memory_space<vmem>>, %arg18: memref<1x32x32xbf16, #tpu.memory_space<vmem>>, %arg19: memref<1x1x32xf32, #tpu.memory_space<vmem>>, %arg20: memref<1x3x1x32xf32, #tpu.memory_space<vmem>>, %arg21: memref<1x3x1x32xf32, #tpu.memory_space<vmem>>, %arg22: memref<2x7x64xf32, #tpu.memory_space<vmem>>, %arg23: memref<16x32xf32, #tpu.memory_space<vmem>>) attributes {dimension_semantics = [#tpu.dimension_semantics<parallel>, #tpu.dimension_semantics<arbitrary>], iteration_bounds = array<i64: 1, 2>, scalar_prefetch = 0 : i64, scratch_operands = 1 : i64, tpu.core_type = #tpu.core_type<tc>, window_params = [{transform_indices = @transform_0, window_bounds = array<i64: 2, 1, 8>}, {transform_indices = @transform_1, window_bounds = array<i64: 2, 1, 8>}, {transform_indices = @transform_2, window_bounds = array<i64: 2, 8, 32>}, {transform_indices = @transform_3, window_bounds = array<i64: 2, 8, 32>}, {transform_indices = @transform_4, window_bounds = array<i64: 1, 32, 96>}, {transform_indices = @transform_5, window_bounds = array<i64: 1, 1, 96>}, {transform_indices = @transform_6, window_bounds = array<i64: 1, 32, 32>}, {transform_indices = @transform_7, window_bounds = array<i64: 1, 1, 32>}, {transform_indices = @transform_8, window_bounds = array<i64: 1, 32, 32>}, {transform_indices = @transform_9, window_bounds = array<i64: 1, 1, 32>}, {transform_indices = @transform_10, window_bounds = array<i64: 1, 32, 64>}, {transform_indices = @transform_11, window_bounds = array<i64: 1, 1, 64>}, {transform_indices = @transform_12, window_bounds = array<i64: 1, 32, 32>}, {transform_indices = @transform_13, window_bounds = array<i64: 1, 1, 32>}, {transform_indices = @transform_14, window_bounds = array<i64: 1, 32, 32>}, {transform_indices = @transform_15, window_bounds = array<i64: 1, 1, 32>}, {transform_indices = @transform_16, window_bounds = array<i64: 1, 32, 32>}, {transform_indices = @transform_17, window_bounds = array<i64: 1, 1, 32>}, {transform_indices = @transform_18, window_bounds = array<i64: 1, 3, 1, 32>}, {transform_indices = @transform_19, window_bounds = array<i64: 1, 3, 1, 32>}, {transform_indices = @transform_20, window_bounds = array<i64: 2, 7, 64>}]} {
    %c0_i32 = arith.constant 0 : i32
    %0 = arith.cmpi eq, %arg1, %c0_i32 : i32
    %1 = arith.extui %0 : i1 to i32
    %c0_i32_0 = arith.constant 0 : i32
    %2 = arith.cmpi ne, %1, %c0_i32_0 : i32
    scf.if %2 {
      %c0_173 = arith.constant 0 : index
      %c0_174 = arith.constant 0 : index
      %c0_175 = arith.constant 0 : index
      %541 = vector.load %arg4[%c0_173, %c0_174, %c0_175] : memref<2x8x32xf32, #tpu.memory_space<vmem>>, vector<2x8x32xf32>
      %542 = vector.shape_cast %541 : vector<2x8x32xf32> to vector<16x32xf32>
      %c0_176 = arith.constant 0 : index
      %c0_177 = arith.constant 0 : index
      %543 = vector.load %arg23[%c0_176, %c0_177] : memref<16x32xf32, #tpu.memory_space<vmem>>, vector<16x32xf32>
      tpu.vector_store %arg23[%c0_176, %c0_177], %542 {strides = array<i32>} : memref<16x32xf32, #tpu.memory_space<vmem>>, vector<16x32xf32>,
    } else {
    }
    %c0 = arith.constant 0 : index
    %c0_1 = arith.constant 0 : index
    %3 = vector.load %arg23[%c0, %c0_1] : memref<16x32xf32, #tpu.memory_space<vmem>>, vector<16x32xf32>
    %c0_2 = arith.constant 0 : index
    %c0_3 = arith.constant 0 : index
    %c0_4 = arith.constant 0 : index
    %4 = vector.load %arg5[%c0_2, %c0_3, %c0_4] : memref<2x8x32xf32, #tpu.memory_space<vmem>>, vector<2x8x32xf32>
    %5 = vector.shape_cast %4 : vector<2x8x32xf32> to vector<16x32xf32>
    %6 = arith.truncf %5 : vector<16x32xf32> to vector<16x32xbf16>
    %c0_5 = arith.constant 0 : index
    %c0_6 = arith.constant 0 : index
    %c0_7 = arith.constant 0 : index
    %c0_8 = arith.constant 0 : index
    %7 = vector.load %arg20[%c0_5, %c0_6, %c0_7, %c0_8] : memref<1x3x1x32xf32, #tpu.memory_space<vmem>>, vector<1x3x1x32xf32>
    %8 = vector.shape_cast %7 : vector<1x3x1x32xf32> to vector<3x1x32xf32>
    %c0_9 = arith.constant 0 : index
    %c0_10 = arith.constant 0 : index
    %c0_11 = arith.constant 0 : index
    %c0_12 = arith.constant 0 : index
    %9 = vector.load %arg21[%c0_9, %c0_10, %c0_11, %c0_12] : memref<1x3x1x32xf32, #tpu.memory_space<vmem>>, vector<1x3x1x32xf32>
    %10 = vector.shape_cast %9 : vector<1x3x1x32xf32> to vector<3x1x32xf32>
    %11 = arith.truncf %3 : vector<16x32xf32> to vector<16x32xbf16>
    %c0_13 = arith.constant 0 : index
    %c0_14 = arith.constant 0 : index
    %c0_15 = arith.constant 0 : index
    %12 = vector.load %arg6[%c0_13, %c0_14, %c0_15] : memref<1x32x96xbf16, #tpu.memory_space<vmem>>, vector<1x32x96xbf16>
    %13 = vector.shape_cast %12 : vector<1x32x96xbf16> to vector<32x96xbf16>
    %cst = arith.constant dense<0.000000e+00> : vector<16x96xf32>
    %14 = tpu.matmul %11, %13, %cst {dimension_numbers = #tpu.dot_dimension_numbers<[1], [0], [0], [1], [0, 0, 1, 1], [], []>} : vector<16x32xbf16>, vector<32x96xbf16>, vector<16x96xf32> -> vector<16x96xf32>
    %c0_16 = arith.constant 0 : index
    %c0_17 = arith.constant 0 : index
    %c0_18 = arith.constant 0 : index
    %15 = vector.load %arg7[%c0_16, %c0_17, %c0_18] : memref<1x1x96xf32, #tpu.memory_space<vmem>>, vector<1x1x96xf32>
    %16 = vector.shape_cast %15 : vector<1x1x96xf32> to vector<1x96xf32>
    %17 = vector.broadcast %16 : vector<1x96xf32> to vector<16x96xf32>
    %18 = arith.addf %14, %17 : vector<16x96xf32>
    %19 = vector.extract_strided_slice %18 {offsets = [0, 0], sizes = [16, 32], strides = [1, 1]} : vector<16x96xf32> to vector<16x32xf32>
    %20 = vector.extract_strided_slice %18 {offsets = [0, 32], sizes = [16, 32], strides = [1, 1]} : vector<16x96xf32> to vector<16x32xf32>
    %21 = vector.extract_strided_slice %18 {offsets = [0, 64], sizes = [16, 32], strides = [1, 1]} : vector<16x96xf32> to vector<16x32xf32>
    %22 = arith.truncf %19 : vector<16x32xf32> to vector<16x32xbf16>
    %23 = arith.truncf %20 : vector<16x32xf32> to vector<16x32xbf16>
    %24 = arith.truncf %21 : vector<16x32xf32> to vector<16x32xbf16>
    %c0_19 = arith.constant 0 : index
    %c0_20 = arith.constant 0 : index
    %c0_21 = arith.constant 0 : index
    %25 = vector.load %arg8[%c0_19, %c0_20, %c0_21] : memref<1x32x32xbf16, #tpu.memory_space<vmem>>, vector<1x32x32xbf16>
    %26 = vector.shape_cast %25 : vector<1x32x32xbf16> to vector<32x32xbf16>
    %c0_22 = arith.constant 0 : index
    %c0_23 = arith.constant 0 : index
    %c0_24 = arith.constant 0 : index
    %27 = vector.load %arg9[%c0_22, %c0_23, %c0_24] : memref<1x1x32xf32, #tpu.memory_space<vmem>>, vector<1x1x32xf32>
    %28 = vector.shape_cast %27 : vector<1x1x32xf32> to vector<1x32xf32>
    %c0_25 = arith.constant 0 : index
    %c0_26 = arith.constant 0 : index
    %c0_27 = arith.constant 0 : index
    %29 = vector.load %arg2[%c0_25, %c0_26, %c0_27] : memref<2x1x8xf32, #tpu.memory_space<vmem>>, vector<1x1x8xf32>
    %30 = vector.shape_cast %29 : vector<1x1x8xf32> to vector<1x8xf32>
    %31 = vector.extract_strided_slice %22 {offsets = [0, 0], sizes = [8, 32], strides = [1, 1]} : vector<16x32xbf16> to vector<8x32xbf16>
    %32 = vector.extract_strided_slice %23 {offsets = [0, 0], sizes = [8, 32], strides = [1, 1]} : vector<16x32xbf16> to vector<8x32xbf16>
    %33 = vector.extract_strided_slice %24 {offsets = [0, 0], sizes = [8, 32], strides = [1, 1]} : vector<16x32xbf16> to vector<8x32xbf16>
    %cst_28 = arith.constant 0.000000e+00 : f32
    %34 = vector.broadcast %cst_28 : f32 to vector<8x32xf32>
    %35 = vector.extract_strided_slice %31 {offsets = [0, 0], sizes = [8, 8], strides = [1, 1]} : vector<8x32xbf16> to vector<8x8xbf16>
    %36 = vector.extract_strided_slice %32 {offsets = [0, 0], sizes = [8, 8], strides = [1, 1]} : vector<8x32xbf16> to vector<8x8xbf16>
    %cst_29 = arith.constant dense<0.000000e+00> : vector<8x8xf32>
    %37 = tpu.matmul %35, %36, %cst_29 {dimension_numbers = #tpu.dot_dimension_numbers<[1], [1], [0], [0], [0, 0, 1, 0], [], []>} : vector<8x8xbf16>, vector<8x8xbf16>, vector<8x8xf32> -> vector<8x8xf32>
    %38 = vector.broadcast %30 : vector<1x8xf32> to vector<8x8xf32>
    %39 = arith.addf %37, %38 : vector<8x8xf32>
    %cst_30 = arith.constant dense<0xFF800000> : vector<8xf32>
    %40 = vector.multi_reduction <maximumf>, %39, %cst_30 [1] : vector<8x8xf32> to vector<8xf32>
    %41 = vector.shape_cast %40 : vector<8xf32> to vector<8x1xf32>
    %42 = vector.broadcast %41 : vector<8x1xf32> to vector<8x8xf32>
    %43 = arith.subf %39, %42 : vector<8x8xf32>
    %44 = math.exp %43 : vector<8x8xf32>
    %cst_31 = arith.constant dense<0.000000e+00> : vector<8xf32>
    %45 = vector.multi_reduction <add>, %44, %cst_31 [1] : vector<8x8xf32> to vector<8xf32>
    %46 = vector.shape_cast %45 : vector<8xf32> to vector<8x1xf32>
    %47 = tpu.reciprocal %46 {approx = true} : vector<8x1xf32> -> vector<8x1xf32>
    %48 = vector.broadcast %47 : vector<8x1xf32> to vector<8x8xf32>
    %49 = arith.mulf %44, %48 : vector<8x8xf32>
    %50 = arith.truncf %49 : vector<8x8xf32> to vector<8x8xbf16>
    %51 = vector.extract_strided_slice %33 {offsets = [0, 0], sizes = [8, 8], strides = [1, 1]} : vector<8x32xbf16> to vector<8x8xbf16>
    %cst_32 = arith.constant dense<0.000000e+00> : vector<8x8xf32>
    %52 = tpu.matmul %50, %51, %cst_32 {dimension_numbers = #tpu.dot_dimension_numbers<[1], [0], [0], [1], [0, 0, 1, 1], [], []>} : vector<8x8xbf16>, vector<8x8xbf16>, vector<8x8xf32> -> vector<8x8xf32>
    %53 = arith.truncf %52 : vector<8x8xf32> to vector<8x8xbf16>
    %54 = vector.extract_strided_slice %26 {offsets = [0, 0], sizes = [8, 32], strides = [1, 1]} : vector<32x32xbf16> to vector<8x32xbf16>
    %cst_33 = arith.constant dense<0.000000e+00> : vector<8x32xf32>
    %55 = tpu.matmul %53, %54, %cst_33 {dimension_numbers = #tpu.dot_dimension_numbers<[1], [0], [0], [1], [0, 0, 1, 1], [], []>} : vector<8x8xbf16>, vector<8x32xbf16>, vector<8x32xf32> -> vector<8x32xf32>
    %56 = arith.addf %34, %55 : vector<8x32xf32>
    %57 = vector.extract_strided_slice %31 {offsets = [0, 8], sizes = [8, 8], strides = [1, 1]} : vector<8x32xbf16> to vector<8x8xbf16>
    %58 = vector.extract_strided_slice %32 {offsets = [0, 8], sizes = [8, 8], strides = [1, 1]} : vector<8x32xbf16> to vector<8x8xbf16>
    %cst_34 = arith.constant dense<0.000000e+00> : vector<8x8xf32>
    %59 = tpu.matmul %57, %58, %cst_34 {dimension_numbers = #tpu.dot_dimension_numbers<[1], [1], [0], [0], [0, 0, 1, 0], [], []>} : vector<8x8xbf16>, vector<8x8xbf16>, vector<8x8xf32> -> vector<8x8xf32>
    %60 = vector.broadcast %30 : vector<1x8xf32> to vector<8x8xf32>
    %61 = arith.addf %59, %60 : vector<8x8xf32>
    %cst_35 = arith.constant dense<0xFF800000> : vector<8xf32>
    %62 = vector.multi_reduction <maximumf>, %61, %cst_35 [1] : vector<8x8xf32> to vector<8xf32>
    %63 = vector.shape_cast %62 : vector<8xf32> to vector<8x1xf32>
    %64 = vector.broadcast %63 : vector<8x1xf32> to vector<8x8xf32>
    %65 = arith.subf %61, %64 : vector<8x8xf32>
    %66 = math.exp %65 : vector<8x8xf32>
    %cst_36 = arith.constant dense<0.000000e+00> : vector<8xf32>
    %67 = vector.multi_reduction <add>, %66, %cst_36 [1] : vector<8x8xf32> to vector<8xf32>
    %68 = vector.shape_cast %67 : vector<8xf32> to vector<8x1xf32>
    %69 = tpu.reciprocal %68 {approx = true} : vector<8x1xf32> -> vector<8x1xf32>
    %70 = vector.broadcast %69 : vector<8x1xf32> to vector<8x8xf32>
    %71 = arith.mulf %66, %70 : vector<8x8xf32>
    %72 = arith.truncf %71 : vector<8x8xf32> to vector<8x8xbf16>
    %73 = vector.extract_strided_slice %33 {offsets = [0, 8], sizes = [8, 8], strides = [1, 1]} : vector<8x32xbf16> to vector<8x8xbf16>
    %cst_37 = arith.constant dense<0.000000e+00> : vector<8x8xf32>
    %74 = tpu.matmul %72, %73, %cst_37 {dimension_numbers = #tpu.dot_dimension_numbers<[1], [0], [0], [1], [0, 0, 1, 1], [], []>} : vector<8x8xbf16>, vector<8x8xbf16>, vector<8x8xf32> -> vector<8x8xf32>
    %75 = arith.truncf %74 : vector<8x8xf32> to vector<8x8xbf16>
    %76 = vector.extract_strided_slice %26 {offsets = [8, 0], sizes = [8, 32], strides = [1, 1]} : vector<32x32xbf16> to vector<8x32xbf16>
    %cst_38 = arith.constant dense<0.000000e+00> : vector<8x32xf32>
    %77 = tpu.matmul %75, %76, %cst_38 {dimension_numbers = #tpu.dot_dimension_numbers<[1], [0], [0], [1], [0, 0, 1, 1], [], []>} : vector<8x8xbf16>, vector<8x32xbf16>, vector<8x32xf32> -> vector<8x32xf32>
    %78 = arith.addf %56, %77 : vector<8x32xf32>
    %79 = vector.extract_strided_slice %31 {offsets = [0, 16], sizes = [8, 8], strides = [1, 1]} : vector<8x32xbf16> to vector<8x8xbf16>
    %80 = vector.extract_strided_slice %32 {offsets = [0, 16], sizes = [8, 8], strides = [1, 1]} : vector<8x32xbf16> to vector<8x8xbf16>
    %cst_39 = arith.constant dense<0.000000e+00> : vector<8x8xf32>
    %81 = tpu.matmul %79, %80, %cst_39 {dimension_numbers = #tpu.dot_dimension_numbers<[1], [1], [0], [0], [0, 0, 1, 0], [], []>} : vector<8x8xbf16>, vector<8x8xbf16>, vector<8x8xf32> -> vector<8x8xf32>
    %82 = vector.broadcast %30 : vector<1x8xf32> to vector<8x8xf32>
    %83 = arith.addf %81, %82 : vector<8x8xf32>
    %cst_40 = arith.constant dense<0xFF800000> : vector<8xf32>
    %84 = vector.multi_reduction <maximumf>, %83, %cst_40 [1] : vector<8x8xf32> to vector<8xf32>
    %85 = vector.shape_cast %84 : vector<8xf32> to vector<8x1xf32>
    %86 = vector.broadcast %85 : vector<8x1xf32> to vector<8x8xf32>
    %87 = arith.subf %83, %86 : vector<8x8xf32>
    %88 = math.exp %87 : vector<8x8xf32>
    %cst_41 = arith.constant dense<0.000000e+00> : vector<8xf32>
    %89 = vector.multi_reduction <add>, %88, %cst_41 [1] : vector<8x8xf32> to vector<8xf32>
    %90 = vector.shape_cast %89 : vector<8xf32> to vector<8x1xf32>
    %91 = tpu.reciprocal %90 {approx = true} : vector<8x1xf32> -> vector<8x1xf32>
    %92 = vector.broadcast %91 : vector<8x1xf32> to vector<8x8xf32>
    %93 = arith.mulf %88, %92 : vector<8x8xf32>
    %94 = arith.truncf %93 : vector<8x8xf32> to vector<8x8xbf16>
    %95 = vector.extract_strided_slice %33 {offsets = [0, 16], sizes = [8, 8], strides = [1, 1]} : vector<8x32xbf16> to vector<8x8xbf16>
    %cst_42 = arith.constant dense<0.000000e+00> : vector<8x8xf32>
    %96 = tpu.matmul %94, %95, %cst_42 {dimension_numbers = #tpu.dot_dimension_numbers<[1], [0], [0], [1], [0, 0, 1, 1], [], []>} : vector<8x8xbf16>, vector<8x8xbf16>, vector<8x8xf32> -> vector<8x8xf32>
    %97 = arith.truncf %96 : vector<8x8xf32> to vector<8x8xbf16>
    %98 = vector.extract_strided_slice %26 {offsets = [16, 0], sizes = [8, 32], strides = [1, 1]} : vector<32x32xbf16> to vector<8x32xbf16>
    %cst_43 = arith.constant dense<0.000000e+00> : vector<8x32xf32>
    %99 = tpu.matmul %97, %98, %cst_43 {dimension_numbers = #tpu.dot_dimension_numbers<[1], [0], [0], [1], [0, 0, 1, 1], [], []>} : vector<8x8xbf16>, vector<8x32xbf16>, vector<8x32xf32> -> vector<8x32xf32>
    %100 = arith.addf %78, %99 : vector<8x32xf32>
    %101 = vector.extract_strided_slice %31 {offsets = [0, 24], sizes = [8, 8], strides = [1, 1]} : vector<8x32xbf16> to vector<8x8xbf16>
    %102 = vector.extract_strided_slice %32 {offsets = [0, 24], sizes = [8, 8], strides = [1, 1]} : vector<8x32xbf16> to vector<8x8xbf16>
    %cst_44 = arith.constant dense<0.000000e+00> : vector<8x8xf32>
    %103 = tpu.matmul %101, %102, %cst_44 {dimension_numbers = #tpu.dot_dimension_numbers<[1], [1], [0], [0], [0, 0, 1, 0], [], []>} : vector<8x8xbf16>, vector<8x8xbf16>, vector<8x8xf32> -> vector<8x8xf32>
    %104 = vector.broadcast %30 : vector<1x8xf32> to vector<8x8xf32>
    %105 = arith.addf %103, %104 : vector<8x8xf32>
    %cst_45 = arith.constant dense<0xFF800000> : vector<8xf32>
    %106 = vector.multi_reduction <maximumf>, %105, %cst_45 [1] : vector<8x8xf32> to vector<8xf32>
    %107 = vector.shape_cast %106 : vector<8xf32> to vector<8x1xf32>
    %108 = vector.broadcast %107 : vector<8x1xf32> to vector<8x8xf32>
    %109 = arith.subf %105, %108 : vector<8x8xf32>
    %110 = math.exp %109 : vector<8x8xf32>
    %cst_46 = arith.constant dense<0.000000e+00> : vector<8xf32>
    %111 = vector.multi_reduction <add>, %110, %cst_46 [1] : vector<8x8xf32> to vector<8xf32>
    %112 = vector.shape_cast %111 : vector<8xf32> to vector<8x1xf32>
    %113 = tpu.reciprocal %112 {approx = true} : vector<8x1xf32> -> vector<8x1xf32>
    %114 = vector.broadcast %113 : vector<8x1xf32> to vector<8x8xf32>
    %115 = arith.mulf %110, %114 : vector<8x8xf32>
    %116 = arith.truncf %115 : vector<8x8xf32> to vector<8x8xbf16>
    %117 = vector.extract_strided_slice %33 {offsets = [0, 24], sizes = [8, 8], strides = [1, 1]} : vector<8x32xbf16> to vector<8x8xbf16>
    %cst_47 = arith.constant dense<0.000000e+00> : vector<8x8xf32>
    %118 = tpu.matmul %116, %117, %cst_47 {dimension_numbers = #tpu.dot_dimension_numbers<[1], [0], [0], [1], [0, 0, 1, 1], [], []>} : vector<8x8xbf16>, vector<8x8xbf16>, vector<8x8xf32> -> vector<8x8xf32>
    %119 = arith.truncf %118 : vector<8x8xf32> to vector<8x8xbf16>
    %120 = vector.extract_strided_slice %26 {offsets = [24, 0], sizes = [8, 32], strides = [1, 1]} : vector<32x32xbf16> to vector<8x32xbf16>
    %cst_48 = arith.constant dense<0.000000e+00> : vector<8x32xf32>
    %121 = tpu.matmul %119, %120, %cst_48 {dimension_numbers = #tpu.dot_dimension_numbers<[1], [0], [0], [1], [0, 0, 1, 1], [], []>} : vector<8x8xbf16>, vector<8x32xbf16>, vector<8x32xf32> -> vector<8x32xf32>
    %122 = arith.addf %100, %121 : vector<8x32xf32>
    %123 = vector.broadcast %28 : vector<1x32xf32> to vector<8x32xf32>
    %124 = arith.addf %122, %123 : vector<8x32xf32>
    %c1 = arith.constant 1 : index
    %c0_49 = arith.constant 0 : index
    %c0_50 = arith.constant 0 : index
    %125 = vector.load %arg2[%c1, %c0_49, %c0_50] : memref<2x1x8xf32, #tpu.memory_space<vmem>>, vector<1x1x8xf32>
    %126 = vector.shape_cast %125 : vector<1x1x8xf32> to vector<1x8xf32>
    %127 = vector.extract_strided_slice %22 {offsets = [8, 0], sizes = [8, 32], strides = [1, 1]} : vector<16x32xbf16> to vector<8x32xbf16>
    %128 = vector.extract_strided_slice %23 {offsets = [8, 0], sizes = [8, 32], strides = [1, 1]} : vector<16x32xbf16> to vector<8x32xbf16>
    %129 = vector.extract_strided_slice %24 {offsets = [8, 0], sizes = [8, 32], strides = [1, 1]} : vector<16x32xbf16> to vector<8x32xbf16>
    %cst_51 = arith.constant 0.000000e+00 : f32
    %130 = vector.broadcast %cst_51 : f32 to vector<8x32xf32>
    %131 = vector.extract_strided_slice %127 {offsets = [0, 0], sizes = [8, 8], strides = [1, 1]} : vector<8x32xbf16> to vector<8x8xbf16>
    %132 = vector.extract_strided_slice %128 {offsets = [0, 0], sizes = [8, 8], strides = [1, 1]} : vector<8x32xbf16> to vector<8x8xbf16>
    %cst_52 = arith.constant dense<0.000000e+00> : vector<8x8xf32>
    %133 = tpu.matmul %131, %132, %cst_52 {dimension_numbers = #tpu.dot_dimension_numbers<[1], [1], [0], [0], [0, 0, 1, 0], [], []>} : vector<8x8xbf16>, vector<8x8xbf16>, vector<8x8xf32> -> vector<8x8xf32>
    %134 = vector.broadcast %126 : vector<1x8xf32> to vector<8x8xf32>
    %135 = arith.addf %133, %134 : vector<8x8xf32>
    %cst_53 = arith.constant dense<0xFF800000> : vector<8xf32>
    %136 = vector.multi_reduction <maximumf>, %135, %cst_53 [1] : vector<8x8xf32> to vector<8xf32>
    %137 = vector.shape_cast %136 : vector<8xf32> to vector<8x1xf32>
    %138 = vector.broadcast %137 : vector<8x1xf32> to vector<8x8xf32>
    %139 = arith.subf %135, %138 : vector<8x8xf32>
    %140 = math.exp %139 : vector<8x8xf32>
    %cst_54 = arith.constant dense<0.000000e+00> : vector<8xf32>
    %141 = vector.multi_reduction <add>, %140, %cst_54 [1] : vector<8x8xf32> to vector<8xf32>
    %142 = vector.shape_cast %141 : vector<8xf32> to vector<8x1xf32>
    %143 = tpu.reciprocal %142 {approx = true} : vector<8x1xf32> -> vector<8x1xf32>
    %144 = vector.broadcast %143 : vector<8x1xf32> to vector<8x8xf32>
    %145 = arith.mulf %140, %144 : vector<8x8xf32>
    %146 = arith.truncf %145 : vector<8x8xf32> to vector<8x8xbf16>
    %147 = vector.extract_strided_slice %129 {offsets = [0, 0], sizes = [8, 8], strides = [1, 1]} : vector<8x32xbf16> to vector<8x8xbf16>
    %cst_55 = arith.constant dense<0.000000e+00> : vector<8x8xf32>
    %148 = tpu.matmul %146, %147, %cst_55 {dimension_numbers = #tpu.dot_dimension_numbers<[1], [0], [0], [1], [0, 0, 1, 1], [], []>} : vector<8x8xbf16>, vector<8x8xbf16>, vector<8x8xf32> -> vector<8x8xf32>
    %149 = arith.truncf %148 : vector<8x8xf32> to vector<8x8xbf16>
    %150 = vector.extract_strided_slice %26 {offsets = [0, 0], sizes = [8, 32], strides = [1, 1]} : vector<32x32xbf16> to vector<8x32xbf16>
    %cst_56 = arith.constant dense<0.000000e+00> : vector<8x32xf32>
    %151 = tpu.matmul %149, %150, %cst_56 {dimension_numbers = #tpu.dot_dimension_numbers<[1], [0], [0], [1], [0, 0, 1, 1], [], []>} : vector<8x8xbf16>, vector<8x32xbf16>, vector<8x32xf32> -> vector<8x32xf32>
    %152 = arith.addf %130, %151 : vector<8x32xf32>
    %153 = vector.extract_strided_slice %127 {offsets = [0, 8], sizes = [8, 8], strides = [1, 1]} : vector<8x32xbf16> to vector<8x8xbf16>
    %154 = vector.extract_strided_slice %128 {offsets = [0, 8], sizes = [8, 8], strides = [1, 1]} : vector<8x32xbf16> to vector<8x8xbf16>
    %cst_57 = arith.constant dense<0.000000e+00> : vector<8x8xf32>
    %155 = tpu.matmul %153, %154, %cst_57 {dimension_numbers = #tpu.dot_dimension_numbers<[1], [1], [0], [0], [0, 0, 1, 0], [], []>} : vector<8x8xbf16>, vector<8x8xbf16>, vector<8x8xf32> -> vector<8x8xf32>
    %156 = vector.broadcast %126 : vector<1x8xf32> to vector<8x8xf32>
    %157 = arith.addf %155, %156 : vector<8x8xf32>
    %cst_58 = arith.constant dense<0xFF800000> : vector<8xf32>
    %158 = vector.multi_reduction <maximumf>, %157, %cst_58 [1] : vector<8x8xf32> to vector<8xf32>
    %159 = vector.shape_cast %158 : vector<8xf32> to vector<8x1xf32>
    %160 = vector.broadcast %159 : vector<8x1xf32> to vector<8x8xf32>
    %161 = arith.subf %157, %160 : vector<8x8xf32>
    %162 = math.exp %161 : vector<8x8xf32>
    %cst_59 = arith.constant dense<0.000000e+00> : vector<8xf32>
    %163 = vector.multi_reduction <add>, %162, %cst_59 [1] : vector<8x8xf32> to vector<8xf32>
    %164 = vector.shape_cast %163 : vector<8xf32> to vector<8x1xf32>
    %165 = tpu.reciprocal %164 {approx = true} : vector<8x1xf32> -> vector<8x1xf32>
    %166 = vector.broadcast %165 : vector<8x1xf32> to vector<8x8xf32>
    %167 = arith.mulf %162, %166 : vector<8x8xf32>
    %168 = arith.truncf %167 : vector<8x8xf32> to vector<8x8xbf16>
    %169 = vector.extract_strided_slice %129 {offsets = [0, 8], sizes = [8, 8], strides = [1, 1]} : vector<8x32xbf16> to vector<8x8xbf16>
    %cst_60 = arith.constant dense<0.000000e+00> : vector<8x8xf32>
    %170 = tpu.matmul %168, %169, %cst_60 {dimension_numbers = #tpu.dot_dimension_numbers<[1], [0], [0], [1], [0, 0, 1, 1], [], []>} : vector<8x8xbf16>, vector<8x8xbf16>, vector<8x8xf32> -> vector<8x8xf32>
    %171 = arith.truncf %170 : vector<8x8xf32> to vector<8x8xbf16>
    %172 = vector.extract_strided_slice %26 {offsets = [8, 0], sizes = [8, 32], strides = [1, 1]} : vector<32x32xbf16> to vector<8x32xbf16>
    %cst_61 = arith.constant dense<0.000000e+00> : vector<8x32xf32>
    %173 = tpu.matmul %171, %172, %cst_61 {dimension_numbers = #tpu.dot_dimension_numbers<[1], [0], [0], [1], [0, 0, 1, 1], [], []>} : vector<8x8xbf16>, vector<8x32xbf16>, vector<8x32xf32> -> vector<8x32xf32>
    %174 = arith.addf %152, %173 : vector<8x32xf32>
    %175 = vector.extract_strided_slice %127 {offsets = [0, 16], sizes = [8, 8], strides = [1, 1]} : vector<8x32xbf16> to vector<8x8xbf16>
    %176 = vector.extract_strided_slice %128 {offsets = [0, 16], sizes = [8, 8], strides = [1, 1]} : vector<8x32xbf16> to vector<8x8xbf16>
    %cst_62 = arith.constant dense<0.000000e+00> : vector<8x8xf32>
    %177 = tpu.matmul %175, %176, %cst_62 {dimension_numbers = #tpu.dot_dimension_numbers<[1], [1], [0], [0], [0, 0, 1, 0], [], []>} : vector<8x8xbf16>, vector<8x8xbf16>, vector<8x8xf32> -> vector<8x8xf32>
    %178 = vector.broadcast %126 : vector<1x8xf32> to vector<8x8xf32>
    %179 = arith.addf %177, %178 : vector<8x8xf32>
    %cst_63 = arith.constant dense<0xFF800000> : vector<8xf32>
    %180 = vector.multi_reduction <maximumf>, %179, %cst_63 [1] : vector<8x8xf32> to vector<8xf32>
    %181 = vector.shape_cast %180 : vector<8xf32> to vector<8x1xf32>
    %182 = vector.broadcast %181 : vector<8x1xf32> to vector<8x8xf32>
    %183 = arith.subf %179, %182 : vector<8x8xf32>
    %184 = math.exp %183 : vector<8x8xf32>
    %cst_64 = arith.constant dense<0.000000e+00> : vector<8xf32>
    %185 = vector.multi_reduction <add>, %184, %cst_64 [1] : vector<8x8xf32> to vector<8xf32>
    %186 = vector.shape_cast %185 : vector<8xf32> to vector<8x1xf32>
    %187 = tpu.reciprocal %186 {approx = true} : vector<8x1xf32> -> vector<8x1xf32>
    %188 = vector.broadcast %187 : vector<8x1xf32> to vector<8x8xf32>
    %189 = arith.mulf %184, %188 : vector<8x8xf32>
    %190 = arith.truncf %189 : vector<8x8xf32> to vector<8x8xbf16>
    %191 = vector.extract_strided_slice %129 {offsets = [0, 16], sizes = [8, 8], strides = [1, 1]} : vector<8x32xbf16> to vector<8x8xbf16>
    %cst_65 = arith.constant dense<0.000000e+00> : vector<8x8xf32>
    %192 = tpu.matmul %190, %191, %cst_65 {dimension_numbers = #tpu.dot_dimension_numbers<[1], [0], [0], [1], [0, 0, 1, 1], [], []>} : vector<8x8xbf16>, vector<8x8xbf16>, vector<8x8xf32> -> vector<8x8xf32>
    %193 = arith.truncf %192 : vector<8x8xf32> to vector<8x8xbf16>
    %194 = vector.extract_strided_slice %26 {offsets = [16, 0], sizes = [8, 32], strides = [1, 1]} : vector<32x32xbf16> to vector<8x32xbf16>
    %cst_66 = arith.constant dense<0.000000e+00> : vector<8x32xf32>
    %195 = tpu.matmul %193, %194, %cst_66 {dimension_numbers = #tpu.dot_dimension_numbers<[1], [0], [0], [1], [0, 0, 1, 1], [], []>} : vector<8x8xbf16>, vector<8x32xbf16>, vector<8x32xf32> -> vector<8x32xf32>
    %196 = arith.addf %174, %195 : vector<8x32xf32>
    %197 = vector.extract_strided_slice %127 {offsets = [0, 24], sizes = [8, 8], strides = [1, 1]} : vector<8x32xbf16> to vector<8x8xbf16>
    %198 = vector.extract_strided_slice %128 {offsets = [0, 24], sizes = [8, 8], strides = [1, 1]} : vector<8x32xbf16> to vector<8x8xbf16>
    %cst_67 = arith.constant dense<0.000000e+00> : vector<8x8xf32>
    %199 = tpu.matmul %197, %198, %cst_67 {dimension_numbers = #tpu.dot_dimension_numbers<[1], [1], [0], [0], [0, 0, 1, 0], [], []>} : vector<8x8xbf16>, vector<8x8xbf16>, vector<8x8xf32> -> vector<8x8xf32>
    %200 = vector.broadcast %126 : vector<1x8xf32> to vector<8x8xf32>
    %201 = arith.addf %199, %200 : vector<8x8xf32>
    %cst_68 = arith.constant dense<0xFF800000> : vector<8xf32>
    %202 = vector.multi_reduction <maximumf>, %201, %cst_68 [1] : vector<8x8xf32> to vector<8xf32>
    %203 = vector.shape_cast %202 : vector<8xf32> to vector<8x1xf32>
    %204 = vector.broadcast %203 : vector<8x1xf32> to vector<8x8xf32>
    %205 = arith.subf %201, %204 : vector<8x8xf32>
    %206 = math.exp %205 : vector<8x8xf32>
    %cst_69 = arith.constant dense<0.000000e+00> : vector<8xf32>
    %207 = vector.multi_reduction <add>, %206, %cst_69 [1] : vector<8x8xf32> to vector<8xf32>
    %208 = vector.shape_cast %207 : vector<8xf32> to vector<8x1xf32>
    %209 = tpu.reciprocal %208 {approx = true} : vector<8x1xf32> -> vector<8x1xf32>
    %210 = vector.broadcast %209 : vector<8x1xf32> to vector<8x8xf32>
    %211 = arith.mulf %206, %210 : vector<8x8xf32>
    %212 = arith.truncf %211 : vector<8x8xf32> to vector<8x8xbf16>
    %213 = vector.extract_strided_slice %129 {offsets = [0, 24], sizes = [8, 8], strides = [1, 1]} : vector<8x32xbf16> to vector<8x8xbf16>
    %cst_70 = arith.constant dense<0.000000e+00> : vector<8x8xf32>
    %214 = tpu.matmul %212, %213, %cst_70 {dimension_numbers = #tpu.dot_dimension_numbers<[1], [0], [0], [1], [0, 0, 1, 1], [], []>} : vector<8x8xbf16>, vector<8x8xbf16>, vector<8x8xf32> -> vector<8x8xf32>
    %215 = arith.truncf %214 : vector<8x8xf32> to vector<8x8xbf16>
    %216 = vector.extract_strided_slice %26 {offsets = [24, 0], sizes = [8, 32], strides = [1, 1]} : vector<32x32xbf16> to vector<8x32xbf16>
    %cst_71 = arith.constant dense<0.000000e+00> : vector<8x32xf32>
    %217 = tpu.matmul %215, %216, %cst_71 {dimension_numbers = #tpu.dot_dimension_numbers<[1], [0], [0], [1], [0, 0, 1, 1], [], []>} : vector<8x8xbf16>, vector<8x32xbf16>, vector<8x32xf32> -> vector<8x32xf32>
    %218 = arith.addf %196, %217 : vector<8x32xf32>
    %219 = vector.broadcast %28 : vector<1x32xf32> to vector<8x32xf32>
    %220 = arith.addf %218, %219 : vector<8x32xf32>
    %221 = tpu.concatenate %124, %220 in 0 : vector<8x32xf32>, vector<8x32xf32> -> vector<16x32xf32>
    %222 = arith.addf %221, %3 : vector<16x32xf32>
    %223 = vector.extract_strided_slice %8 {offsets = [0, 0, 0], sizes = [1, 1, 32], strides = [1, 1, 1]} : vector<3x1x32xf32> to vector<1x1x32xf32>
    %224 = vector.shape_cast %223 : vector<1x1x32xf32> to vector<1x32xf32>
    %225 = vector.extract_strided_slice %10 {offsets = [0, 0, 0], sizes = [1, 1, 32], strides = [1, 1, 1]} : vector<3x1x32xf32> to vector<1x1x32xf32>
    %226 = vector.shape_cast %225 : vector<1x1x32xf32> to vector<1x32xf32>
    %cst_72 = arith.constant dense<0.000000e+00> : vector<16xf32>
    %227 = vector.multi_reduction <add>, %222, %cst_72 [1] : vector<16x32xf32> to vector<16xf32>
    %228 = vector.shape_cast %227 : vector<16xf32> to vector<16x1xf32>
    %cst_73 = arith.constant 3.200000e+01 : f32
    %229 = vector.broadcast %cst_73 : f32 to vector<16x1xf32>
    %230 = arith.divf %228, %229 : vector<16x1xf32>
    %231 = vector.broadcast %230 : vector<16x1xf32> to vector<16x32xf32>
    %232 = arith.subf %222, %231 : vector<16x32xf32>
    %233 = arith.mulf %232, %232 : vector<16x32xf32>
    %cst_74 = arith.constant dense<0.000000e+00> : vector<16xf32>
    %234 = vector.multi_reduction <add>, %233, %cst_74 [1] : vector<16x32xf32> to vector<16xf32>
    %235 = vector.shape_cast %234 : vector<16xf32> to vector<16x1xf32>
    %cst_75 = arith.constant 3.200000e+01 : f32
    %236 = vector.broadcast %cst_75 : f32 to vector<16x1xf32>
    %237 = arith.divf %235, %236 : vector<16x1xf32>
    %238 = vector.broadcast %230 : vector<16x1xf32> to vector<16x32xf32>
    %239 = arith.subf %222, %238 : vector<16x32xf32>
    %cst_76 = arith.constant 9.99999974E-6 : f32
    %240 = vector.broadcast %cst_76 : f32 to vector<16x1xf32>
    %241 = arith.addf %237, %240 : vector<16x1xf32>
    %242 = math.rsqrt %241 : vector<16x1xf32>
    %243 = vector.broadcast %242 : vector<16x1xf32> to vector<16x32xf32>
    %244 = arith.mulf %239, %243 : vector<16x32xf32>
    %245 = vector.broadcast %224 : vector<1x32xf32> to vector<16x32xf32>
    %246 = arith.mulf %244, %245 : vector<16x32xf32>
    %247 = vector.broadcast %226 : vector<1x32xf32> to vector<16x32xf32>
    %248 = arith.addf %246, %247 : vector<16x32xf32>
    %249 = arith.truncf %248 : vector<16x32xf32> to vector<16x32xbf16>
    %c0_77 = arith.constant 0 : index
    %c0_78 = arith.constant 0 : index
    %c0_79 = arith.constant 0 : index
    %250 = vector.load %arg10[%c0_77, %c0_78, %c0_79] : memref<1x32x32xbf16, #tpu.memory_space<vmem>>, vector<1x32x32xbf16>
    %251 = vector.shape_cast %250 : vector<1x32x32xbf16> to vector<32x32xbf16>
    %cst_80 = arith.constant dense<0.000000e+00> : vector<16x32xf32>
    %252 = tpu.matmul %249, %251, %cst_80 {dimension_numbers = #tpu.dot_dimension_numbers<[1], [0], [0], [1], [0, 0, 1, 1], [], []>} : vector<16x32xbf16>, vector<32x32xbf16>, vector<16x32xf32> -> vector<16x32xf32>
    %c0_81 = arith.constant 0 : index
    %c0_82 = arith.constant 0 : index
    %c0_83 = arith.constant 0 : index
    %253 = vector.load %arg11[%c0_81, %c0_82, %c0_83] : memref<1x1x32xf32, #tpu.memory_space<vmem>>, vector<1x1x32xf32>
    %254 = vector.shape_cast %253 : vector<1x1x32xf32> to vector<1x32xf32>
    %255 = vector.broadcast %254 : vector<1x32xf32> to vector<16x32xf32>
    %256 = arith.addf %252, %255 : vector<16x32xf32>
    %c0_84 = arith.constant 0 : index
    %c0_85 = arith.constant 0 : index
    %c0_86 = arith.constant 0 : index
    %257 = vector.load %arg12[%c0_84, %c0_85, %c0_86] : memref<1x32x64xbf16, #tpu.memory_space<vmem>>, vector<1x32x64xbf16>
    %258 = vector.shape_cast %257 : vector<1x32x64xbf16> to vector<32x64xbf16>
    %cst_87 = arith.constant dense<0.000000e+00> : vector<16x64xf32>
    %259 = tpu.matmul %6, %258, %cst_87 {dimension_numbers = #tpu.dot_dimension_numbers<[1], [0], [0], [1], [0, 0, 1, 1], [], []>} : vector<16x32xbf16>, vector<32x64xbf16>, vector<16x64xf32> -> vector<16x64xf32>
    %c0_88 = arith.constant 0 : index
    %c0_89 = arith.constant 0 : index
    %c0_90 = arith.constant 0 : index
    %260 = vector.load %arg13[%c0_88, %c0_89, %c0_90] : memref<1x1x64xf32, #tpu.memory_space<vmem>>, vector<1x1x64xf32>
    %261 = vector.shape_cast %260 : vector<1x1x64xf32> to vector<1x64xf32>
    %262 = vector.broadcast %261 : vector<1x64xf32> to vector<16x64xf32>
    %263 = arith.addf %259, %262 : vector<16x64xf32>
    %264 = vector.extract_strided_slice %263 {offsets = [0, 0], sizes = [16, 32], strides = [1, 1]} : vector<16x64xf32> to vector<16x32xf32>
    %265 = vector.extract_strided_slice %263 {offsets = [0, 32], sizes = [16, 32], strides = [1, 1]} : vector<16x64xf32> to vector<16x32xf32>
    %266 = arith.truncf %256 : vector<16x32xf32> to vector<16x32xbf16>
    %267 = arith.truncf %264 : vector<16x32xf32> to vector<16x32xbf16>
    %268 = arith.truncf %265 : vector<16x32xf32> to vector<16x32xbf16>
    %c0_91 = arith.constant 0 : index
    %c0_92 = arith.constant 0 : index
    %c0_93 = arith.constant 0 : index
    %269 = vector.load %arg14[%c0_91, %c0_92, %c0_93] : memref<1x32x32xbf16, #tpu.memory_space<vmem>>, vector<1x32x32xbf16>
    %270 = vector.shape_cast %269 : vector<1x32x32xbf16> to vector<32x32xbf16>
    %c0_94 = arith.constant 0 : index
    %c0_95 = arith.constant 0 : index
    %c0_96 = arith.constant 0 : index
    %271 = vector.load %arg15[%c0_94, %c0_95, %c0_96] : memref<1x1x32xf32, #tpu.memory_space<vmem>>, vector<1x1x32xf32>
    %272 = vector.shape_cast %271 : vector<1x1x32xf32> to vector<1x32xf32>
    %c0_97 = arith.constant 0 : index
    %c0_98 = arith.constant 0 : index
    %c0_99 = arith.constant 0 : index
    %273 = vector.load %arg3[%c0_97, %c0_98, %c0_99] : memref<2x1x8xf32, #tpu.memory_space<vmem>>, vector<1x1x8xf32>
    %274 = vector.shape_cast %273 : vector<1x1x8xf32> to vector<1x8xf32>
    %275 = vector.extract_strided_slice %266 {offsets = [0, 0], sizes = [8, 32], strides = [1, 1]} : vector<16x32xbf16> to vector<8x32xbf16>
    %276 = vector.extract_strided_slice %267 {offsets = [0, 0], sizes = [8, 32], strides = [1, 1]} : vector<16x32xbf16> to vector<8x32xbf16>
    %277 = vector.extract_strided_slice %268 {offsets = [0, 0], sizes = [8, 32], strides = [1, 1]} : vector<16x32xbf16> to vector<8x32xbf16>
    %cst_100 = arith.constant 0.000000e+00 : f32
    %278 = vector.broadcast %cst_100 : f32 to vector<8x32xf32>
    %279 = vector.extract_strided_slice %275 {offsets = [0, 0], sizes = [8, 8], strides = [1, 1]} : vector<8x32xbf16> to vector<8x8xbf16>
    %280 = vector.extract_strided_slice %276 {offsets = [0, 0], sizes = [8, 8], strides = [1, 1]} : vector<8x32xbf16> to vector<8x8xbf16>
    %cst_101 = arith.constant dense<0.000000e+00> : vector<8x8xf32>
    %281 = tpu.matmul %279, %280, %cst_101 {dimension_numbers = #tpu.dot_dimension_numbers<[1], [1], [0], [0], [0, 0, 1, 0], [], []>} : vector<8x8xbf16>, vector<8x8xbf16>, vector<8x8xf32> -> vector<8x8xf32>
    %282 = vector.broadcast %274 : vector<1x8xf32> to vector<8x8xf32>
    %283 = arith.addf %281, %282 : vector<8x8xf32>
    %cst_102 = arith.constant dense<0xFF800000> : vector<8xf32>
    %284 = vector.multi_reduction <maximumf>, %283, %cst_102 [1] : vector<8x8xf32> to vector<8xf32>
    %285 = vector.shape_cast %284 : vector<8xf32> to vector<8x1xf32>
    %286 = vector.broadcast %285 : vector<8x1xf32> to vector<8x8xf32>
    %287 = arith.subf %283, %286 : vector<8x8xf32>
    %288 = math.exp %287 : vector<8x8xf32>
    %cst_103 = arith.constant dense<0.000000e+00> : vector<8xf32>
    %289 = vector.multi_reduction <add>, %288, %cst_103 [1] : vector<8x8xf32> to vector<8xf32>
    %290 = vector.shape_cast %289 : vector<8xf32> to vector<8x1xf32>
    %291 = tpu.reciprocal %290 {approx = true} : vector<8x1xf32> -> vector<8x1xf32>
    %292 = vector.broadcast %291 : vector<8x1xf32> to vector<8x8xf32>
    %293 = arith.mulf %288, %292 : vector<8x8xf32>
    %294 = arith.truncf %293 : vector<8x8xf32> to vector<8x8xbf16>
    %295 = vector.extract_strided_slice %277 {offsets = [0, 0], sizes = [8, 8], strides = [1, 1]} : vector<8x32xbf16> to vector<8x8xbf16>
    %cst_104 = arith.constant dense<0.000000e+00> : vector<8x8xf32>
    %296 = tpu.matmul %294, %295, %cst_104 {dimension_numbers = #tpu.dot_dimension_numbers<[1], [0], [0], [1], [0, 0, 1, 1], [], []>} : vector<8x8xbf16>, vector<8x8xbf16>, vector<8x8xf32> -> vector<8x8xf32>
    %297 = arith.truncf %296 : vector<8x8xf32> to vector<8x8xbf16>
    %298 = vector.extract_strided_slice %270 {offsets = [0, 0], sizes = [8, 32], strides = [1, 1]} : vector<32x32xbf16> to vector<8x32xbf16>
    %cst_105 = arith.constant dense<0.000000e+00> : vector<8x32xf32>
    %299 = tpu.matmul %297, %298, %cst_105 {dimension_numbers = #tpu.dot_dimension_numbers<[1], [0], [0], [1], [0, 0, 1, 1], [], []>} : vector<8x8xbf16>, vector<8x32xbf16>, vector<8x32xf32> -> vector<8x32xf32>
    %300 = arith.addf %278, %299 : vector<8x32xf32>
    %301 = vector.extract_strided_slice %275 {offsets = [0, 8], sizes = [8, 8], strides = [1, 1]} : vector<8x32xbf16> to vector<8x8xbf16>
    %302 = vector.extract_strided_slice %276 {offsets = [0, 8], sizes = [8, 8], strides = [1, 1]} : vector<8x32xbf16> to vector<8x8xbf16>
    %cst_106 = arith.constant dense<0.000000e+00> : vector<8x8xf32>
    %303 = tpu.matmul %301, %302, %cst_106 {dimension_numbers = #tpu.dot_dimension_numbers<[1], [1], [0], [0], [0, 0, 1, 0], [], []>} : vector<8x8xbf16>, vector<8x8xbf16>, vector<8x8xf32> -> vector<8x8xf32>
    %304 = vector.broadcast %274 : vector<1x8xf32> to vector<8x8xf32>
    %305 = arith.addf %303, %304 : vector<8x8xf32>
    %cst_107 = arith.constant dense<0xFF800000> : vector<8xf32>
    %306 = vector.multi_reduction <maximumf>, %305, %cst_107 [1] : vector<8x8xf32> to vector<8xf32>
    %307 = vector.shape_cast %306 : vector<8xf32> to vector<8x1xf32>
    %308 = vector.broadcast %307 : vector<8x1xf32> to vector<8x8xf32>
    %309 = arith.subf %305, %308 : vector<8x8xf32>
    %310 = math.exp %309 : vector<8x8xf32>
    %cst_108 = arith.constant dense<0.000000e+00> : vector<8xf32>
    %311 = vector.multi_reduction <add>, %310, %cst_108 [1] : vector<8x8xf32> to vector<8xf32>
    %312 = vector.shape_cast %311 : vector<8xf32> to vector<8x1xf32>
    %313 = tpu.reciprocal %312 {approx = true} : vector<8x1xf32> -> vector<8x1xf32>
    %314 = vector.broadcast %313 : vector<8x1xf32> to vector<8x8xf32>
    %315 = arith.mulf %310, %314 : vector<8x8xf32>
    %316 = arith.truncf %315 : vector<8x8xf32> to vector<8x8xbf16>
    %317 = vector.extract_strided_slice %277 {offsets = [0, 8], sizes = [8, 8], strides = [1, 1]} : vector<8x32xbf16> to vector<8x8xbf16>
    %cst_109 = arith.constant dense<0.000000e+00> : vector<8x8xf32>
    %318 = tpu.matmul %316, %317, %cst_109 {dimension_numbers = #tpu.dot_dimension_numbers<[1], [0], [0], [1], [0, 0, 1, 1], [], []>} : vector<8x8xbf16>, vector<8x8xbf16>, vector<8x8xf32> -> vector<8x8xf32>
    %319 = arith.truncf %318 : vector<8x8xf32> to vector<8x8xbf16>
    %320 = vector.extract_strided_slice %270 {offsets = [8, 0], sizes = [8, 32], strides = [1, 1]} : vector<32x32xbf16> to vector<8x32xbf16>
    %cst_110 = arith.constant dense<0.000000e+00> : vector<8x32xf32>
    %321 = tpu.matmul %319, %320, %cst_110 {dimension_numbers = #tpu.dot_dimension_numbers<[1], [0], [0], [1], [0, 0, 1, 1], [], []>} : vector<8x8xbf16>, vector<8x32xbf16>, vector<8x32xf32> -> vector<8x32xf32>
    %322 = arith.addf %300, %321 : vector<8x32xf32>
    %323 = vector.extract_strided_slice %275 {offsets = [0, 16], sizes = [8, 8], strides = [1, 1]} : vector<8x32xbf16> to vector<8x8xbf16>
    %324 = vector.extract_strided_slice %276 {offsets = [0, 16], sizes = [8, 8], strides = [1, 1]} : vector<8x32xbf16> to vector<8x8xbf16>
    %cst_111 = arith.constant dense<0.000000e+00> : vector<8x8xf32>
    %325 = tpu.matmul %323, %324, %cst_111 {dimension_numbers = #tpu.dot_dimension_numbers<[1], [1], [0], [0], [0, 0, 1, 0], [], []>} : vector<8x8xbf16>, vector<8x8xbf16>, vector<8x8xf32> -> vector<8x8xf32>
    %326 = vector.broadcast %274 : vector<1x8xf32> to vector<8x8xf32>
    %327 = arith.addf %325, %326 : vector<8x8xf32>
    %cst_112 = arith.constant dense<0xFF800000> : vector<8xf32>
    %328 = vector.multi_reduction <maximumf>, %327, %cst_112 [1] : vector<8x8xf32> to vector<8xf32>
    %329 = vector.shape_cast %328 : vector<8xf32> to vector<8x1xf32>
    %330 = vector.broadcast %329 : vector<8x1xf32> to vector<8x8xf32>
    %331 = arith.subf %327, %330 : vector<8x8xf32>
    %332 = math.exp %331 : vector<8x8xf32>
    %cst_113 = arith.constant dense<0.000000e+00> : vector<8xf32>
    %333 = vector.multi_reduction <add>, %332, %cst_113 [1] : vector<8x8xf32> to vector<8xf32>
    %334 = vector.shape_cast %333 : vector<8xf32> to vector<8x1xf32>
    %335 = tpu.reciprocal %334 {approx = true} : vector<8x1xf32> -> vector<8x1xf32>
    %336 = vector.broadcast %335 : vector<8x1xf32> to vector<8x8xf32>
    %337 = arith.mulf %332, %336 : vector<8x8xf32>
    %338 = arith.truncf %337 : vector<8x8xf32> to vector<8x8xbf16>
    %339 = vector.extract_strided_slice %277 {offsets = [0, 16], sizes = [8, 8], strides = [1, 1]} : vector<8x32xbf16> to vector<8x8xbf16>
    %cst_114 = arith.constant dense<0.000000e+00> : vector<8x8xf32>
    %340 = tpu.matmul %338, %339, %cst_114 {dimension_numbers = #tpu.dot_dimension_numbers<[1], [0], [0], [1], [0, 0, 1, 1], [], []>} : vector<8x8xbf16>, vector<8x8xbf16>, vector<8x8xf32> -> vector<8x8xf32>
    %341 = arith.truncf %340 : vector<8x8xf32> to vector<8x8xbf16>
    %342 = vector.extract_strided_slice %270 {offsets = [16, 0], sizes = [8, 32], strides = [1, 1]} : vector<32x32xbf16> to vector<8x32xbf16>
    %cst_115 = arith.constant dense<0.000000e+00> : vector<8x32xf32>
    %343 = tpu.matmul %341, %342, %cst_115 {dimension_numbers = #tpu.dot_dimension_numbers<[1], [0], [0], [1], [0, 0, 1, 1], [], []>} : vector<8x8xbf16>, vector<8x32xbf16>, vector<8x32xf32> -> vector<8x32xf32>
    %344 = arith.addf %322, %343 : vector<8x32xf32>
    %345 = vector.extract_strided_slice %275 {offsets = [0, 24], sizes = [8, 8], strides = [1, 1]} : vector<8x32xbf16> to vector<8x8xbf16>
    %346 = vector.extract_strided_slice %276 {offsets = [0, 24], sizes = [8, 8], strides = [1, 1]} : vector<8x32xbf16> to vector<8x8xbf16>
    %cst_116 = arith.constant dense<0.000000e+00> : vector<8x8xf32>
    %347 = tpu.matmul %345, %346, %cst_116 {dimension_numbers = #tpu.dot_dimension_numbers<[1], [1], [0], [0], [0, 0, 1, 0], [], []>} : vector<8x8xbf16>, vector<8x8xbf16>, vector<8x8xf32> -> vector<8x8xf32>
    %348 = vector.broadcast %274 : vector<1x8xf32> to vector<8x8xf32>
    %349 = arith.addf %347, %348 : vector<8x8xf32>
    %cst_117 = arith.constant dense<0xFF800000> : vector<8xf32>
    %350 = vector.multi_reduction <maximumf>, %349, %cst_117 [1] : vector<8x8xf32> to vector<8xf32>
    %351 = vector.shape_cast %350 : vector<8xf32> to vector<8x1xf32>
    %352 = vector.broadcast %351 : vector<8x1xf32> to vector<8x8xf32>
    %353 = arith.subf %349, %352 : vector<8x8xf32>
    %354 = math.exp %353 : vector<8x8xf32>
    %cst_118 = arith.constant dense<0.000000e+00> : vector<8xf32>
    %355 = vector.multi_reduction <add>, %354, %cst_118 [1] : vector<8x8xf32> to vector<8xf32>
    %356 = vector.shape_cast %355 : vector<8xf32> to vector<8x1xf32>
    %357 = tpu.reciprocal %356 {approx = true} : vector<8x1xf32> -> vector<8x1xf32>
    %358 = vector.broadcast %357 : vector<8x1xf32> to vector<8x8xf32>
    %359 = arith.mulf %354, %358 : vector<8x8xf32>
    %360 = arith.truncf %359 : vector<8x8xf32> to vector<8x8xbf16>
    %361 = vector.extract_strided_slice %277 {offsets = [0, 24], sizes = [8, 8], strides = [1, 1]} : vector<8x32xbf16> to vector<8x8xbf16>
    %cst_119 = arith.constant dense<0.000000e+00> : vector<8x8xf32>
    %362 = tpu.matmul %360, %361, %cst_119 {dimension_numbers = #tpu.dot_dimension_numbers<[1], [0], [0], [1], [0, 0, 1, 1], [], []>} : vector<8x8xbf16>, vector<8x8xbf16>, vector<8x8xf32> -> vector<8x8xf32>
    %363 = arith.truncf %362 : vector<8x8xf32> to vector<8x8xbf16>
    %364 = vector.extract_strided_slice %270 {offsets = [24, 0], sizes = [8, 32], strides = [1, 1]} : vector<32x32xbf16> to vector<8x32xbf16>
    %cst_120 = arith.constant dense<0.000000e+00> : vector<8x32xf32>
    %365 = tpu.matmul %363, %364, %cst_120 {dimension_numbers = #tpu.dot_dimension_numbers<[1], [0], [0], [1], [0, 0, 1, 1], [], []>} : vector<8x8xbf16>, vector<8x32xbf16>, vector<8x32xf32> -> vector<8x32xf32>
    %366 = arith.addf %344, %365 : vector<8x32xf32>
    %367 = vector.broadcast %272 : vector<1x32xf32> to vector<8x32xf32>
    %368 = arith.addf %366, %367 : vector<8x32xf32>
    %c1_121 = arith.constant 1 : index
    %c0_122 = arith.constant 0 : index
    %c0_123 = arith.constant 0 : index
    %369 = vector.load %arg3[%c1_121, %c0_122, %c0_123] : memref<2x1x8xf32, #tpu.memory_space<vmem>>, vector<1x1x8xf32>
    %370 = vector.shape_cast %369 : vector<1x1x8xf32> to vector<1x8xf32>
    %371 = vector.extract_strided_slice %266 {offsets = [8, 0], sizes = [8, 32], strides = [1, 1]} : vector<16x32xbf16> to vector<8x32xbf16>
    %372 = vector.extract_strided_slice %267 {offsets = [8, 0], sizes = [8, 32], strides = [1, 1]} : vector<16x32xbf16> to vector<8x32xbf16>
    %373 = vector.extract_strided_slice %268 {offsets = [8, 0], sizes = [8, 32], strides = [1, 1]} : vector<16x32xbf16> to vector<8x32xbf16>
    %cst_124 = arith.constant 0.000000e+00 : f32
    %374 = vector.broadcast %cst_124 : f32 to vector<8x32xf32>
    %375 = vector.extract_strided_slice %371 {offsets = [0, 0], sizes = [8, 8], strides = [1, 1]} : vector<8x32xbf16> to vector<8x8xbf16>
    %376 = vector.extract_strided_slice %372 {offsets = [0, 0], sizes = [8, 8], strides = [1, 1]} : vector<8x32xbf16> to vector<8x8xbf16>
    %cst_125 = arith.constant dense<0.000000e+00> : vector<8x8xf32>
    %377 = tpu.matmul %375, %376, %cst_125 {dimension_numbers = #tpu.dot_dimension_numbers<[1], [1], [0], [0], [0, 0, 1, 0], [], []>} : vector<8x8xbf16>, vector<8x8xbf16>, vector<8x8xf32> -> vector<8x8xf32>
    %378 = vector.broadcast %370 : vector<1x8xf32> to vector<8x8xf32>
    %379 = arith.addf %377, %378 : vector<8x8xf32>
    %cst_126 = arith.constant dense<0xFF800000> : vector<8xf32>
    %380 = vector.multi_reduction <maximumf>, %379, %cst_126 [1] : vector<8x8xf32> to vector<8xf32>
    %381 = vector.shape_cast %380 : vector<8xf32> to vector<8x1xf32>
    %382 = vector.broadcast %381 : vector<8x1xf32> to vector<8x8xf32>
    %383 = arith.subf %379, %382 : vector<8x8xf32>
    %384 = math.exp %383 : vector<8x8xf32>
    %cst_127 = arith.constant dense<0.000000e+00> : vector<8xf32>
    %385 = vector.multi_reduction <add>, %384, %cst_127 [1] : vector<8x8xf32> to vector<8xf32>
    %386 = vector.shape_cast %385 : vector<8xf32> to vector<8x1xf32>
    %387 = tpu.reciprocal %386 {approx = true} : vector<8x1xf32> -> vector<8x1xf32>
    %388 = vector.broadcast %387 : vector<8x1xf32> to vector<8x8xf32>
    %389 = arith.mulf %384, %388 : vector<8x8xf32>
    %390 = arith.truncf %389 : vector<8x8xf32> to vector<8x8xbf16>
    %391 = vector.extract_strided_slice %373 {offsets = [0, 0], sizes = [8, 8], strides = [1, 1]} : vector<8x32xbf16> to vector<8x8xbf16>
    %cst_128 = arith.constant dense<0.000000e+00> : vector<8x8xf32>
    %392 = tpu.matmul %390, %391, %cst_128 {dimension_numbers = #tpu.dot_dimension_numbers<[1], [0], [0], [1], [0, 0, 1, 1], [], []>} : vector<8x8xbf16>, vector<8x8xbf16>, vector<8x8xf32> -> vector<8x8xf32>
    %393 = arith.truncf %392 : vector<8x8xf32> to vector<8x8xbf16>
    %394 = vector.extract_strided_slice %270 {offsets = [0, 0], sizes = [8, 32], strides = [1, 1]} : vector<32x32xbf16> to vector<8x32xbf16>
    %cst_129 = arith.constant dense<0.000000e+00> : vector<8x32xf32>
    %395 = tpu.matmul %393, %394, %cst_129 {dimension_numbers = #tpu.dot_dimension_numbers<[1], [0], [0], [1], [0, 0, 1, 1], [], []>} : vector<8x8xbf16>, vector<8x32xbf16>, vector<8x32xf32> -> vector<8x32xf32>
    %396 = arith.addf %374, %395 : vector<8x32xf32>
    %397 = vector.extract_strided_slice %371 {offsets = [0, 8], sizes = [8, 8], strides = [1, 1]} : vector<8x32xbf16> to vector<8x8xbf16>
    %398 = vector.extract_strided_slice %372 {offsets = [0, 8], sizes = [8, 8], strides = [1, 1]} : vector<8x32xbf16> to vector<8x8xbf16>
    %cst_130 = arith.constant dense<0.000000e+00> : vector<8x8xf32>
    %399 = tpu.matmul %397, %398, %cst_130 {dimension_numbers = #tpu.dot_dimension_numbers<[1], [1], [0], [0], [0, 0, 1, 0], [], []>} : vector<8x8xbf16>, vector<8x8xbf16>, vector<8x8xf32> -> vector<8x8xf32>
    %400 = vector.broadcast %370 : vector<1x8xf32> to vector<8x8xf32>
    %401 = arith.addf %399, %400 : vector<8x8xf32>
    %cst_131 = arith.constant dense<0xFF800000> : vector<8xf32>
    %402 = vector.multi_reduction <maximumf>, %401, %cst_131 [1] : vector<8x8xf32> to vector<8xf32>
    %403 = vector.shape_cast %402 : vector<8xf32> to vector<8x1xf32>
    %404 = vector.broadcast %403 : vector<8x1xf32> to vector<8x8xf32>
    %405 = arith.subf %401, %404 : vector<8x8xf32>
    %406 = math.exp %405 : vector<8x8xf32>
    %cst_132 = arith.constant dense<0.000000e+00> : vector<8xf32>
    %407 = vector.multi_reduction <add>, %406, %cst_132 [1] : vector<8x8xf32> to vector<8xf32>
    %408 = vector.shape_cast %407 : vector<8xf32> to vector<8x1xf32>
    %409 = tpu.reciprocal %408 {approx = true} : vector<8x1xf32> -> vector<8x1xf32>
    %410 = vector.broadcast %409 : vector<8x1xf32> to vector<8x8xf32>
    %411 = arith.mulf %406, %410 : vector<8x8xf32>
    %412 = arith.truncf %411 : vector<8x8xf32> to vector<8x8xbf16>
    %413 = vector.extract_strided_slice %373 {offsets = [0, 8], sizes = [8, 8], strides = [1, 1]} : vector<8x32xbf16> to vector<8x8xbf16>
    %cst_133 = arith.constant dense<0.000000e+00> : vector<8x8xf32>
    %414 = tpu.matmul %412, %413, %cst_133 {dimension_numbers = #tpu.dot_dimension_numbers<[1], [0], [0], [1], [0, 0, 1, 1], [], []>} : vector<8x8xbf16>, vector<8x8xbf16>, vector<8x8xf32> -> vector<8x8xf32>
    %415 = arith.truncf %414 : vector<8x8xf32> to vector<8x8xbf16>
    %416 = vector.extract_strided_slice %270 {offsets = [8, 0], sizes = [8, 32], strides = [1, 1]} : vector<32x32xbf16> to vector<8x32xbf16>
    %cst_134 = arith.constant dense<0.000000e+00> : vector<8x32xf32>
    %417 = tpu.matmul %415, %416, %cst_134 {dimension_numbers = #tpu.dot_dimension_numbers<[1], [0], [0], [1], [0, 0, 1, 1], [], []>} : vector<8x8xbf16>, vector<8x32xbf16>, vector<8x32xf32> -> vector<8x32xf32>
    %418 = arith.addf %396, %417 : vector<8x32xf32>
    %419 = vector.extract_strided_slice %371 {offsets = [0, 16], sizes = [8, 8], strides = [1, 1]} : vector<8x32xbf16> to vector<8x8xbf16>
    %420 = vector.extract_strided_slice %372 {offsets = [0, 16], sizes = [8, 8], strides = [1, 1]} : vector<8x32xbf16> to vector<8x8xbf16>
    %cst_135 = arith.constant dense<0.000000e+00> : vector<8x8xf32>
    %421 = tpu.matmul %419, %420, %cst_135 {dimension_numbers = #tpu.dot_dimension_numbers<[1], [1], [0], [0], [0, 0, 1, 0], [], []>} : vector<8x8xbf16>, vector<8x8xbf16>, vector<8x8xf32> -> vector<8x8xf32>
    %422 = vector.broadcast %370 : vector<1x8xf32> to vector<8x8xf32>
    %423 = arith.addf %421, %422 : vector<8x8xf32>
    %cst_136 = arith.constant dense<0xFF800000> : vector<8xf32>
    %424 = vector.multi_reduction <maximumf>, %423, %cst_136 [1] : vector<8x8xf32> to vector<8xf32>
    %425 = vector.shape_cast %424 : vector<8xf32> to vector<8x1xf32>
    %426 = vector.broadcast %425 : vector<8x1xf32> to vector<8x8xf32>
    %427 = arith.subf %423, %426 : vector<8x8xf32>
    %428 = math.exp %427 : vector<8x8xf32>
    %cst_137 = arith.constant dense<0.000000e+00> : vector<8xf32>
    %429 = vector.multi_reduction <add>, %428, %cst_137 [1] : vector<8x8xf32> to vector<8xf32>
    %430 = vector.shape_cast %429 : vector<8xf32> to vector<8x1xf32>
    %431 = tpu.reciprocal %430 {approx = true} : vector<8x1xf32> -> vector<8x1xf32>
    %432 = vector.broadcast %431 : vector<8x1xf32> to vector<8x8xf32>
    %433 = arith.mulf %428, %432 : vector<8x8xf32>
    %434 = arith.truncf %433 : vector<8x8xf32> to vector<8x8xbf16>
    %435 = vector.extract_strided_slice %373 {offsets = [0, 16], sizes = [8, 8], strides = [1, 1]} : vector<8x32xbf16> to vector<8x8xbf16>
    %cst_138 = arith.constant dense<0.000000e+00> : vector<8x8xf32>
    %436 = tpu.matmul %434, %435, %cst_138 {dimension_numbers = #tpu.dot_dimension_numbers<[1], [0], [0], [1], [0, 0, 1, 1], [], []>} : vector<8x8xbf16>, vector<8x8xbf16>, vector<8x8xf32> -> vector<8x8xf32>
    %437 = arith.truncf %436 : vector<8x8xf32> to vector<8x8xbf16>
    %438 = vector.extract_strided_slice %270 {offsets = [16, 0], sizes = [8, 32], strides = [1, 1]} : vector<32x32xbf16> to vector<8x32xbf16>
    %cst_139 = arith.constant dense<0.000000e+00> : vector<8x32xf32>
    %439 = tpu.matmul %437, %438, %cst_139 {dimension_numbers = #tpu.dot_dimension_numbers<[1], [0], [0], [1], [0, 0, 1, 1], [], []>} : vector<8x8xbf16>, vector<8x32xbf16>, vector<8x32xf32> -> vector<8x32xf32>
    %440 = arith.addf %418, %439 : vector<8x32xf32>
    %441 = vector.extract_strided_slice %371 {offsets = [0, 24], sizes = [8, 8], strides = [1, 1]} : vector<8x32xbf16> to vector<8x8xbf16>
    %442 = vector.extract_strided_slice %372 {offsets = [0, 24], sizes = [8, 8], strides = [1, 1]} : vector<8x32xbf16> to vector<8x8xbf16>
    %cst_140 = arith.constant dense<0.000000e+00> : vector<8x8xf32>
    %443 = tpu.matmul %441, %442, %cst_140 {dimension_numbers = #tpu.dot_dimension_numbers<[1], [1], [0], [0], [0, 0, 1, 0], [], []>} : vector<8x8xbf16>, vector<8x8xbf16>, vector<8x8xf32> -> vector<8x8xf32>
    %444 = vector.broadcast %370 : vector<1x8xf32> to vector<8x8xf32>
    %445 = arith.addf %443, %444 : vector<8x8xf32>
    %cst_141 = arith.constant dense<0xFF800000> : vector<8xf32>
    %446 = vector.multi_reduction <maximumf>, %445, %cst_141 [1] : vector<8x8xf32> to vector<8xf32>
    %447 = vector.shape_cast %446 : vector<8xf32> to vector<8x1xf32>
    %448 = vector.broadcast %447 : vector<8x1xf32> to vector<8x8xf32>
    %449 = arith.subf %445, %448 : vector<8x8xf32>
    %450 = math.exp %449 : vector<8x8xf32>
    %cst_142 = arith.constant dense<0.000000e+00> : vector<8xf32>
    %451 = vector.multi_reduction <add>, %450, %cst_142 [1] : vector<8x8xf32> to vector<8xf32>
    %452 = vector.shape_cast %451 : vector<8xf32> to vector<8x1xf32>
    %453 = tpu.reciprocal %452 {approx = true} : vector<8x1xf32> -> vector<8x1xf32>
    %454 = vector.broadcast %453 : vector<8x1xf32> to vector<8x8xf32>
    %455 = arith.mulf %450, %454 : vector<8x8xf32>
    %456 = arith.truncf %455 : vector<8x8xf32> to vector<8x8xbf16>
    %457 = vector.extract_strided_slice %373 {offsets = [0, 24], sizes = [8, 8], strides = [1, 1]} : vector<8x32xbf16> to vector<8x8xbf16>
    %cst_143 = arith.constant dense<0.000000e+00> : vector<8x8xf32>
    %458 = tpu.matmul %456, %457, %cst_143 {dimension_numbers = #tpu.dot_dimension_numbers<[1], [0], [0], [1], [0, 0, 1, 1], [], []>} : vector<8x8xbf16>, vector<8x8xbf16>, vector<8x8xf32> -> vector<8x8xf32>
    %459 = arith.truncf %458 : vector<8x8xf32> to vector<8x8xbf16>
    %460 = vector.extract_strided_slice %270 {offsets = [24, 0], sizes = [8, 32], strides = [1, 1]} : vector<32x32xbf16> to vector<8x32xbf16>
    %cst_144 = arith.constant dense<0.000000e+00> : vector<8x32xf32>
    %461 = tpu.matmul %459, %460, %cst_144 {dimension_numbers = #tpu.dot_dimension_numbers<[1], [0], [0], [1], [0, 0, 1, 1], [], []>} : vector<8x8xbf16>, vector<8x32xbf16>, vector<8x32xf32> -> vector<8x32xf32>
    %462 = arith.addf %440, %461 : vector<8x32xf32>
    %463 = vector.broadcast %272 : vector<1x32xf32> to vector<8x32xf32>
    %464 = arith.addf %462, %463 : vector<8x32xf32>
    %465 = tpu.concatenate %368, %464 in 0 : vector<8x32xf32>, vector<8x32xf32> -> vector<16x32xf32>
    %466 = arith.addf %465, %248 : vector<16x32xf32>
    %467 = vector.extract_strided_slice %8 {offsets = [1, 0, 0], sizes = [1, 1, 32], strides = [1, 1, 1]} : vector<3x1x32xf32> to vector<1x1x32xf32>
    %468 = vector.shape_cast %467 : vector<1x1x32xf32> to vector<1x32xf32>
    %469 = vector.extract_strided_slice %10 {offsets = [1, 0, 0], sizes = [1, 1, 32], strides = [1, 1, 1]} : vector<3x1x32xf32> to vector<1x1x32xf32>
    %470 = vector.shape_cast %469 : vector<1x1x32xf32> to vector<1x32xf32>
    %cst_145 = arith.constant dense<0.000000e+00> : vector<16xf32>
    %471 = vector.multi_reduction <add>, %466, %cst_145 [1] : vector<16x32xf32> to vector<16xf32>
    %472 = vector.shape_cast %471 : vector<16xf32> to vector<16x1xf32>
    %cst_146 = arith.constant 3.200000e+01 : f32
    %473 = vector.broadcast %cst_146 : f32 to vector<16x1xf32>
    %474 = arith.divf %472, %473 : vector<16x1xf32>
    %475 = vector.broadcast %474 : vector<16x1xf32> to vector<16x32xf32>
    %476 = arith.subf %466, %475 : vector<16x32xf32>
    %477 = arith.mulf %476, %476 : vector<16x32xf32>
    %cst_147 = arith.constant dense<0.000000e+00> : vector<16xf32>
    %478 = vector.multi_reduction <add>, %477, %cst_147 [1] : vector<16x32xf32> to vector<16xf32>
    %479 = vector.shape_cast %478 : vector<16xf32> to vector<16x1xf32>
    %cst_148 = arith.constant 3.200000e+01 : f32
    %480 = vector.broadcast %cst_148 : f32 to vector<16x1xf32>
    %481 = arith.divf %479, %480 : vector<16x1xf32>
    %482 = vector.broadcast %474 : vector<16x1xf32> to vector<16x32xf32>
    %483 = arith.subf %466, %482 : vector<16x32xf32>
    %cst_149 = arith.constant 9.99999974E-6 : f32
    %484 = vector.broadcast %cst_149 : f32 to vector<16x1xf32>
    %485 = arith.addf %481, %484 : vector<16x1xf32>
    %486 = math.rsqrt %485 : vector<16x1xf32>
    %487 = vector.broadcast %486 : vector<16x1xf32> to vector<16x32xf32>
    %488 = arith.mulf %483, %487 : vector<16x32xf32>
    %489 = vector.broadcast %468 : vector<1x32xf32> to vector<16x32xf32>
    %490 = arith.mulf %488, %489 : vector<16x32xf32>
    %491 = vector.broadcast %470 : vector<1x32xf32> to vector<16x32xf32>
    %492 = arith.addf %490, %491 : vector<16x32xf32>
    %493 = arith.truncf %492 : vector<16x32xf32> to vector<16x32xbf16>
    %c0_150 = arith.constant 0 : index
    %c0_151 = arith.constant 0 : index
    %c0_152 = arith.constant 0 : index
    %494 = vector.load %arg16[%c0_150, %c0_151, %c0_152] : memref<1x32x32xbf16, #tpu.memory_space<vmem>>, vector<1x32x32xbf16>
    %495 = vector.shape_cast %494 : vector<1x32x32xbf16> to vector<32x32xbf16>
    %cst_153 = arith.constant dense<0.000000e+00> : vector<16x32xf32>
    %496 = tpu.matmul %493, %495, %cst_153 {dimension_numbers = #tpu.dot_dimension_numbers<[1], [0], [0], [1], [0, 0, 1, 1], [], []>} : vector<16x32xbf16>, vector<32x32xbf16>, vector<16x32xf32> -> vector<16x32xf32>
    %c0_154 = arith.constant 0 : index
    %c0_155 = arith.constant 0 : index
    %c0_156 = arith.constant 0 : index
    %497 = vector.load %arg17[%c0_154, %c0_155, %c0_156] : memref<1x1x32xf32, #tpu.memory_space<vmem>>, vector<1x1x32xf32>
    %498 = vector.shape_cast %497 : vector<1x1x32xf32> to vector<1x32xf32>
    %499 = vector.broadcast %498 : vector<1x32xf32> to vector<16x32xf32>
    %500 = arith.addf %496, %499 : vector<16x32xf32>
    %cst_157 = arith.constant 0.000000e+00 : f32
    %501 = vector.broadcast %cst_157 : f32 to vector<16x32xf32>
    %502 = arith.maximumf %500, %501 : vector<16x32xf32>
    %503 = arith.truncf %502 : vector<16x32xf32> to vector<16x32xbf16>
    %c0_158 = arith.constant 0 : index
    %c0_159 = arith.constant 0 : index
    %c0_160 = arith.constant 0 : index
    %504 = vector.load %arg18[%c0_158, %c0_159, %c0_160] : memref<1x32x32xbf16, #tpu.memory_space<vmem>>, vector<1x32x32xbf16>
    %505 = vector.shape_cast %504 : vector<1x32x32xbf16> to vector<32x32xbf16>
    %cst_161 = arith.constant dense<0.000000e+00> : vector<16x32xf32>
    %506 = tpu.matmul %503, %505, %cst_161 {dimension_numbers = #tpu.dot_dimension_numbers<[1], [0], [0], [1], [0, 0, 1, 1], [], []>} : vector<16x32xbf16>, vector<32x32xbf16>, vector<16x32xf32> -> vector<16x32xf32>
    %c0_162 = arith.constant 0 : index
    %c0_163 = arith.constant 0 : index
    %c0_164 = arith.constant 0 : index
    %507 = vector.load %arg19[%c0_162, %c0_163, %c0_164] : memref<1x1x32xf32, #tpu.memory_space<vmem>>, vector<1x1x32xf32>
    %508 = vector.shape_cast %507 : vector<1x1x32xf32> to vector<1x32xf32>
    %509 = vector.broadcast %508 : vector<1x32xf32> to vector<16x32xf32>
    %510 = arith.addf %506, %509 : vector<16x32xf32>
    %511 = vector.extract_strided_slice %8 {offsets = [2, 0, 0], sizes = [1, 1, 32], strides = [1, 1, 1]} : vector<3x1x32xf32> to vector<1x1x32xf32>
    %512 = vector.shape_cast %511 : vector<1x1x32xf32> to vector<1x32xf32>
    %513 = vector.extract_strided_slice %10 {offsets = [2, 0, 0], sizes = [1, 1, 32], strides = [1, 1, 1]} : vector<3x1x32xf32> to vector<1x1x32xf32>
    %514 = vector.shape_cast %513 : vector<1x1x32xf32> to vector<1x32xf32>
    %cst_165 = arith.constant dense<0.000000e+00> : vector<16xf32>
    %515 = vector.multi_reduction <add>, %510, %cst_165 [1] : vector<16x32xf32> to vector<16xf32>
    %516 = vector.shape_cast %515 : vector<16xf32> to vector<16x1xf32>
    %cst_166 = arith.constant 3.200000e+01 : f32
    %517 = vector.broadcast %cst_166 : f32 to vector<16x1xf32>
    %518 = arith.divf %516, %517 : vector<16x1xf32>
    %519 = vector.broadcast %518 : vector<16x1xf32> to vector<16x32xf32>
    %520 = arith.subf %510, %519 : vector<16x32xf32>
    %521 = arith.mulf %520, %520 : vector<16x32xf32>
    %cst_167 = arith.constant dense<0.000000e+00> : vector<16xf32>
    %522 = vector.multi_reduction <add>, %521, %cst_167 [1] : vector<16x32xf32> to vector<16xf32>
    %523 = vector.shape_cast %522 : vector<16xf32> to vector<16x1xf32>
    %cst_168 = arith.constant 3.200000e+01 : f32
    %524 = vector.broadcast %cst_168 : f32 to vector<16x1xf32>
    %525 = arith.divf %523, %524 : vector<16x1xf32>
    %526 = vector.broadcast %518 : vector<16x1xf32> to vector<16x32xf32>
    %527 = arith.subf %510, %526 : vector<16x32xf32>
    %cst_169 = arith.constant 9.99999974E-6 : f32
    %528 = vector.broadcast %cst_169 : f32 to vector<16x1xf32>
    %529 = arith.addf %525, %528 : vector<16x1xf32>
    %530 = math.rsqrt %529 : vector<16x1xf32>
    %531 = vector.broadcast %530 : vector<16x1xf32> to vector<16x32xf32>
    %532 = arith.mulf %527, %531 : vector<16x32xf32>
    %533 = vector.broadcast %512 : vector<1x32xf32> to vector<16x32xf32>
    %534 = arith.mulf %532, %533 : vector<16x32xf32>
    %535 = vector.broadcast %514 : vector<1x32xf32> to vector<16x32xf32>
    %536 = arith.addf %534, %535 : vector<16x32xf32>
    %c0_170 = arith.constant 0 : index
    %c0_171 = arith.constant 0 : index
    %537 = vector.load %arg23[%c0_170, %c0_171] : memref<16x32xf32, #tpu.memory_space<vmem>>, vector<16x32xf32>
    tpu.vector_store %arg23[%c0_170, %c0_171], %536 {strides = array<i32>} : memref<16x32xf32, #tpu.memory_space<vmem>>, vector<16x32xf32>,
    %c1_i32 = arith.constant 1 : i32
    %538 = arith.cmpi eq, %arg1, %c1_i32 : i32
    %539 = arith.extui %538 : i1 to i32
    %c0_i32_172 = arith.constant 0 : i32
    %540 = arith.cmpi ne, %539, %c0_i32_172 : i32
    scf.if %540 {
      %541 = vector.shape_cast %536 : vector<16x32xf32> to vector<2x8x32xf32>
      %542 = vector.extract_strided_slice %541 {offsets = [0, 0, 0], sizes = [2, 7, 32], strides = [1, 1, 1]} : vector<2x8x32xf32> to vector<2x7x32xf32>
      %c0_173 = arith.constant 0 : index
      %c0_174 = arith.constant 0 : index
      %c0_175 = arith.constant 0 : index
      %543 = vector.load %arg22[%c0_173, %c0_174, %c0_175] : memref<2x7x64xf32, #tpu.memory_space<vmem>>, vector<2x7x32xf32>
      tpu.vector_store %arg22[%c0_173, %c0_174, %c0_175], %542 {strides = array<i32>} : memref<2x7x64xf32, #tpu.memory_space<vmem>>, vector<2x7x32xf32>,
      %544 = vector.extract_strided_slice %541 {offsets = [0, 1, 0], sizes = [2, 7, 32], strides = [1, 1, 1]} : vector<2x8x32xf32> to vector<2x7x32xf32>
      %c0_176 = arith.constant 0 : index
      %c0_177 = arith.constant 0 : index
      %c32 = arith.constant 32 : index
      %545 = vector.load %arg22[%c0_176, %c0_177, %c32] : memref<2x7x64xf32, #tpu.memory_space<vmem>>, vector<2x7x32xf32>
      tpu.vector_store %arg22[%c0_176, %c0_177, %c32], %544 {strides = array<i32>} : memref<2x7x64xf32, #tpu.memory_space<vmem>>, vector<2x7x32xf32>,
    } else {
    }
    return
  }
  func.func @transform_0(%arg0: i32, %arg1: i32) -> (i32, i32, i32) {
    %c0_i32 = arith.constant 0 : i32
    %c0_i32_0 = arith.constant 0 : i32
    %c0_i32_1 = arith.constant 0 : i32
    return %arg0, %c0_i32, %c0_i32_0 : i32, i32, i32
  }
  func.func @transform_1(%arg0: i32, %arg1: i32) -> (i32, i32, i32) {
    %c0_i32 = arith.constant 0 : i32
    %c0_i32_0 = arith.constant 0 : i32
    %c0_i32_1 = arith.constant 0 : i32
    return %arg0, %c0_i32, %c0_i32_0 : i32, i32, i32
  }
  func.func @transform_2(%arg0: i32, %arg1: i32) -> (i32, i32, i32) {
    %c0_i32 = arith.constant 0 : i32
    %c0_i32_0 = arith.constant 0 : i32
    %c0_i32_1 = arith.constant 0 : i32
    return %arg0, %c0_i32, %c0_i32_0 : i32, i32, i32
  }
  func.func @transform_3(%arg0: i32, %arg1: i32) -> (i32, i32, i32) {
    %c0_i32 = arith.constant 0 : i32
    %c0_i32_0 = arith.constant 0 : i32
    %c0_i32_1 = arith.constant 0 : i32
    return %arg0, %c0_i32, %c0_i32_0 : i32, i32, i32
  }
  func.func @transform_4(%arg0: i32, %arg1: i32) -> (i32, i32, i32) {
    %c0_i32 = arith.constant 0 : i32
    %c0_i32_0 = arith.constant 0 : i32
    %c0_i32_1 = arith.constant 0 : i32
    return %arg1, %c0_i32, %c0_i32_0 : i32, i32, i32
  }
  func.func @transform_5(%arg0: i32, %arg1: i32) -> (i32, i32, i32) {
    %c0_i32 = arith.constant 0 : i32
    %c0_i32_0 = arith.constant 0 : i32
    %c0_i32_1 = arith.constant 0 : i32
    return %arg1, %c0_i32, %c0_i32_0 : i32, i32, i32
  }
  func.func @transform_6(%arg0: i32, %arg1: i32) -> (i32, i32, i32) {
    %c0_i32 = arith.constant 0 : i32
    %c0_i32_0 = arith.constant 0 : i32
    %c0_i32_1 = arith.constant 0 : i32
    return %arg1, %c0_i32, %c0_i32_0 : i32, i32, i32
  }
  func.func @transform_7(%arg0: i32, %arg1: i32) -> (i32, i32, i32) {
    %c0_i32 = arith.constant 0 : i32
    %c0_i32_0 = arith.constant 0 : i32
    %c0_i32_1 = arith.constant 0 : i32
    return %arg1, %c0_i32, %c0_i32_0 : i32, i32, i32
  }
  func.func @transform_8(%arg0: i32, %arg1: i32) -> (i32, i32, i32) {
    %c0_i32 = arith.constant 0 : i32
    %c0_i32_0 = arith.constant 0 : i32
    %c0_i32_1 = arith.constant 0 : i32
    return %arg1, %c0_i32, %c0_i32_0 : i32, i32, i32
  }
  func.func @transform_9(%arg0: i32, %arg1: i32) -> (i32, i32, i32) {
    %c0_i32 = arith.constant 0 : i32
    %c0_i32_0 = arith.constant 0 : i32
    %c0_i32_1 = arith.constant 0 : i32
    return %arg1, %c0_i32, %c0_i32_0 : i32, i32, i32
  }
  func.func @transform_10(%arg0: i32, %arg1: i32) -> (i32, i32, i32) {
    %c0_i32 = arith.constant 0 : i32
    %c0_i32_0 = arith.constant 0 : i32
    %c0_i32_1 = arith.constant 0 : i32
    return %arg1, %c0_i32, %c0_i32_0 : i32, i32, i32
  }
  func.func @transform_11(%arg0: i32, %arg1: i32) -> (i32, i32, i32) {
    %c0_i32 = arith.constant 0 : i32
    %c0_i32_0 = arith.constant 0 : i32
    %c0_i32_1 = arith.constant 0 : i32
    return %arg1, %c0_i32, %c0_i32_0 : i32, i32, i32
  }
  func.func @transform_12(%arg0: i32, %arg1: i32) -> (i32, i32, i32) {
    %c0_i32 = arith.constant 0 : i32
    %c0_i32_0 = arith.constant 0 : i32
    %c0_i32_1 = arith.constant 0 : i32
    return %arg1, %c0_i32, %c0_i32_0 : i32, i32, i32
  }
  func.func @transform_13(%arg0: i32, %arg1: i32) -> (i32, i32, i32) {
    %c0_i32 = arith.constant 0 : i32
    %c0_i32_0 = arith.constant 0 : i32
    %c0_i32_1 = arith.constant 0 : i32
    return %arg1, %c0_i32, %c0_i32_0 : i32, i32, i32
  }
  func.func @transform_14(%arg0: i32, %arg1: i32) -> (i32, i32, i32) {
    %c0_i32 = arith.constant 0 : i32
    %c0_i32_0 = arith.constant 0 : i32
    %c0_i32_1 = arith.constant 0 : i32
    return %arg1, %c0_i32, %c0_i32_0 : i32, i32, i32
  }
  func.func @transform_15(%arg0: i32, %arg1: i32) -> (i32, i32, i32) {
    %c0_i32 = arith.constant 0 : i32
    %c0_i32_0 = arith.constant 0 : i32
    %c0_i32_1 = arith.constant 0 : i32
    return %arg1, %c0_i32, %c0_i32_0 : i32, i32, i32
  }
  func.func @transform_16(%arg0: i32, %arg1: i32) -> (i32, i32, i32) {
    %c0_i32 = arith.constant 0 : i32
    %c0_i32_0 = arith.constant 0 : i32
    %c0_i32_1 = arith.constant 0 : i32
    return %arg1, %c0_i32, %c0_i32_0 : i32, i32, i32
  }
  func.func @transform_17(%arg0: i32, %arg1: i32) -> (i32, i32, i32) {
    %c0_i32 = arith.constant 0 : i32
    %c0_i32_0 = arith.constant 0 : i32
    %c0_i32_1 = arith.constant 0 : i32
    return %arg1, %c0_i32, %c0_i32_0 : i32, i32, i32
  }
  func.func @transform_18(%arg0: i32, %arg1: i32) -> (i32, i32, i32, i32) {
    %c0_i32 = arith.constant 0 : i32
    %c0_i32_0 = arith.constant 0 : i32
    %c0_i32_1 = arith.constant 0 : i32
    %c0_i32_2 = arith.constant 0 : i32
    return %arg1, %c0_i32, %c0_i32_0, %c0_i32_1 : i32, i32, i32, i32
  }
  func.func @transform_19(%arg0: i32, %arg1: i32) -> (i32, i32, i32, i32) {
    %c0_i32 = arith.constant 0 : i32
    %c0_i32_0 = arith.constant 0 : i32
    %c0_i32_1 = arith.constant 0 : i32
    %c0_i32_2 = arith.constant 0 : i32
    return %arg1, %c0_i32, %c0_i32_0, %c0_i32_1 : i32, i32, i32, i32
  }
  func.func @transform_20(%arg0: i32, %arg1: i32) -> (i32, i32, i32) {
    %c0_i32 = arith.constant 0 : i32
    %c0_i32_0 = arith.constant 0 : i32
    %c0_i32_1 = arith.constant 0 : i32
    return %arg0, %c0_i32, %c0_i32_0 : i32, i32, i32
  }
}

</mosaic_0001>

<bundles_post_ra>
// kernel: tpu_custom_call.1
= control target key start
LH: loop header
LB: loop body
LE: loop exit
PB: predicated region body
PF: predicated region fallthrough
CT: control target
= control target key end

     0   :  { %s6870_s0 = inlined_call_operand.hbm [shape: f32[2,1,8], index: 0, kind: input, shape index: {}]   ;;  %s6871_s1 = inlined_call_operand.hbm [shape: f32[2,1,8], index: 1, kind: input, shape index: {}]   ;;  %s6872_s2 = inlined_call_operand.hbm [shape: f32[2,8,32], index: 2, kind: input, shape index: {}]   ;;  %s6873_s3 = inlined_call_operand.hbm [shape: f32[2,8,32], index: 3, kind: input, shape index: {}]   ;;  %s6874_s4 = inlined_call_operand.hbm [shape: bf16[2,32,96], index: 4, kind: input, shape index: {}]   ;;  %s6875_s5 = inlined_call_operand.hbm [shape: f32[2,1,96], index: 5, kind: input, shape index: {}]   ;;  %s6876_s6 = inlined_call_operand.hbm [shape: bf16[2,32,32], index: 6, kind: input, shape index: {}]   ;;  %s6877_s7 = inlined_call_operand.hbm [shape: f32[2,1,32], index: 7, kind: input, shape index: {}]   ;;  %s6878_s8 = inlined_call_operand.hbm [shape: bf16[2,32,32], index: 8, kind: input, shape index: {}]   ;;  %s6879_s9 = inlined_call_operand.vmem [shape: f32[2,1,32], index: 9, kind: input, shape index: {}]   ;;  %s6880_s10 = inlined_call_operand.hbm [shape: bf16[2,32,64], index: 10, kind: input, shape index: {}]   ;;  %s6881_s11 = inlined_call_operand.vmem [shape: f32[2,1,64], index: 11, kind: input, shape index: {}]   ;;  %s6882_s12 = inlined_call_operand.hbm [shape: bf16[2,32,32], index: 12, kind: input, shape index: {}]   ;;  %s6883_s13 = inlined_call_operand.vmem [shape: f32[2,1,32], index: 13, kind: input, shape index: {}]   ;;  %s6884_s14 = inlined_call_operand.hbm [shape: bf16[2,32,32], index: 14, kind: input, shape index: {}]   ;;  %s6885_s15 = inlined_call_operand.vmem [shape: f32[2,1,32], index: 15, kind: input, shape index: {}]   ;;  %s6886_s16 = inlined_call_operand.hbm [shape: bf16[2,32,32], index: 16, kind: input, shape index: {}]   ;;  %s6887_s17 = inlined_call_operand.vmem [shape: f32[2,1,32], index: 17, kind: input, shape index: {}]   ;;  %s6888_s18 = inlined_call_operand.vmem [shape: f32[2,3,1,32], index: 18, kind: input, shape index: {}]   ;;  %s6889_s19 = inlined_call_operand.vmem [shape: f32[2,3,1,32], index: 19, kind: input, shape index: {}]   ;;  %s6890_s20 = inlined_call_operand.vmem [shape: f32[2,7,64], index: 20, kind: output, shape index: {}]  }
   0x1   :  { %6912 = sst [smem:[#allocation31_spill]] %s6870_s0 }
   0x2   :  { %6913 = sst [smem:[#allocation32_spill]] %s6871_s1 }
   0x3   :  { %6914 = sst [smem:[#allocation33_spill]] %s6872_s2 }
   0x4   :  { %6915 = sst [smem:[#allocation34_spill]] %s6873_s3 }
   0x5   :  { %6916 = sst [smem:[#allocation35_spill]] %s6874_s4 }
   0x6   :  { %6917 = sst [smem:[#allocation36_spill]] %s6875_s5 }
   0x7   :  { %6918 = sst [smem:[#allocation37_spill]] %s6876_s6 }
   0x8   :  { %6919 = sst [smem:[#allocation38_spill]] %s6877_s7 }
   0x9   :  { %6920 = sst [smem:[#allocation39_spill]] %s6879_s9 }
   0xa   :  { %6921 = sst [smem:[#allocation40_spill]] %s6881_s11 }
   0xb   :  { %6922 = sst [smem:[#allocation41_spill]] %s6883_s13 }
   0xc   :  { %6923 = sst [smem:[#allocation42_spill]] %s6885_s15 }
   0xd   :  { %6924 = sst [smem:[#allocation43_spill]] %s6887_s17 }
   0xe   :  { %6925 = sst [smem:[#allocation44_spill]] %s6888_s18 }
   0xf   :  { %6926 = sst [smem:[#allocation45_spill]] %s6889_s19 }
  0x10   :  { %6927 = sst [smem:[#allocation46_spill]] %s6890_s20 }
  0x11   :  { %25 = vsyncpa [#allocation4], 0 }
  0x12   :  { %26 = vsyncpa [#allocation6], 0 }
  0x13   :  { %27 = vsyncpa [#allocation9], 0  ;;  %s5925_s1 = smov 0   ;;  %s5927_s22 = smov 0  }
  0x14   :  { %s5929_s23 = smov 0   ;;  %s5931_s24 = smov 0  }
  0x15   :  { %s5933_s2 = smov 0   ;;  %s5935_s25 = smov 0  }
  0x16 LB: > { %6928 = sst [smem:[#allocation23_spill]] %s5769_s22  ;;  %s6891_s3 = sadd.s32 4294967295, %s5785_s25   ;;  %s5785_s25 = sphi %s5935_s25, %s33_s25   ;;  %s5781_s2 = sphi %s5933_s2, %s6989_s2   ;;  %s5777_s24 = sphi %s5931_s24, %s6988_s24   ;;  %s5773_s23 = sphi %s5929_s23, %s6986_s23   ;;  %s5769_s22 = sphi %s5927_s22, %s6985_s22   ;;  %s5765_s1 = sphi %s5925_s1, %s6984_s1  }
  0x17   : > { %6929 = sst [smem:[#allocation24_spill]] %s5773_s23  ;;  %s42_s26 = sadd.s32 1, %s5781_s2 }
  0x18   : > { %6930 = sst [smem:[#allocation25_spill]] %s5777_s24  ;;  %p43_p0 = scmp.ge.s32.totalorder %s42_s26, 2 }
  0x19   : > { %6931 = sst [smem:[#allocation26_spill]] %s5785_s25  ;;  %s156_s27 = sadd.s32 1, %s5773_s23 }
  0x1a   : > { %p163_p1 = scmp.ne.s32.totalorder %s5773_s23, %s5769_s22  ;;  %p164_p2 = scmp.eq.s32.totalorder %s5785_s25, 0 }
  0x1b   : > { %s6991_s26 = smov (%p43_p0, %s42_s26), 0  ;;  %p169_p4 = scmp.ne.s32.totalorder %s5769_s22, %s5765_s1 }
  0x1c   : > { %6932 = sst [smem:[#allocation27_spill]] %s6991_s26  ;;  %p5961_p3 = por %p164_p2, %p163_p1 }
  0x1d   : > { %s153_s4 = ssub.s32 %s5781_s2, %s6991_s26  ;;  %p5970_p5 = scmp.eq.s32.totalorder %s6891_s3, 0 }
  0x1e   : > { %p154_p6 = scmp.eq.s32.totalorder %s153_s4, 0  ;;  %p4551_p7 = scmp.ge.s32.totalorder %s5785_s25, 1 }
  0x1f   : > { %s6934_s29 = scalar_select %p5970_p5, 1, 0 }
  0x20   : > { %p5977_p8 = por %p5970_p5, %p169_p4  ;;  %p596_p9 = scmp.lt.s32.totalorder %s5785_s25, 3 }
  0x21   : > { %6935 = sst [smem:[#allocation28_spill]] %s6934_s29  ;;  %s5787_s1 = smov [#allocation3]  }
  0x22   : > { %s6936_s30 = scalar_select %p5977_p8, 1, 0 }
  0x23   : > { %s5983_s0 = scalar_select %p154_p6, %s5773_s23, %s156_s27  }
  0x24   : > { %6937 = sst [smem:[#allocation29_spill]] %s6936_s30  ;;  %p5985_p10 = pnand %p4551_p7, %p596_p9 }
  0x25   : > { %6938 = sst [smem:[#allocation30_spill]] %s5983_s0  ;;  %s611_s3 = sshll.u32 %s5787_s1, 4  ;;  %s612_s3 = int_to_ptr.vmem [resolvable:$true] %s611_s3 }
  0x26   : > { %s6939_s21 = scalar_select %p5985_p10, 1, 0 }
  0x27   : > { %p5159_p11 = pneg %p5985_p10  ;;  %p5204_p13 = scmp.lt.s32.totalorder %s5785_s25, 2 }
  0x28   : > { %s673_s27 = sand.u32 1, %s5785_s25   ;;  %s5378_s26 = scalar_lea.vmem %s612_s3, 32 }
  0x29   : > { %p5993_p12 = pnand %p5159_p11, %p5970_p5  ;;  %p5379_p1 = scmp.ne.s32.totalorder %s612_s3, %s5378_s26 }
  0x2a   : > { %p5386_p6 = scmp.lt.s32.totalorder %s612_s3, %s612_s3  ;;  %p5387_p7 = scmp.lt.s32.totalorder %s5378_s26, %s5378_s26 }
  0x2b   : > { %p5369_p0 = pneg %p5993_p12 }
  0x2c   : > { %p5388_p9 = por %p5387_p7, %p5386_p6 }
  0x2d   : > { %p5381_p2 = pnand %p5379_p1, %p5369_p0 }
  0x2f   : > { %p5382_p4 = pneg %p5381_p2 }
  0x31   : > { %p5389_p8 = pnand %p5388_p9, %p5382_p4 }
  0x33   : > { %5392 = shalt.err (!%p5389_p8)
}
  0x34   : > { %s6895_s1 = smov 16   ;;  %s6896_s0 = smov 1  }
  0x35   : > { %s6941_s18 = sld [smem:[#allocation31_spill]]  ;;  %p6016_p11 = pnand %p5204_p13, %p5961_p3 }
  0x36   : > { %s6021_s17 = sand.u32 1, %s5773_s23   ;;  %s6027_s13 = sshll.u32 %s5781_s2, 8 }
  0x37   : > { %s6024_s15 = sshll.u32 %s6021_s17, 4  ;;  %s6943_s19 = sld [smem:[#allocation35_spill]] }
  0x38   : > { %s677_s20 = scalar_lea.vmem [#allocation10], %s6024_s15  ;;  %s6034_s28 = scalar_lea.sflag [#allocation4], %s673_s27 }
  0x39   : > { %p6038_p3 = pneg %p6016_p11  ;;  %s5790_s23 = smov [#allocation10]  }
  0x3a   : > { %s5411_s24 = sshll.u32 %s5790_s23, 4  ;;  %s5412_s24 = int_to_ptr.vmem [resolvable:$false] %s5411_s24 }
  0x3b   : > { %5162 = dma.hbm_to_vmem [thread:$0]  (!%p5993_p12), %s6941_s18, 32, %s612_s3, [#allocation4], %s6895_s1, %s6895_s1, %s6896_s0  }
  0x3c   : > { %s684_s3 = sshll.u32 %s677_s20, 4  ;;  %s5413_s9 = scalar_lea.vmem %s5412_s24, 512  ;;  %s685_s3 = int_to_ptr.vmem [resolvable:$true] %s684_s3 }
  0x3d   : > { %s683_s18 = scalar_lea.hbm %s6943_s19, %s6027_s13  ;;  %s5406_s0 = scalar_lea.vmem %s685_s3, 256 }
  0x3e   : > { %p5407_p8 = scmp.ne.s32.totalorder %s685_s3, %s5406_s0  ;;  %p5414_p2 = scmp.lt.s32.totalorder %s685_s3, %s5412_s24 }
  0x3f   : > { %p5415_p4 = scmp.lt.s32.totalorder %s5413_s9, %s5406_s0 }
  0x40   : > { %p5409_p13 = pnand %p5407_p8, %p6038_p3 }
  0x41   : > { %p5416_p6 = por %p5415_p4, %p5414_p2 }
  0x42   : > { %p5410_p1 = pneg %p5409_p13 }
  0x44   : > { %p5417_p7 = pnand %p5416_p6, %p5410_p1 }
  0x46   : > { %5420 = shalt.err (!%p5417_p7)
}
  0x47   : > { %s6905_s11 = smov 64   ;;  %s6907_s27 = smov 4  }
  0x48   : > { %5175 = dma.hbm_to_vmem [thread:$0]  (!%p6016_p11), %s683_s18, 256, %s685_s3, %s6034_s28, %s6905_s11, %s6905_s11, %s6907_s27  }
  0x49   : > { %s4560_s23 = sshll.u32 %s5781_s2, 4  ;;  %s697_s19 = scalar_lea.vmem [#allocation11], %s6021_s17 }
  0x4a   : > { %s704_s20 = sshll.u32 %s697_s19, 4  ;;  %s6945_s5 = sld [smem:[#allocation36_spill]]  ;;  %s705_s20 = int_to_ptr.vmem [resolvable:$true] %s704_s20 }
  0x4b   : > { %s5434_s30 = scalar_lea.vmem %s705_s20, 16  ;;  %s5793_s22 = smov [#allocation11]  }
  0x4c   : > { %p5435_p9 = scmp.ne.s32.totalorder %s705_s20, %s5434_s30  ;;  %s5439_s25 = sshll.u32 %s5793_s22, 4  ;;  %s5440_s25 = int_to_ptr.vmem [resolvable:$false] %s5439_s25 }
  0x4d   : > { %s5441_s29 = scalar_lea.vmem %s5440_s25, 32  ;;  %p5442_p1 = scmp.lt.s32.totalorder %s705_s20, %s5440_s25 }
  0x4e   : > { %p5437_p8 = pnand %p5435_p9, %p6038_p3  ;;  %p5443_p2 = scmp.lt.s32.totalorder %s5441_s29, %s5434_s30 }
  0x50   : > { %s702_s9 = scalar_lea.hbm %s6945_s5, %s4560_s23  ;;  %p5438_p13 = pneg %p5437_p8 }
  0x51   : > { %p5444_p4 = por %p5443_p2, %p5442_p1 }
  0x53   : > { %p5445_p6 = pnand %p5444_p4, %p5438_p13 }
  0x55   : > { %5448 = shalt.err (!%p5445_p6)
}
  0x56   : > { %5178 = dma.hbm_to_vmem [thread:$0]  (!%p6016_p11), %s702_s9, 16, %s705_s20, %s6034_s28  }
  0x57   : > { %s6946_s6 = sld [smem:[#allocation37_spill]]  ;;  %s715_s24 = scalar_lea.vmem [#allocation12], %s6024_s15 }
  0x58   : > { %s722_s22 = sshll.u32 %s715_s24, 4  ;;  %s6947_s7 = sld [smem:[#allocation38_spill]]  ;;  %s723_s22 = int_to_ptr.vmem [resolvable:$true] %s722_s22 }
  0x59   : > { %s5462_s30 = scalar_lea.vmem %s723_s22, 256  ;;  %s5794_s11 = smov [#allocation12]  }
  0x5a   : > { %p5463_p7 = scmp.ne.s32.totalorder %s723_s22, %s5462_s30  ;;  %s5467_s27 = sshll.u32 %s5794_s11, 4  ;;  %s5468_s27 = int_to_ptr.vmem [resolvable:$false] %s5467_s27 }
  0x5b   : > { %s5469_s20 = scalar_lea.vmem %s5468_s27, 512  ;;  %p5470_p13 = scmp.lt.s32.totalorder %s723_s22, %s5468_s27 }
  0x5c   : > { %p5465_p9 = pnand %p5463_p7, %p6038_p3  ;;  %p5471_p1 = scmp.lt.s32.totalorder %s5469_s20, %s5462_s30 }
  0x5d   : > { %s721_s19 = scalar_lea.hbm %s6946_s6, %s6027_s13 }
  0x5e   : > { %s6068_s29 = scalar_lea.hbm %s6947_s7, %s4560_s23  ;;  %p5466_p8 = pneg %p5465_p9 }
  0x5f   : > { %p5472_p2 = por %p5471_p1, %p5470_p13 }
  0x61   : > { %p5473_p4 = pnand %p5472_p2, %p5466_p8 }
  0x63   : > { %5476 = shalt.err (!%p5473_p4)
}
  0x64   : > { %s6948_s9 = smov 4   ;;  %s6949_s18 = smov 64  }
  0x65   : > { %5181 = dma.hbm_to_vmem [thread:$0]  (!%p6016_p11), %s721_s19, 256, %s723_s22, %s6034_s28, %s6949_s18, %s6949_s18, %s6948_s9  }
  0x66   : > { %s735_s23 = scalar_lea.vmem [#allocation13], %s6021_s17  ;;  %s759_s27 = scalar_lea.hbm %s6878_s8, %s6027_s13 }
  0x67   : > { %s742_s3 = sshll.u32 %s735_s23, 4  ;;  %s5795_s25 = smov [#allocation13]   ;;  %s743_s3 = int_to_ptr.vmem [resolvable:$true] %s742_s3 }
  0x68   : > { %s5490_s0 = scalar_lea.vmem %s743_s3, 16  ;;  %s5495_s30 = sshll.u32 %s5795_s25, 4  ;;  %s5496_s30 = int_to_ptr.vmem [resolvable:$false] %s5495_s30 }
  0x69   : > { %p5491_p6 = scmp.ne.s32.totalorder %s743_s3, %s5490_s0  ;;  %s5497_s20 = scalar_lea.vmem %s5496_s30, 32 }
  0x6a   : > { %p5498_p8 = scmp.lt.s32.totalorder %s743_s3, %s5496_s30  ;;  %p5499_p13 = scmp.lt.s32.totalorder %s5497_s20, %s5490_s0 }
  0x6b   : > { %p5493_p7 = pnand %p5491_p6, %p6038_p3 }
  0x6c   : > { %p5500_p1 = por %p5499_p13, %p5498_p8 }
  0x6d   : > { %p5494_p9 = pneg %p5493_p7 }
  0x6f   : > { %p5501_p2 = pnand %p5500_p1, %p5494_p9 }
  0x71   : > { %5504 = shalt.err (!%p5501_p2)
}
  0x72   : > { %5184 = dma.hbm_to_vmem [thread:$0]  (!%p6016_p11), %s6068_s29, 16, %s743_s3, %s6034_s28  }
  0x73   : > { %s753_s17 = scalar_lea.vmem [#allocation14], %s6024_s15  ;;  %s786_s11 = scalar_lea.hbm %s6880_s10, %s6027_s13 }
  0x74   : > { %s760_s19 = sshll.u32 %s753_s17, 4  ;;  %s5796_s0 = smov [#allocation14]   ;;  %s761_s19 = int_to_ptr.vmem [resolvable:$true] %s760_s19 }
  0x75   : > { %s5518_s24 = scalar_lea.vmem %s761_s19, 256  ;;  %s5523_s25 = sshll.u32 %s5796_s0, 4  ;;  %s5524_s25 = int_to_ptr.vmem [resolvable:$false] %s5523_s25 }
  0x76   : > { %p5519_p4 = scmp.ne.s32.totalorder %s761_s19, %s5518_s24  ;;  %s5525_s30 = scalar_lea.vmem %s5524_s25, 512 }
  0x77   : > { %p5526_p9 = scmp.lt.s32.totalorder %s761_s19, %s5524_s25  ;;  %p5527_p8 = scmp.lt.s32.totalorder %s5525_s30, %s5518_s24 }
  0x78   : > { %p5521_p6 = pnand %p5519_p4, %p6038_p3 }
  0x79   : > { %p5528_p13 = por %p5527_p8, %p5526_p9 }
  0x7a   : > { %p5522_p7 = pneg %p5521_p6 }
  0x7c   : > { %p5529_p1 = pnand %p5528_p13, %p5522_p7 }
  0x7e   : > { %5532 = shalt.err (!%p5529_p1)
}
  0x7f   : > { %5187 = dma.hbm_to_vmem [thread:$0]  (!%p6016_p11), %s759_s27, 256, %s761_s19, %s6034_s28, %s6949_s18, %s6949_s18, %s6948_s9  }
  0x80   : > { %s780_s20 = scalar_lea.vmem [#allocation15], %s6024_s15  ;;  %s813_s24 = scalar_lea.hbm %s6882_s12, %s6027_s13 }
  0x81   : > { %s787_s17 = sshll.u32 %s780_s20, 4  ;;  %s5797_s25 = smov [#allocation15]   ;;  %s788_s17 = int_to_ptr.vmem [resolvable:$true] %s787_s17 }
  0x82   : > { %s5546_s0 = scalar_lea.vmem %s788_s17, 256  ;;  %s5551_s30 = sshll.u32 %s5797_s25, 4  ;;  %s5552_s30 = int_to_ptr.vmem [resolvable:$false] %s5551_s30 }
  0x83   : > { %p5547_p2 = scmp.ne.s32.totalorder %s788_s17, %s5546_s0  ;;  %s5553_s29 = scalar_lea.vmem %s5552_s30, 512 }
  0x84   : > { %p5554_p7 = scmp.lt.s32.totalorder %s788_s17, %s5552_s30  ;;  %p5555_p9 = scmp.lt.s32.totalorder %s5553_s29, %s5546_s0 }
  0x85   : > { %p5549_p4 = pnand %p5547_p2, %p6038_p3 }
  0x86   : > { %p5556_p8 = por %p5555_p9, %p5554_p7 }
  0x87   : > { %p5550_p6 = pneg %p5549_p4 }
  0x89   : > { %p5557_p13 = pnand %p5556_p8, %p5550_p6 }
  0x8b   : > { %5560 = shalt.err (!%p5557_p13)
}
  0x8c   : > { %5190 = dma.hbm_to_vmem [thread:$0]  (!%p6016_p11), %s786_s11, 256, %s788_s17, %s6034_s28, %s6949_s18, %s6949_s18, %s6948_s9  }
  0x8d   : > { %s807_s3 = scalar_lea.vmem [#allocation16], %s6024_s15  ;;  %s5798_s22 = smov [#allocation5]  }
  0x8e   : > { %s814_s20 = sshll.u32 %s807_s3, 4  ;;  %s627_s23 = sshll.u32 %s5798_s22, 4  ;;  %s815_s20 = int_to_ptr.vmem [resolvable:$true] %s814_s20  ;;  %s628_s23 = int_to_ptr.vmem [resolvable:$true] %s627_s23 }
  0x8f   : > { %s5574_s0 = scalar_lea.vmem %s815_s20, 256  ;;  %s5799_s25 = smov [#allocation16]  }
  0x90   : > { %p5575_p1 = scmp.ne.s32.totalorder %s815_s20, %s5574_s0  ;;  %s5579_s30 = sshll.u32 %s5799_s25, 4  ;;  %s5580_s30 = int_to_ptr.vmem [resolvable:$false] %s5579_s30 }
  0x91   : > { %s5581_s29 = scalar_lea.vmem %s5580_s30, 512  ;;  %p5582_p6 = scmp.lt.s32.totalorder %s815_s20, %s5580_s30 }
  0x92   : > { %p5577_p2 = pnand %p5575_p1, %p6038_p3  ;;  %p5583_p7 = scmp.lt.s32.totalorder %s5581_s29, %s5574_s0 }
  0x94   : > { %p5578_p4 = pneg %p5577_p2  ;;  %p5584_p9 = por %p5583_p7, %p5582_p6 }
  0x96   : > { %p5585_p8 = pnand %p5584_p9, %p5578_p4 }
  0x98   : > { %5588 = shalt.err (!%p5585_p8)
}
  0x99   : > { %5193 = dma.hbm_to_vmem [thread:$0]  (!%p6016_p11), %s813_s24, 256, %s815_s20, %s6034_s28, %s6949_s18, %s6949_s18, %s6948_s9  }
  0x9a   : > { %s5600_s27 = scalar_lea.vmem %s628_s23, 32  ;;  %p5608_p4 = scmp.lt.s32.totalorder %s628_s23, %s628_s23 }
  0x9b   : > { %p5601_p13 = scmp.ne.s32.totalorder %s628_s23, %s5600_s27  ;;  %p5609_p6 = scmp.lt.s32.totalorder %s5600_s27, %s5600_s27 }
  0x9d   : > { %p5603_p1 = pnand %p5601_p13, %p5369_p0  ;;  %p5610_p7 = por %p5609_p6, %p5608_p4 }
  0x9f   : > { %p5604_p2 = pneg %p5603_p1 }
  0xa1   : > { %p5611_p9 = pnand %p5610_p7, %p5604_p2 }
  0xa3   : > { %5614 = shalt.err (!%p5611_p9)
}
  0xa4   : > { %s6950_s19 = smov 1   ;;  %s6951_s3 = smov 16  }
  0xa5   : > { %s6952_s24 = sld [smem:[#allocation32_spill]]  ;;  %s840_s30 = scalar_lea.hbm %s6884_s14, %s6027_s13 }
  0xa6   : > { %s834_s29 = scalar_lea.vmem [#allocation17], %s6024_s15  ;;  %s5800_s27 = smov [#allocation17]  }
  0xa7   : > { %s841_s11 = sshll.u32 %s834_s29, 4  ;;  %s5633_s5 = sshll.u32 %s5800_s27, 4  ;;  %s842_s11 = int_to_ptr.vmem [resolvable:$true] %s841_s11  ;;  %s5634_s5 = int_to_ptr.vmem [resolvable:$false] %s5633_s5 }
  0xa8   : > { %s5628_s17 = scalar_lea.vmem %s842_s11, 256  ;;  %s5635_s22 = scalar_lea.vmem %s5634_s5, 512 }
  0xa9   : > { %p5629_p8 = scmp.ne.s32.totalorder %s842_s11, %s5628_s17  ;;  %p5636_p2 = scmp.lt.s32.totalorder %s842_s11, %s5634_s5 }
  0xaa   : > { %p5637_p4 = scmp.lt.s32.totalorder %s5635_s22, %s5628_s17 }
  0xab   : > { %5165 = dma.hbm_to_vmem [thread:$0]  (!%p5993_p12), %s6952_s24, 32, %s628_s23, [#allocation6], %s6951_s3, %s6951_s3, %s6950_s19  }
  0xac   : > { %p5631_p13 = pnand %p5629_p8, %p6038_p3  ;;  %p5638_p6 = por %p5637_p4, %p5636_p2 }
  0xae   : > { %p5632_p1 = pneg %p5631_p13 }
  0xb0   : > { %p5639_p7 = pnand %p5638_p6, %p5632_p1 }
  0xb2   : > { %5642 = shalt.err (!%p5639_p7)
}
  0xb3   : > { %5196 = dma.hbm_to_vmem [thread:$0]  (!%p6016_p11), %s840_s30, 256, %s842_s11, %s6034_s28, %s6949_s18, %s6949_s18, %s6948_s9  }
  0xb4   : > { %s5801_s23 = smov [#allocation7]  }
  0xb5   : > { %s643_s19 = sshll.u32 %s5801_s23, 4  ;;  %s644_s19 = int_to_ptr.vmem [resolvable:$true] %s643_s19 }
  0xb6   : > { %s5654_s3 = scalar_lea.vmem %s644_s19, 256  ;;  %p5662_p2 = scmp.lt.s32.totalorder %s644_s19, %s644_s19 }
  0xb7   : > { %p5655_p9 = scmp.ne.s32.totalorder %s644_s19, %s5654_s3  ;;  %p5663_p1 = scmp.lt.s32.totalorder %s5654_s3, %s5654_s3 }
  0xb9   : > { %p5657_p8 = pnand %p5655_p9, %p5369_p0  ;;  %p5664_p4 = por %p5663_p1, %p5662_p2 }
  0xbb   : > { %p5658_p13 = pneg %p5657_p8 }
  0xbd   : > { %p5665_p6 = pnand %p5664_p4, %p5658_p13 }
  0xbf   : > { %5668 = shalt.err (!%p5665_p6)
}
  0xc0   : > { %s5802_s5 = smov 128   ;;  %s5803_s0 = smov 8  }
  0xc1   : > { %s6953_s25 = sld [smem:[#allocation33_spill]]  ;;  %s5804_s30 = smov [#allocation8]  }
  0xc2   : > { %s659_s29 = sshll.u32 %s5804_s30, 4  ;;  %s867_s27 = scalar_lea.hbm %s6886_s16, %s6027_s13  ;;  %s660_s29 = int_to_ptr.vmem [resolvable:$true] %s659_s29 }
  0xc3   : > { %s861_s22 = scalar_lea.vmem [#allocation18], %s6024_s15  ;;  %s5680_s3 = scalar_lea.vmem %s660_s29, 256 }
  0xc4   : > { %s868_s23 = sshll.u32 %s861_s22, 4  ;;  %p5681_p7 = scmp.ne.s32.totalorder %s660_s29, %s5680_s3  ;;  %s869_s23 = int_to_ptr.vmem [resolvable:$true] %s868_s23 }
  0xc5   : > { %p5688_p13 = scmp.lt.s32.totalorder %s660_s29, %s660_s29  ;;  %p5689_p2 = scmp.lt.s32.totalorder %s5680_s3, %s5680_s3 }
  0xc6   : > { %p5683_p9 = pnand %p5681_p7, %p5369_p0 }
  0xc7   : > { %5168 = dma.hbm_to_vmem [thread:$0]  (!%p5993_p12), %s6953_s25, 256, %s644_s19, [#allocation6], %s5802_s5, %s5802_s5, %s5803_s0  }
  0xc8   : > { %p5684_p8 = pneg %p5683_p9  ;;  %p5690_p1 = por %p5689_p2, %p5688_p13 }
  0xca   : > { %p5691_p4 = pnand %p5690_p1, %p5684_p8 }
  0xcc   : > { %5694 = shalt.err (!%p5691_p4)
}
  0xcd   : > { %s6954_s20 = sld [smem:[#allocation34_spill]]  ;;  %s5708_s15 = scalar_lea.vmem %s869_s23, 256 }
  0xce   : > { %p5709_p6 = scmp.ne.s32.totalorder %s869_s23, %s5708_s15  ;;  %s5805_s25 = smov [#allocation18]  }
  0xcf   : > { %s5713_s30 = sshll.u32 %s5805_s25, 4  ;;  %s5714_s30 = int_to_ptr.vmem [resolvable:$false] %s5713_s30 }
  0xd0   : > { %p5711_p5 = pnand %p5709_p6, %p6038_p3  ;;  %s5715_s11 = scalar_lea.vmem %s5714_s30, 512 }
  0xd1   : > { %p5716_p0 = scmp.lt.s32.totalorder %s869_s23, %s5714_s30  ;;  %p5717_p7 = scmp.lt.s32.totalorder %s5715_s11, %s5708_s15 }
  0xd2   : > { %p5712_p10 = pneg %p5711_p5 }
  0xd3   : > { %5171 = dma.hbm_to_vmem [thread:$0]  (!%p5993_p12), %s6954_s20, 256, %s660_s29, [#allocation9], %s5802_s5, %s5802_s5, %s5803_s0  }
  0xd4   : > { %p5718_p9 = por %p5717_p7, %p5716_p0 }
  0xd6   : > { %p5719_p8 = pnand %p5718_p9, %p5712_p10 }
  0xd8   : > { %5722 = shalt.err (!%p5719_p8)
}
  0xd9   : > { %5199 = dma.hbm_to_vmem [thread:$0]  (!%p6016_p11), %s867_s27, 256, %s869_s23, %s6034_s28, %s6949_s18, %s6949_s18, %s6948_s9  }
  0xda   : > { %p6955_p5 = scmp.ne.s32.totalorder %s6939_s21, 0 }
  0xdb   : > { %s6956_s1 = sld [smem:[#allocation28_spill]] (!%p6955_p5) }
  0xdc   : > { %900 = sbr.rel (%p6955_p5) target bundleno = 10140 (0x279c), region = 100 }
  0xe1   : > { %p6957_p12 = scmp.ne.s32.totalorder %s6956_s1, 0 }
  0xe3   : > { %5748 = dma.done.wait (%p6957_p12), [#allocation4], 32  }
  0xe4   : > { %5750 = vsyncadd (%p6957_p12), [#allocation4], 4294967264 }
  0xe5   : > { %5752 = dma.done.wait (%p6957_p12), [#allocation6], 288  }
  0xe6   : > { %5754 = vsyncadd (%p6957_p12), [#allocation6], 4294967008 }
  0xe7   : > { %5756 = dma.done.wait (%p6957_p12), [#allocation9], 256  }
  0xe8   : > { %5758 = vsyncadd (%p6957_p12), [#allocation9], 4294967040  ;;  %s6958_s13 = sld [smem:[#allocation26_spill]] }
  0xe9   : > { %s6960_s26 = sld [smem:[#allocation23_spill]] }
  0xea   : > { %s6961_s28 = sld [smem:[#allocation29_spill]] }
  0xee   : > { %s6959_s21 = sadd.s32 4294967295, %s6958_s13  }
  0xef   : > { %s918_s9 = sand.u32 1, %s6959_s21   ;;  %s6214_s18 = sand.u32 1, %s6960_s26  }
  0xf0   : > { %s6217_s0 = sshll.u32 %s6214_s18, 4  ;;  %s919_s29 = scalar_lea.sflag [#allocation4], %s918_s9 }
  0xf1   : > { %p6962_p10 = scmp.ne.s32.totalorder %s6961_s28, 0 }
  0xf3   : > { %5760 = dma.done.wait (%p6962_p10), %s919_s29, 1824  }
  0xf4   : > { %5762 = vsyncadd (%p6962_p10), %s919_s29, 4294965472  ;;  %s6963_s27 = sld [smem:[#allocation25_spill]]  ;;  %s930_s11 = scalar_lea.vmem [#allocation11], %s6214_s18 }
  0xf5   : > { %s6966_s5 = sld [smem:[#allocation41_spill]]  ;;  %s6261_s4 = scalar_lea.vmem [#allocation12], %s6217_s0 }
  0xf6   : > { %s6967_s26 = sld [smem:[#allocation42_spill]]  ;;  %s956_s13 = scalar_lea.vmem [#allocation14], %s6217_s0 }
  0xf7   : > { %s6969_s19 = sld [smem:[#allocation44_spill]]  ;;  %s965_s21 = scalar_lea.vmem [#allocation15], %s6217_s0 }
  0xf8   : > { %s6970_s25 = sld [smem:[#allocation45_spill]]  ;;  %s983_s9 = scalar_lea.vmem [#allocation17], %s6217_s0 }
  0xf9   : > { %s992_s29 = scalar_lea.vmem [#allocation18], %s6217_s0 }
  0xfa   : > { %p1114_p11 = scmp.lt.s32.totalorder %s6963_s27, 1  ;;  %p4592_p3 = scmp.ne.s32.totalorder %s6963_s27, 0 }
  0xfc   : > { %s6226_s22 = scalar_select %p1114_p11, %s6963_s27, 1 }
  0xfd   : > { %1147 = sbr.rel (%p4592_p3) target bundleno = 260 (0x104), region = 156 }
  0xfe   : > { %s1122_s1 = scalar_lea.vmem %s6966_s5, %s6226_s22  ;;  %s1125_s28 = scalar_lea.vmem %s6967_s26, %s6226_s22 }
  0xff   : > { %s5124_s17 = smul.u32 3, %s6226_s22  ;;  %s947_s5 = scalar_lea.vmem [#allocation13], %s6214_s18 }
 0x100   : > { %s6267_s26 = scalar_lea.vmem [#allocation16], %s6217_s0 }
 0x101   : > { %s6252_s24 = scalar_lea.vmem %s6969_s19, %s5124_s17  ;;  %s6257_s30 = scalar_lea.vmem %s6970_s25, %s5124_s17 }
 0x102   : > { %v1148_v0 = vld [vmem:[#allocation7] sm:$0xff]  ;;  %vm1150_vm0 = vcmask 261120   ;;  %v1149_v1 = vld [vmem:[#allocation7 + $0x8] sm:$0xff] }
 0x103   : > { %1151 = vst.msk [vmem:[#allocation2] sm:$0xff] %vm1150_vm0, %v1148_v0  ;;  %1152 = vst.msk [vmem:[#allocation2 + $0x8] sm:$0xff] %vm1150_vm0, %v1149_v1 }
 0x104 PF: > { %s6971_s6 = scalar_lea.vmem [#allocation10], %s6217_s0  ;;  %v5806_v3 = vmov 0.0   ;;  %vm5807_vm1 = vmmov 0   ;;  %vm1188_vm2 = vcmask 261120   ;;  %v4593_v9 = vld [vmem:[%s930_s11] ss:$0 sm:$0xff] }
 0x105   : > { %v5281_v2 = vld [vmem:[%s6971_s6 + $0x8] sm:$0xff]   ;;  %4796 = vmatprep.subr.bf16.mxu0 %v5806_v3  ;;  %4804 = vmatprep.subr.bf16.mxu1 %v5806_v3  ;;  %s6972_s7 = smov %s6971_s6  ;;  %s5808_s17 = smov 120   ;;  %vm1249_vm3 = vcmask 64512   ;;  %vm1313_vm4 = vcmask 1043456   ;;  %v1234_v56 = vld [vmem:[%s6261_s4] sm:$0xf] }
 0x106   : > { %4797 = vmatpush3.bf16.msra.mxu0 %v5281_v2  ;;  %v5282_v4 = vld [vmem:[%s6972_s7] sm:$0xff]   ;;  %4800 = vmatprep.mubr.msk.bf16.mxu0 %vm5807_vm1, %v5806_v3  ;;  %s5809_s27 = smov 96   ;;  %s5810_s23 = smov 88   ;;  %v6314_v21 = vld [vmem:[#allocation3] ss:$0 sm:$0xff]  ;;  %v6342_v57 = vsel %vm1313_vm4, %v1234_v56, 0 }
 0x107   : > { %4798 = vmatprep.subr.bf16.mxu0 %v5806_v3  ;;  %4806 = vmatprep.mubr.msk.bf16.mxu1 %vm5807_vm1, %v5806_v3  ;;  %s5811_s19 = smov 64   ;;  %s5812_s20 = smov 56   ;;  %v1235_v58 = vld [vmem:[%s6261_s4 + $0x4] sm:$0xf] }
 0x108   : > { %s5813_s15 = smov 112   ;;  %s5814_s25 = smov 80   ;;  %v6348_v59 = vsel %vm1313_vm4, %v1235_v58, 0 }
 0x109   : > { %s5815_s11 = smov 72   ;;  %s5816_s6 = smov 104  }
 0x10a   : > { %v6280_v5 = vld [vmem:[#allocation2] sm:$0xff]  ;;  %v6282_v6 = vld [vmem:[#allocation2 + $0x8] sm:$0xff]  ;;  %4799 = vmatpush3.bf16.msra.mxu0 %v5282_v4  ;;  %s5817_s7 = smov 48   ;;  %s5818_s3 = smov 40  }
 0x10b   : > { %v1164_v7 = vpack.c.bf16 %v6282_v6, %v6280_v5  ;;  %4810 = vmatprep.subr.bf16.mxu0 %v5806_v3 }
 0x10d   : > { %4801 = vmatmul.mubr.msk.bf16.vlgmr.msra.gmra.mxu0 %vm1188_vm2, %v1164_v7 }
 0x10e   : > { %4812 = vmatprep.mubr.msk.bf16.mxu0 %vm5807_vm1, %v5806_v3 }
 0x1cd   : > { %v1226_v8 = vpop.f32.mrf.mxu0 }
 0x1ce   : > { %v1227_v12 = vadd.f32 %v4593_v9, %v1226_v8 }
 0x1cf   : > { %v4802_v10 = vpop.f32.mrf.mxu0 }
 0x1d1   : > { %v1229_v11 = vpop.f32.mrf.mxu0 }
 0x1d2   : > { %v1230_v13 = vadd.f32 %v4593_v9, %v1229_v11 }
 0x1d3   : > { %v4803_v14 = vpop.f32.mrf.mxu0 }
 0x1d4   : > { %v6295_v15 = vpack.c.bf16 %v1230_v13, %v1227_v12 }
 0x1d6   : > { %1358 = vrot.lane.b32.xlu1 %v6295_v15, %s5808_s17  ;;  %1247 = vrot.lane.b32.xlu0 %v6295_v15, %s5809_s27  ;;  %v6398_v56 = vrot.slane %v6295_v15, 4 }
 0x1da   : > { %1360 = vrot.lane.b32.xlu0 %v6295_v15, %s5810_s23 }
 0x248   : > { %v1248_v16 = vpop.permute.xlu0 %1247  ;;  %v1359_v20 = vpop.permute.xlu1 %1358 }
 0x249   : > { %v1254_v17 = vsel %vm1249_vm3, %v1248_v16, 0 }
 0x24a   : > { %4805 = vmatpush3.bf16.xpose.msra.mxu1 %v1254_v17 }
 0x24b   : > { %4816 = vmatprep.subr.bf16.mxu1 %v5806_v3 }
 0x24c   : > { %v1361_v18 = vpop.permute.xlu0 %1360 }
 0x24d   : > { %v1366_v19 = vsel %vm1249_vm3, %v1361_v18, 0 }
 0x251   : > { %4807 = vmatmul.mubr.msk.bf16.vlgmr.msra.gmra.mxu1 %vm1249_vm3, %v6295_v15 }
 0x252   : > { %4817 = vmatpush3.bf16.xpose.msra.mxu1 %v1366_v19  ;;  %4818 = vmatprep.mubr.msk.bf16.mxu1 %vm5807_vm1, %v5806_v3 }
 0x253   : > { %4828 = vmatprep.subr.bf16.mxu1 %v5806_v3 }
 0x259   : > { %4819 = vmatmul.mubr.msk.bf16.vlgmr.msra.gmra.mxu1 %vm1249_vm3, %v1359_v20 }
 0x25a   : > { %4830 = vmatprep.mubr.msk.bf16.mxu1 %vm5807_vm1, %v5806_v3  ;;  %4829 = vmatpush3.bf16.msra.mxu1 %v6348_v59 }
 0x25b   : > { %4840 = vmatprep.subr.bf16.mxu1 %v5806_v3 }
 0x311   : > { %v1290_v22 = vpop.f32.mrf.mxu1 }
 0x312   : > { %v1291_v23 = vadd.f32 %v6314_v21, %v1290_v22 }
 0x313   : > { %v4808_v24 = vpop.f32.mrf.mxu1 }
 0x314   : > { %v1296_v25 = vsel %vm1249_vm3, %v1291_v23, -inf }
 0x315   : > { %1297 = vmax.xlane.f32.xlu1 %v1296_v25  ;;  %v1293_v26 = vpop.f32.mrf.mxu1 }
 0x317   : > { %v4809_v27 = vpop.f32.mrf.mxu1 }
 0x319   : > { %v1402_v28 = vpop.f32.mrf.mxu1 }
 0x31a   : > { %v1403_v29 = vadd.f32 %v6314_v21, %v1402_v28 }
 0x31b   : > { %v4820_v30 = vpop.f32.mrf.mxu1 }
 0x31c   : > { %v1408_v31 = vsel %vm1249_vm3, %v1403_v29, -inf }
 0x31d   : > { %1409 = vmax.xlane.f32.xlu0 %v1408_v31  ;;  %v1405_v32 = vpop.f32.mrf.mxu1 }
 0x31f   : > { %v4821_v33 = vpop.f32.mrf.mxu1 }
 0x39e   : > { %v1298_v34 = vpop.xlane.xlu1 %1297 }
 0x39f   : > { %v1299_v35 = vsub.f32 %v1291_v23, %v1298_v34 }
 0x3a1   : > { %v1300_v36 = vmul.f32 1.442695, %v1299_v35 }
 0x3a3   : > { %5291 = vpow2.f32 %v1300_v36 }
 0x3a6   : > { %v1410_v37 = vpop.xlane.xlu0 %1409 }
 0x3a7   : > { %v1411_v38 = vsub.f32 %v1403_v29, %v1410_v37 }
 0x3a9   : > { %v1412_v39 = vmul.f32 1.442695, %v1411_v38 }
 0x3ab   : > { %5293 = vpow2.f32 %v1412_v39 }
 0x3b0   : > { %v5292_v40 = vpop.eup %5291 }
 0x3b1   : > { %v1302_v41 = vsel %vm1249_vm3, %v5292_v40, 0.0 }
 0x3b2   : > { %1303 = vadd.xlane.f32.xlu0 %v1302_v41 }
 0x3b8   : > { %v5294_v42 = vpop.eup %5293 }
 0x3b9   : > { %v1414_v43 = vsel %vm1249_vm3, %v5294_v42, 0.0 }
 0x3ba   : > { %1415 = vadd.xlane.f32.xlu1 %v1414_v43  ;;  %v1236_v43 = vld [vmem:[%s6261_s4 + $0x8] sm:$0xf] }
 0x3c8   : > { %1308 = vrot.lane.b32.xlu0 %v6295_v15, %s5811_s19 }
 0x3cb   : > { %1420 = vrot.lane.b32.xlu1 %v6295_v15, %s5812_s20 }
 0x3cc   : > { %1561 = vrot.lane.b32.xlu0 %v6295_v15, %s5813_s15 }
 0x3cf   : > { %1563 = vrot.lane.b32.xlu1 %v6295_v15, %s5814_s25 }
 0x43b   : > { %v1304_v44 = vpop.xlane.xlu0 %1303 }
 0x43c   : > { %5295 = vrcp.f32 %v1304_v44  ;;  %v6386_v44 = vsel %vm1313_vm4, %v1236_v43, 0 }
 0x43f   : > { %v1309_v45 = vpop.permute.xlu0 %1308 }
 0x440   : > { %v1315_v46 = vsel %vm1313_vm4, %v1309_v45, 0 }
 0x441   : > { %4811 = vmatpush3.bf16.msra.mxu0 %v1315_v46 }
 0x442   : > { %4822 = vmatprep.subr.bf16.mxu0 %v5806_v3 }
 0x443   : > { %v1416_v47 = vpop.xlane.xlu1 %1415  ;;  %v1562_v11 = vpop.permute.xlu0 %1561 }
 0x444   : > { %5297 = vrcp.f32 %v1416_v47 }
 0x447   : > { %v1421_v50 = vpop.permute.xlu1 %1420 }
 0x448   : > { %v1426_v52 = vsel %vm1313_vm4, %v1421_v50, 0 }
 0x449   : > { %v5296_v48 = vpop.eup %5295 }
 0x44a   : > { %v1306_v49 = vmul.f32 %v5296_v48, %v5292_v40 }
 0x44b   : > { %v1564_v1 = vpop.permute.xlu1 %1563 }
 0x44c   : > { %v1307_v51 = vpack.c.bf16 %v1306_v49, %v1306_v49  ;;  %v1569_v8 = vsel %vm1249_vm3, %v1564_v1, 0 }
 0x44e   : > { %4813 = vmatmul.mubr.msk.bf16.vlgmr.msra.gmra.mxu0 %vm1249_vm3, %v1307_v51 }
 0x44f   : > { %4823 = vmatpush3.bf16.msra.mxu0 %v1426_v52  ;;  %4824 = vmatprep.mubr.msk.bf16.mxu0 %vm5807_vm1, %v5806_v3 }
 0x450   : > { %4834 = vmatprep.subr.bf16.mxu0 %v5806_v3 }
 0x451   : > { %v5298_v53 = vpop.eup %5297 }
 0x452   : > { %v1418_v54 = vmul.f32 %v5298_v53, %v5294_v42 }
 0x454   : > { %v1419_v55 = vpack.c.bf16 %v1418_v54, %v1418_v54 }
 0x456   : > { %4825 = vmatmul.mubr.msk.bf16.vlgmr.msra.gmra.mxu0 %vm1249_vm3, %v1419_v55 }
 0x457   : > { %4836 = vmatprep.mubr.msk.bf16.mxu0 %vm5807_vm1, %v5806_v3  ;;  %4835 = vmatpush3.bf16.msra.mxu0 %v6342_v57 }
 0x458   : > { %4846 = vmatprep.subr.bf16.mxu0 %v5806_v3 }
 0x50e   : > { %v1351_v60 = vpop.f32.mrf.mxu0 }
 0x50f   : > { %v1357_v61 = vpack.c.bf16 %v1351_v60, %v1351_v60 }
 0x510   : > { %v4814_v62 = vpop.f32.mrf.mxu0 }
 0x511   : > { %4837 = vmatmul.mubr.msk.bf16.vlgmr.msra.gmra.mxu0 %vm1249_vm3, %v1357_v61 }
 0x512   : > { %v1354_v63 = vpop.f32.mrf.mxu0  ;;  %4848 = vmatprep.mubr.msk.bf16.mxu0 %vm5807_vm1, %v5806_v3 }
 0x514   : > { %v4815_v0 = vpop.f32.mrf.mxu0 }
 0x516   : > { %v1462_v2 = vpop.f32.mrf.mxu0 }
 0x517   : > { %v1468_v4 = vpack.c.bf16 %v1462_v2, %v1462_v2 }
 0x518   : > { %v4826_v7 = vpop.f32.mrf.mxu0 }
 0x519   : > { %4831 = vmatmul.mubr.msk.bf16.vlgmr.msra.gmra.mxu1 %vm1249_vm3, %v1468_v4 }
 0x51a   : > { %4841 = vmatpush3.bf16.xpose.msra.mxu1 %v1569_v8  ;;  %v1465_v9 = vpop.f32.mrf.mxu0  ;;  %4842 = vmatprep.mubr.msk.bf16.mxu1 %vm5807_vm1, %v5806_v3 }
 0x51b   : > { %4852 = vmatprep.subr.bf16.mxu1 %v5806_v3 }
 0x51c   : > { %v4827_v10 = vpop.f32.mrf.mxu0 }
 0x521   : > { %4843 = vmatmul.mubr.msk.bf16.vlgmr.msra.gmra.mxu1 %vm1249_vm3, %v1562_v11 }
 0x522   : > { %4854 = vmatprep.mubr.msk.bf16.mxu1 %vm5807_vm1, %v5806_v3  ;;  %4853 = vmatpush3.bf16.msra.mxu1 %v6386_v44 }
 0x523   : > { %4864 = vmatprep.subr.bf16.mxu1 %v5806_v3 }
 0x5d1   : > { %v1555_v12 = vpop.f32.mrf.mxu0 }
 0x5d3   : > { %v4838_v13 = vpop.f32.mrf.mxu0 }
 0x5d5   : > { %v1558_v14 = vpop.f32.mrf.mxu0 }
 0x5d7   : > { %v4839_v16 = vpop.f32.mrf.mxu0 }
 0x5d9   : > { %v1509_v17 = vpop.f32.mrf.mxu1 }
 0x5da   : > { %v6363_v18 = vadd.f32 %v1555_v12, %v1509_v17 }
 0x5db   : > { %v4832_v19 = vpop.f32.mrf.mxu1 }
 0x5dd   : > { %v1512_v20 = vpop.f32.mrf.mxu1 }
 0x5df   : > { %v4833_v22 = vpop.f32.mrf.mxu1 }
 0x5e1   : > { %v1605_v23 = vpop.f32.mrf.mxu1 }
 0x5e2   : > { %v1606_v24 = vadd.f32 %v6314_v21, %v1605_v23 }
 0x5e3   : > { %v4844_v25 = vpop.f32.mrf.mxu1 }
 0x5e4   : > { %v1611_v26 = vsel %vm1249_vm3, %v1606_v24, -inf  ;;  %v6437_v25 = vld [vmem:[#allocation3 + $0x1] ss:$0 sm:$0xff] }
 0x5e5   : > { %1612 = vmax.xlane.f32.xlu1 %v1611_v26  ;;  %v1608_v27 = vpop.f32.mrf.mxu1 }
 0x5e7   : > { %v4845_v28 = vpop.f32.mrf.mxu1 }
 0x5f6   : > { %1721 = vrot.lane.b32.xlu1 %v6295_v15, %s5815_s11 }
 0x5fa   : > { %1719 = vrot.lane.b32.xlu1 %v6295_v15, %s5816_s6 }
 0x66e   : > { %v1613_v29 = vpop.xlane.xlu1 %1612 }
 0x66f   : > { %v1614_v30 = vsub.f32 %v1606_v24, %v1613_v29 }
 0x671   : > { %v1615_v31 = vmul.f32 1.442695, %v1614_v30 }
 0x672   : > { %v1722_v39 = vpop.permute.xlu1 %1721 }
 0x673   : > { %5299 = vpow2.f32 %v1615_v31  ;;  %v1727_v41 = vsel %vm1249_vm3, %v1722_v39, 0 }
 0x676   : > { %v1720_v42 = vpop.permute.xlu1 %1719 }
 0x680   : > { %v5300_v32 = vpop.eup %5299 }
 0x681   : > { %v1617_v33 = vsel %vm1249_vm3, %v5300_v32, 0.0 }
 0x682   : > { %1618 = vadd.xlane.f32.xlu0 %v1617_v33 }
 0x698   : > { %1623 = vrot.lane.b32.xlu0 %v6295_v15, %s5817_s7 }
 0x70b   : > { %v1619_v34 = vpop.xlane.xlu0 %1618 }
 0x70c   : > { %5301 = vrcp.f32 %v1619_v34 }
 0x70f   : > { %v1624_v35 = vpop.permute.xlu0 %1623 }
 0x710   : > { %v1629_v36 = vsel %vm1313_vm4, %v1624_v35, 0 }
 0x711   : > { %4847 = vmatpush3.bf16.msra.mxu0 %v1629_v36 }
 0x712   : > { %4858 = vmatprep.subr.bf16.mxu0 %v5806_v3 }
 0x719   : > { %v5302_v37 = vpop.eup %5301 }
 0x71a   : > { %v1621_v38 = vmul.f32 %v5302_v37, %v5300_v32 }
 0x71c   : > { %v1622_v40 = vpack.c.bf16 %v1621_v38, %v1621_v38 }
 0x71e   : > { %4849 = vmatmul.mubr.msk.bf16.vlgmr.msra.gmra.mxu0 %vm1249_vm3, %v1622_v40 }
 0x71f   : > { %4859 = vmatpush3.bf16.xpose.msra.mxu0 %v1727_v41  ;;  %4860 = vmatprep.mubr.msk.bf16.mxu0 %vm5807_vm1, %v5806_v3 }
 0x720   : > { %4870 = vmatprep.subr.bf16.mxu0 %v5806_v3 }
 0x726   : > { %4861 = vmatmul.mubr.msk.bf16.vlgmr.msra.gmra.mxu0 %vm1249_vm3, %v1720_v42 }
 0x727   : > { %4872 = vmatprep.mubr.msk.bf16.mxu0 %vm5807_vm1, %v5806_v3 }
 0x7de   : > { %v1665_v45 = vpop.f32.mrf.mxu0 }
 0x7df   : > { %v1671_v46 = vpack.c.bf16 %v1665_v45, %v1665_v45 }
 0x7e0   : > { %v4850_v47 = vpop.f32.mrf.mxu0 }
 0x7e1   : > { %4855 = vmatmul.mubr.msk.bf16.vlgmr.msra.gmra.mxu1 %vm1249_vm3, %v1671_v46 }
 0x7e2   : > { %v1668_v48 = vpop.f32.mrf.mxu0  ;;  %4866 = vmatprep.mubr.msk.bf16.mxu1 %vm5807_vm1, %v5806_v3 }
 0x7e4   : > { %v4851_v49 = vpop.f32.mrf.mxu0 }
 0x7e6   : > { %v1763_v50 = vpop.f32.mrf.mxu0 }
 0x7e7   : > { %v1764_v51 = vadd.f32 %v6314_v21, %v1763_v50 }
 0x7e8   : > { %v4862_v52 = vpop.f32.mrf.mxu0 }
 0x7e9   : > { %v1769_v53 = vsel %vm1249_vm3, %v1764_v51, -inf }
 0x7ea   : > { %1770 = vmax.xlane.f32.xlu0 %v1769_v53  ;;  %v1766_v54 = vpop.f32.mrf.mxu0 }
 0x7ec   : > { %v4863_v55 = vpop.f32.mrf.mxu0 }
 0x800   : > { %1781 = vrot.lane.b32.xlu0 %v6295_v15, %s5818_s3 }
 0x804   : > { %2004 = vrot.lane.b32.xlu0 %v6398_v56, %s5810_s23 }
 0x873   : > { %v1771_v58 = vpop.xlane.xlu0 %1770 }
 0x874   : > { %v1772_v60 = vsub.f32 %v1764_v51, %v1771_v58 }
 0x876   : > { %v1773_v61 = vmul.f32 1.442695, %v1772_v60 }
 0x877   : > { %v1782_v21 = vpop.permute.xlu0 %1781 }
 0x878   : > { %5303 = vpow2.f32 %v1773_v61  ;;  %v1787_v62 = vsel %vm1313_vm4, %v1782_v21, 0 }
 0x879   : > { %4865 = vmatpush3.bf16.msra.mxu1 %v1787_v62 }
 0x87a   : > { %4876 = vmatprep.subr.bf16.mxu1 %v5806_v3 }
 0x87b   : > { %v2005_v14 = vpop.permute.xlu0 %2004 }
 0x87c   : > { %v2010_v16 = vsel %vm1249_vm3, %v2005_v14, 0 }
 0x885   : > { %v5304_v63 = vpop.eup %5303 }
 0x886   : > { %v1775_v0 = vsel %vm1249_vm3, %v5304_v63, 0.0 }
 0x887   : > { %1776 = vadd.xlane.f32.xlu1 %v1775_v0 }
 0x898   : > { %1893 = vrot.lane.b32.xlu1 %v6398_v56, %s5809_s27 }
 0x89c   : > { %2002 = vrot.lane.b32.xlu1 %v6398_v56, %s5808_s17 }
 0x8a1   : > { %v1712_v15 = vpop.f32.mrf.mxu1 }
 0x8a2   : > { %v6410_v1 = vadd.f32 %v1712_v15, %v6363_v18  ;;  %v1237_v18 = vld [vmem:[%s6261_s4 + $0xc] sm:$0xf]  ;;  %s6973_s4 = sld [smem:[#allocation40_spill]] }
 0x8a3   : > { %v4856_v2 = vpop.f32.mrf.mxu1  ;;  %v6430_v19 = vsel %vm1313_vm4, %v1237_v18, 0 }
 0x8a4   : > { %4871 = vmatpush3.bf16.msra.mxu0 %v6430_v19 }
 0x8a5   : > { %v1715_v4 = vpop.f32.mrf.mxu1  ;;  %4882 = vmatprep.subr.bf16.mxu0 %v5806_v3 }
 0x8a7   : > { %v4857_v7 = vpop.f32.mrf.mxu1 }
 0x910   : > { %v1777_v8 = vpop.xlane.xlu1 %1776 }
 0x911   : > { %5305 = vrcp.f32 %v1777_v8 }
 0x914   : > { %v1894_v11 = vpop.permute.xlu1 %1893 }
 0x915   : > { %v1899_v13 = vsel %vm1249_vm3, %v1894_v11, 0 }
 0x918   : > { %v2003_v17 = vpop.permute.xlu1 %2002 }
 0x91e   : > { %v5306_v9 = vpop.eup %5305 }
 0x91f   : > { %v1779_v10 = vmul.f32 %v5306_v9, %v5304_v63 }
 0x921   : > { %v1780_v12 = vpack.c.bf16 %v1779_v10, %v1779_v10 }
 0x923   : > { %4867 = vmatmul.mubr.msk.bf16.vlgmr.msra.gmra.mxu1 %vm1249_vm3, %v1780_v12 }
 0x924   : > { %4877 = vmatpush3.bf16.xpose.msra.mxu1 %v1899_v13  ;;  %4878 = vmatprep.mubr.msk.bf16.mxu1 %vm5807_vm1, %v5806_v3 }
 0x925   : > { %4888 = vmatprep.subr.bf16.mxu1 %v5806_v3 }
 0x92b   : > { %4879 = vmatmul.mubr.msk.bf16.vlgmr.msra.gmra.mxu1 %vm1249_vm3, %v6398_v56 }
 0x92c   : > { %4889 = vmatpush3.bf16.xpose.msra.mxu1 %v2010_v16  ;;  %4890 = vmatprep.mubr.msk.bf16.mxu1 %vm5807_vm1, %v5806_v3 }
 0x92d   : > { %4900 = vmatprep.subr.bf16.mxu1 %v5806_v3 }
 0x933   : > { %4891 = vmatmul.mubr.msk.bf16.vlgmr.msra.gmra.mxu1 %vm1249_vm3, %v2003_v17 }
 0x934   : > { %4901 = vmatpush3.bf16.msra.mxu1 %v6348_v59  ;;  %4902 = vmatprep.mubr.msk.bf16.mxu1 %vm5807_vm1, %v5806_v3 }
 0x935   : > { %4912 = vmatprep.subr.bf16.mxu1 %v5806_v3 }
 0x9e3   : > { %v1823_v20 = vpop.f32.mrf.mxu1 }
 0x9e4   : > { %v1829_v22 = vpack.c.bf16 %v1823_v20, %v1823_v20 }
 0x9e5   : > { %v4868_v23 = vpop.f32.mrf.mxu1 }
 0x9e6   : > { %4873 = vmatmul.mubr.msk.bf16.vlgmr.msra.gmra.mxu0 %vm1249_vm3, %v1829_v22 }
 0x9e7   : > { %v1826_v24 = vpop.f32.mrf.mxu1  ;;  %4884 = vmatprep.mubr.msk.bf16.mxu0 %vm5807_vm1, %v5806_v3 }
 0x9e9   : > { %v4869_v59 = vpop.f32.mrf.mxu1 }
 0x9eb   : > { %v1935_v26 = vpop.f32.mrf.mxu1 }
 0x9ec   : > { %v1936_v27 = vadd.f32 %v6437_v25, %v1935_v26 }
 0x9ed   : > { %v4880_v28 = vpop.f32.mrf.mxu1 }
 0x9ee   : > { %v1941_v29 = vsel %vm1249_vm3, %v1936_v27, -inf }
 0x9ef   : > { %1942 = vmax.xlane.f32.xlu0 %v1941_v29  ;;  %v1938_v30 = vpop.f32.mrf.mxu1 }
 0x9f1   : > { %v4881_v31 = vpop.f32.mrf.mxu1 }
 0x9f3   : > { %v2046_v32 = vpop.f32.mrf.mxu1 }
 0x9f4   : > { %v2047_v33 = vadd.f32 %v6437_v25, %v2046_v32 }
 0x9f5   : > { %v4892_v34 = vpop.f32.mrf.mxu1 }
 0x9f6   : > { %v2052_v35 = vsel %vm1249_vm3, %v2047_v33, -inf }
 0x9f7   : > { %2053 = vmax.xlane.f32.xlu1 %v2052_v35  ;;  %v2049_v36 = vpop.f32.mrf.mxu1 }
 0x9f9   : > { %v4893_v37 = vpop.f32.mrf.mxu1 }
 0xa08   : > { %1953 = vrot.lane.b32.xlu1 %v6398_v56, %s5811_s19  ;;  %s6975_s19 = sld [smem:[#allocation39_spill]] }
 0xa0c   : > { %2201 = vrot.lane.b32.xlu1 %v6398_v56, %s5814_s25 }
 0xa10   : > { %2199 = vrot.lane.b32.xlu1 %v6398_v56, %s5813_s15 }
 0xa78   : > { %v1943_v38 = vpop.xlane.xlu0 %1942 }
 0xa79   : > { %v1944_v39 = vsub.f32 %v1936_v27, %v1943_v38 }
 0xa7b   : > { %v1945_v40 = vmul.f32 1.442695, %v1944_v39 }
 0xa7d   : > { %5307 = vpow2.f32 %v1945_v40 }
 0xa80   : > { %v2054_v41 = vpop.xlane.xlu1 %2053 }
 0xa81   : > { %v2055_v42 = vsub.f32 %v2047_v33, %v2054_v41 }
 0xa83   : > { %v2056_v43 = vmul.f32 1.442695, %v2055_v42 }
 0xa84   : > { %v1954_v45 = vpop.permute.xlu1 %1953 }
 0xa85   : > { %5309 = vpow2.f32 %v2056_v43  ;;  %v1959_v46 = vsel %vm1313_vm4, %v1954_v45, 0 }
 0xa86   : > { %4883 = vmatpush3.bf16.msra.mxu0 %v1959_v46 }
 0xa87   : > { %4894 = vmatprep.subr.bf16.mxu0 %v5806_v3 }
 0xa88   : > { %v2202_v11 = vpop.permute.xlu1 %2201 }
 0xa8a   : > { %v5308_v47 = vpop.eup %5307 }
 0xa8b   : > { %v1947_v48 = vsel %vm1249_vm3, %v5308_v47, 0.0 }
 0xa8c   : > { %1948 = vadd.xlane.f32.xlu0 %v1947_v48  ;;  %v2200_v18 = vpop.permute.xlu1 %2199 }
 0xa92   : > { %v5310_v49 = vpop.eup %5309 }
 0xa93   : > { %v2058_v50 = vsel %vm1249_vm3, %v5310_v49, 0.0 }
 0xa94   : > { %2059 = vadd.xlane.f32.xlu0 %v2058_v50 }
 0xaa6   : > { %v1870_v51 = vpop.f32.mrf.mxu0 }
 0xaa7   : > { %v6454_v52 = vadd.f32 %v1870_v51, %v6410_v1 }
 0xaa8   : > { %v4874_v53 = vpop.f32.mrf.mxu0 }
 0xaaa   : > { %2064 = vrot.lane.b32.xlu0 %v6398_v56, %s5812_s20  ;;  %v1873_v54 = vpop.f32.mrf.mxu0  ;;  %s6976_s20 = scalar_lea.vmem %s6975_s19, %s6226_s22 }
 0xaab   : > { %v4610_v54 = vld [vmem:[%s947_s5] ss:$0 sm:$0xff]  ;;  %s6974_s5 = scalar_lea.vmem %s6973_s4, %s6226_s22 }
 0xaac   : > { %v4875_v55 = vpop.f32.mrf.mxu0 }
 0xb15   : > { %v1949_v58 = vpop.xlane.xlu0 %1948 }
 0xb16   : > { %5311 = vrcp.f32 %v1949_v58 }
 0xb1d   : > { %v2060_v60 = vpop.xlane.xlu0 %2059 }
 0xb1e   : > { %5313 = vrcp.f32 %v2060_v60  ;;  %v1883_v60 = vadd.f32 %v4610_v54, %v6454_v52 }
 0xb21   : > { %v2065_v62 = vpop.permute.xlu0 %2064 }
 0xb22   : > { %v2070_v0 = vsel %vm1313_vm4, %v2065_v62, 0 }
 0xb23   : > { %v5312_v61 = vpop.eup %5311 }
 0xb24   : > { %v1951_v21 = vmul.f32 %v5312_v61, %v5308_v47 }
 0xb26   : > { %v1952_v63 = vpack.c.bf16 %v1951_v21, %v1951_v21 }
 0xb28   : > { %4885 = vmatmul.mubr.msk.bf16.vlgmr.msra.gmra.mxu0 %vm1249_vm3, %v1952_v63  ;;  %v2510_v63 = vadd.f32 %v1883_v60, %v6280_v5  ;;  %v4624_v60 = vld [vmem:[%s6252_s24] ss:$0 sm:$0xff] }
 0xb29   : > { %4895 = vmatpush3.bf16.msra.mxu0 %v2070_v0  ;;  %4896 = vmatprep.mubr.msk.bf16.mxu0 %vm5807_vm1, %v5806_v3 }
 0xb2a   : > { %4906 = vmatprep.subr.bf16.mxu0 %v5806_v3 }
 0xb2b   : > { %v5314_v15 = vpop.eup %5313 }
 0xb2c   : > { %v2062_v1 = vmul.f32 %v5314_v15, %v5310_v49 }
 0xb2e   : > { %v2063_v2 = vpack.c.bf16 %v2062_v1, %v2062_v1  ;;  %v2512_v1 = vsel %vm1188_vm2, %v2510_v63, 0.0 }
 0xb30   : > { %4897 = vmatmul.mubr.msk.bf16.vlgmr.msra.gmra.mxu0 %vm1249_vm3, %v2063_v2 }
 0xb31   : > { %4907 = vmatpush3.bf16.msra.mxu0 %v6342_v57  ;;  %4908 = vmatprep.mubr.msk.bf16.mxu0 %vm5807_vm1, %v5806_v3  ;;  %v2207_v57 = vsel %vm1249_vm3, %v2202_v11, 0 }
 0xb32   : > { %4918 = vmatprep.subr.bf16.mxu0 %v5806_v3 }
 0xbe8   : > { %v1995_v4 = vpop.f32.mrf.mxu0 }
 0xbe9   : > { %v2001_v7 = vpack.c.bf16 %v1995_v4, %v1995_v4 }
 0xbea   : > { %v4886_v8 = vpop.f32.mrf.mxu0 }
 0xbeb   : > { %4909 = vmatmul.mubr.msk.bf16.vlgmr.msra.gmra.mxu0 %vm1249_vm3, %v2001_v7 }
 0xbec   : > { %v1998_v9 = vpop.f32.mrf.mxu0  ;;  %4920 = vmatprep.mubr.msk.bf16.mxu0 %vm5807_vm1, %v5806_v3 }
 0xbee   : > { %v4887_v10 = vpop.f32.mrf.mxu0 }
 0xbf0   : > { %v2106_v12 = vpop.f32.mrf.mxu0 }
 0xbf1   : > { %v2112_v13 = vpack.c.bf16 %v2106_v12, %v2106_v12 }
 0xbf2   : > { %v4898_v14 = vpop.f32.mrf.mxu0 }
 0xbf3   : > { %4903 = vmatmul.mubr.msk.bf16.vlgmr.msra.gmra.mxu1 %vm1249_vm3, %v2112_v13 }
 0xbf4   : > { %4913 = vmatpush3.bf16.xpose.msra.mxu1 %v2207_v57  ;;  %v2109_v16 = vpop.f32.mrf.mxu0  ;;  %4914 = vmatprep.mubr.msk.bf16.mxu1 %vm5807_vm1, %v5806_v3 }
 0xbf5   : > { %4924 = vmatprep.subr.bf16.mxu1 %v5806_v3 }
 0xbf6   : > { %v4899_v17 = vpop.f32.mrf.mxu0 }
 0xbfb   : > { %4915 = vmatmul.mubr.msk.bf16.vlgmr.msra.gmra.mxu1 %vm1249_vm3, %v2200_v18 }
 0xbfc   : > { %4925 = vmatpush3.bf16.msra.mxu1 %v6386_v44  ;;  %4926 = vmatprep.mubr.msk.bf16.mxu1 %vm5807_vm1, %v5806_v3 }
 0xbfd   : > { %4936 = vmatprep.subr.bf16.mxu1 %v5806_v3 }
 0xcab   : > { %v2193_v20 = vpop.f32.mrf.mxu0 }
 0xcad   : > { %v4910_v22 = vpop.f32.mrf.mxu0 }
 0xcaf   : > { %v2196_v23 = vpop.f32.mrf.mxu0 }
 0xcb1   : > { %v4911_v24 = vpop.f32.mrf.mxu0 }
 0xcb3   : > { %v2150_v59 = vpop.f32.mrf.mxu1 }
 0xcb4   : > { %v6481_v26 = vadd.f32 %v2193_v20, %v2150_v59 }
 0xcb5   : > { %v4904_v27 = vpop.f32.mrf.mxu1 }
 0xcb7   : > { %v2153_v28 = vpop.f32.mrf.mxu1 }
 0xcb9   : > { %v4905_v29 = vpop.f32.mrf.mxu1 }
 0xcbb   : > { %v2243_v30 = vpop.f32.mrf.mxu1 }
 0xcbc   : > { %v2244_v31 = vadd.f32 %v6437_v25, %v2243_v30 }
 0xcbd   : > { %v4916_v32 = vpop.f32.mrf.mxu1 }
 0xcbe   : > { %v2249_v44 = vsel %vm1249_vm3, %v2244_v31, -inf }
 0xcbf   : > { %2250 = vmax.xlane.f32.xlu0 %v2249_v44  ;;  %v2246_v33 = vpop.f32.mrf.mxu1 }
 0xcc1   : > { %v4917_v34 = vpop.f32.mrf.mxu1 }
 0xcd5   : > { %2261 = vrot.lane.b32.xlu0 %v6398_v56, %s5817_s7 }
 0xcd9   : > { %2354 = vrot.lane.b32.xlu0 %v6398_v56, %s5816_s6 }
 0xd48   : > { %v2251_v35 = vpop.xlane.xlu0 %2250 }
 0xd49   : > { %v2252_v36 = vsub.f32 %v2244_v31, %v2251_v35 }
 0xd4b   : > { %v2253_v37 = vmul.f32 1.442695, %v2252_v36 }
 0xd4c   : > { %v2262_v38 = vpop.permute.xlu0 %2261 }
 0xd4d   : > { %5315 = vpow2.f32 %v2253_v37  ;;  %v2267_v39 = vsel %vm1313_vm4, %v2262_v38, 0 }
 0xd4e   : > { %4919 = vmatpush3.bf16.msra.mxu0 %v2267_v39 }
 0xd4f   : > { %4930 = vmatprep.subr.bf16.mxu0 %v5806_v3 }
 0xd50   : > { %v2355_v49 = vpop.permute.xlu0 %2354 }
 0xd5a   : > { %v5316_v40 = vpop.eup %5315 }
 0xd5b   : > { %v2255_v41 = vsel %vm1249_vm3, %v5316_v40, 0.0 }
 0xd5c   : > { %2256 = vadd.xlane.f32.xlu1 %v2255_v41  ;;  %v5284_v41 = vld [vmem:[%s965_s21] sm:$0xff]  }
 0xd6d   : > { %2356 = vrot.lane.b32.xlu1 %v6398_v56, %s5815_s11 }
 0xde5   : > { %v2257_v42 = vpop.xlane.xlu1 %2256 }
 0xde6   : > { %5317 = vrcp.f32 %v2257_v42  ;;  %v1155_v42 = vld [vmem:[#allocation8] sm:$0xff] }
 0xde9   : > { %v2357_v46 = vpop.permute.xlu1 %2356 }
 0xdea   : > { %v2362_v48 = vsel %vm1249_vm3, %v2357_v46, 0  ;;  %v5285_v46 = vld [vmem:[%s956_s13 + $0x8] sm:$0xff]  }
 0xdf3   : > { %v5318_v43 = vpop.eup %5317 }
 0xdf4   : > { %v2259_v45 = vmul.f32 %v5318_v43, %v5316_v40  ;;  %v1156_v43 = vld [vmem:[#allocation8 + $0x8] sm:$0xff] }
 0xdf6   : > { %v2260_v47 = vpack.c.bf16 %v2259_v45, %v2259_v45  ;;  %v1157_v45 = vpack.c.bf16 %v1156_v43, %v1155_v42 }
 0xdf8   : > { %4921 = vmatmul.mubr.msk.bf16.vlgmr.msra.gmra.mxu0 %vm1249_vm3, %v2260_v47  ;;  %v5286_v47 = vld [vmem:[%s956_s13] sm:$0xff]  }
 0xdf9   : > { %4931 = vmatpush3.bf16.xpose.msra.mxu0 %v2362_v48  ;;  %4932 = vmatprep.mubr.msk.bf16.mxu0 %vm5807_vm1, %v5806_v3 }
 0xdfa   : > { %4942 = vmatprep.subr.bf16.mxu0 %v5806_v3 }
 0xe00   : > { %4933 = vmatmul.mubr.msk.bf16.vlgmr.msra.gmra.mxu0 %vm1249_vm3, %v2355_v49 }
 0xe01   : > { %4943 = vmatpush3.bf16.msra.mxu0 %v6430_v19  ;;  %4944 = vmatprep.mubr.msk.bf16.mxu0 %vm5807_vm1, %v5806_v3 }
 0xe02   : > { %4956 = vmatprep.subr.bf16.mxu0 %v5806_v3 }
 0xeb8   : > { %v2303_v50 = vpop.f32.mrf.mxu0 }
 0xeb9   : > { %v2309_v51 = vpack.c.bf16 %v2303_v50, %v2303_v50 }
 0xeba   : > { %v4922_v53 = vpop.f32.mrf.mxu0 }
 0xebb   : > { %4927 = vmatmul.mubr.msk.bf16.vlgmr.msra.gmra.mxu1 %vm1249_vm3, %v2309_v51 }
 0xebc   : > { %v2306_v55 = vpop.f32.mrf.mxu0  ;;  %4938 = vmatprep.mubr.msk.bf16.mxu1 %vm5807_vm1, %v5806_v3 }
 0xebe   : > { %v4923_v58 = vpop.f32.mrf.mxu0 }
 0xec0   : > { %v2398_v19 = vpop.f32.mrf.mxu0 }
 0xec1   : > { %v2399_v61 = vadd.f32 %v6437_v25, %v2398_v19 }
 0xec2   : > { %v4934_v21 = vpop.f32.mrf.mxu0 }
 0xec3   : > { %v2404_v62 = vsel %vm1249_vm3, %v2399_v61, -inf }
 0xec4   : > { %2405 = vmax.xlane.f32.xlu1 %v2404_v62  ;;  %v2401_v0 = vpop.f32.mrf.mxu0  ;;  %v4625_v62 = vld [vmem:[%s6257_s30] ss:$0 sm:$0xff] }
 0xec6   : > { %v4935_v15 = vpop.f32.mrf.mxu0 }
 0xec8   : > { %2513 = vadd.xlane.f32.xlu1 %v2512_v1 }
 0xf4d   : > { %v2406_v2 = vpop.xlane.xlu1 %2405 }
 0xf4e   : > { %v2407_v4 = vsub.f32 %v2399_v61, %v2406_v2  ;;  %v4630_v2 = vld [vmem:[%s6974_s5] ss:$0 sm:$0xff] }
 0xf50   : > { %v2408_v7 = vmul.f32 1.442695, %v2407_v4 }
 0xf51   : > { %v2514_v24 = vpop.xlane.xlu1 %2513 }
 0xf52   : > { %5319 = vpow2.f32 %v2408_v7  ;;  %v2519_v59 = vmul.f32 0.03125, %v2514_v24 }
 0xf54   : > { %v2521_v29 = vsub.f32 %v2510_v63, %v2519_v59 }
 0xf56   : > { %v2523_v34 = vmul.f32 %v2521_v29, %v2521_v29 }
 0xf58   : > { %v2525_v35 = vsel %vm1188_vm2, %v2523_v34, 0.0 }
 0xf5f   : > { %v5320_v8 = vpop.eup %5319 }
 0xf60   : > { %v2410_v52 = vsel %vm1249_vm3, %v5320_v8, 0.0 }
 0xf61   : > { %2411 = vadd.xlane.f32.xlu0 %v2410_v52 }
 0xf77   : > { %2416 = vrot.lane.b32.xlu0 %v6398_v56, %s5818_s3 }
 0xf7b   : > { %v2347_v25 = vpop.f32.mrf.mxu1 }
 0xf7c   : > { %v2353_v5 = vadd.f32 %v2347_v25, %v6481_v26 }
 0xf7d   : > { %v4928_v9 = vpop.f32.mrf.mxu1 }
 0xf7f   : > { %v2350_v10 = vpop.f32.mrf.mxu1 }
 0xf81   : > { %v4929_v11 = vpop.f32.mrf.mxu1 }
 0xfea   : > { %v2412_v12 = vpop.xlane.xlu0 %2411 }
 0xfeb   : > { %5321 = vrcp.f32 %v2412_v12  ;;  %v4626_v12 = vld [vmem:[%s6976_s20] ss:$0 sm:$0xff] }
 0xfee   : > { %v2417_v13 = vpop.permute.xlu0 %2416 }
 0xfef   : > { %v2422_v14 = vsel %vm1313_vm4, %v2417_v13, 0 }
 0xff0   : > { %4937 = vmatpush3.bf16.msra.mxu1 %v2422_v14 }
 0xff1   : > { %4948 = vmatprep.subr.bf16.mxu1 %v5806_v3 }
 0xff8   : > { %v5322_v57 = vpop.eup %5321 }
 0xff9   : > { %v2414_v16 = vmul.f32 %v5322_v57, %v5320_v8 }
 0xffb   : > { %v2415_v17 = vpack.c.bf16 %v2414_v16, %v2414_v16 }
 0xffd   : > { %4939 = vmatmul.mubr.msk.bf16.vlgmr.msra.gmra.mxu1 %vm1249_vm3, %v2415_v17 }
 0xffe   : > { %4952 = vmatprep.mubr.msk.bf16.mxu1 %vm5807_vm1, %v5806_v3  ;;  %4949 = vmatpush3.bf16.msra.mxu1 %v5285_v46 }
 0xfff   : > { %4950 = vmatprep.subr.bf16.mxu1 %v5806_v3 }
0x1002   : > { %4951 = vmatpush3.bf16.msra.mxu1 %v5286_v47 }
0x1003   : > { %4964 = vmatprep.subr.bf16.mxu1 %v5806_v3 }
0x10bd   : > { %v2458_v56 = vpop.f32.mrf.mxu1 }
0x10be   : > { %v2464_v18 = vpack.c.bf16 %v2458_v56, %v2458_v56 }
0x10bf   : > { %v4940_v20 = vpop.f32.mrf.mxu1 }
0x10c0   : > { %4945 = vmatmul.mubr.msk.bf16.vlgmr.msra.gmra.mxu0 %vm1249_vm3, %v2464_v18 }
0x10c1   : > { %v2461_v22 = vpop.f32.mrf.mxu1  ;;  %4960 = vmatprep.mubr.msk.bf16.mxu0 %vm5807_vm1, %v5806_v3 }
0x10c3   : > { %v4941_v23 = vpop.f32.mrf.mxu1 }
0x10c4   : > { %v6586_v23 = vld [vmem:[#allocation5] ss:$0 sm:$0xff] }
0x1180   : > { %v2502_v26 = vpop.f32.mrf.mxu0 }
0x1181   : > { %v2508_v27 = vadd.f32 %v2502_v26, %v2353_v5 }
0x1182   : > { %v4946_v28 = vpop.f32.mrf.mxu0 }
0x1183   : > { %v2509_v30 = vadd.f32 %v4610_v54, %v2508_v27 }
0x1184   : > { %v2505_v31 = vpop.f32.mrf.mxu0 }
0x1185   : > { %v2511_v32 = vadd.f32 %v2509_v30, %v6282_v6  ;;  %v5283_v6 = vld [vmem:[%s965_s21 + $0x8] sm:$0xff]  }
0x1186   : > { %v4947_v44 = vpop.f32.mrf.mxu0  ;;  %4957 = vmatpush3.bf16.msra.mxu0 %v5283_v6 }
0x1187   : > { %v2515_v33 = vsel %vm1188_vm2, %v2511_v32, 0.0  ;;  %4958 = vmatprep.subr.bf16.mxu0 %v5806_v3 }
0x1188   : > { %2516 = vadd.xlane.f32.xlu1 %v2515_v33 }
0x118a   : > { %4959 = vmatpush3.bf16.msra.mxu0 %v5284_v41 }
0x118b   : > { %4970 = vmatprep.subr.bf16.mxu0 %v5806_v3 }
0x118c   : > { %2526 = vadd.xlane.f32.xlu1 %v2525_v35 }
0x118d   : > { %4961 = vmatmul.mubr.msk.bf16.vlgmr.msra.gmra.mxu0 %vm1188_vm2, %v1157_v45 }
0x118e   : > { %4972 = vmatprep.mubr.msk.bf16.mxu0 %vm5807_vm1, %v5806_v3 }
0x1211   : > { %v2517_v36 = vpop.xlane.xlu1 %2516 }
0x1212   : > { %v2520_v37 = vmul.f32 0.03125, %v2517_v36 }
0x1214   : > { %v2522_v38 = vsub.f32 %v2511_v32, %v2520_v37 }
0x1215   : > { %v2527_v48 = vpop.xlane.xlu1 %2526 }
0x1216   : > { %v2524_v39 = vmul.f32 %v2522_v38, %v2522_v38  ;;  %v2531_v49 = vmul.f32 0.03125, %v2527_v48 }
0x1218   : > { %v2528_v40 = vsel %vm1188_vm2, %v2524_v39, 0.0  ;;  %v2533_v50 = vadd.f32 1e-05, %v2531_v49 }
0x1219   : > { %2529 = vadd.xlane.f32.xlu1 %v2528_v40 }
0x121a   : > { %5323 = vrsqrt.f32 %v2533_v50 }
0x1227   : > { %v5324_v55 = vpop.eup %5323 }
0x1228   : > { %v2537_v58 = vmul.f32 %v5324_v55, %v2521_v29 }
0x122a   : > { %v2545_v21 = vmul.f32 %v4624_v60, %v2537_v58 }
0x122c   : > { %v6547_v0 = vadd.f32 %v4625_v62, %v2545_v21  ;;  %v2693_v21 = vld [vmem:[%s6267_s26 + $0x4] sm:$0xf] }
0x124d   : > { %v2683_v4 = vpop.f32.mrf.mxu0 }
0x124e   : > { %v2684_v8 = vadd.f32 %v4630_v2, %v2683_v4 }
0x124f   : > { %v4962_v7 = vpop.f32.mrf.mxu0 }
0x1251   : > { %v2686_v52 = vpop.f32.mrf.mxu0 }
0x1252   : > { %v2687_v25 = vadd.f32 %v4630_v2, %v2686_v52 }
0x1253   : > { %v4963_v5 = vpop.f32.mrf.mxu0 }
0x1254   : > { %v6561_v9 = vpack.c.bf16 %v2687_v25, %v2684_v8 }
0x1256   : > { %2815 = vrot.lane.b32.xlu1 %v6561_v9, %s5808_s17  ;;  %v2708_v10 = vsel %vm1249_vm3, %v6561_v9, 0 }
0x12a2   : > { %v2530_v51 = vpop.xlane.xlu1 %2529 }
0x12a3   : > { %v2532_v53 = vmul.f32 0.03125, %v2530_v51 }
0x12a5   : > { %v2534_v54 = vadd.f32 1e-05, %v2532_v53 }
0x12a7   : > { %5325 = vrsqrt.f32 %v2534_v54 }
0x12b4   : > { %v5326_v19 = vpop.eup %5325 }
0x12b5   : > { %v2538_v61 = vmul.f32 %v5326_v19, %v2522_v38  ;;  %v2692_v19 = vld [vmem:[%s6267_s26] sm:$0xf] }
0x12b7   : > { %v2546_v63 = vmul.f32 %v4624_v60, %v2538_v61  ;;  %v6614_v61 = vsel %vm1313_vm4, %v2692_v19, 0 }
0x12b9   : > { %v6549_v15 = vadd.f32 %v4625_v62, %v2546_v63  ;;  %v6620_v62 = vsel %vm1313_vm4, %v2693_v21, 0  ;;  %v6668_v21 = vrot.slane %v6561_v9, 4 }
0x12bb   : > { %v2555_v1 = vpack.c.bf16 %v6549_v15, %v6547_v0 }
0x12bd   : > { %4953 = vmatmul.mubr.msk.bf16.vlgmr.msra.gmra.mxu1 %vm1188_vm2, %v2555_v1 }
0x12be   : > { %4966 = vmatprep.mubr.msk.bf16.mxu1 %vm5807_vm1, %v5806_v3  ;;  %4965 = vmatpush3.bf16.xpose.msra.mxu1 %v2708_v10 }
0x12bf   : > { %4976 = vmatprep.subr.bf16.mxu1 %v5806_v3 }
0x12c8   : > { %v2816_v57 = vpop.permute.xlu1 %2815 }
0x12c9   : > { %v2821_v20 = vsel %vm1249_vm3, %v2816_v57, 0 }
0x137d   : > { %v2616_v11 = vpop.f32.mrf.mxu1 }
0x137e   : > { %v2617_v16 = vadd.f32 %v4626_v12, %v2616_v11 }
0x137f   : > { %v4954_v13 = vpop.f32.mrf.mxu1 }
0x1381   : > { %v2619_v14 = vpop.f32.mrf.mxu1 }
0x1382   : > { %v2620_v17 = vadd.f32 %v4626_v12, %v2619_v14 }
0x1383   : > { %v4955_v56 = vpop.f32.mrf.mxu1 }
0x1384   : > { %v6573_v18 = vpack.c.bf16 %v2620_v17, %v2617_v16 }
0x1386   : > { %2813 = vrot.lane.b32.xlu0 %v6573_v18, %s5808_s17  ;;  %4967 = vmatmul.mubr.msk.bf16.vlgmr.msra.gmra.mxu1 %vm1249_vm3, %v6573_v18 }
0x1387   : > { %4977 = vmatpush3.bf16.xpose.msra.mxu1 %v2821_v20  ;;  %4978 = vmatprep.mubr.msk.bf16.mxu1 %vm5807_vm1, %v5806_v3 }
0x1388   : > { %4988 = vmatprep.subr.bf16.mxu1 %v5806_v3 }
0x13f8   : > { %v2814_v22 = vpop.permute.xlu0 %2813 }
0x13f9   : > { %4979 = vmatmul.mubr.msk.bf16.vlgmr.msra.gmra.mxu1 %vm1249_vm3, %v2814_v22 }
0x13fa   : > { %4990 = vmatprep.mubr.msk.bf16.mxu1 %vm5807_vm1, %v5806_v3  ;;  %4989 = vmatpush3.bf16.msra.mxu1 %v6620_v62 }
0x13fb   : > { %5000 = vmatprep.subr.bf16.mxu1 %v5806_v3 }
0x1446   : > { %v2744_v24 = vpop.f32.mrf.mxu1 }
0x1447   : > { %v2745_v59 = vadd.f32 %v6586_v23, %v2744_v24 }
0x1448   : > { %v4968_v26 = vpop.f32.mrf.mxu1 }
0x1449   : > { %v2750_v27 = vsel %vm1249_vm3, %v2745_v59, -inf }
0x144a   : > { %2751 = vmax.xlane.f32.xlu0 %v2750_v27  ;;  %v2747_v28 = vpop.f32.mrf.mxu1 }
0x144c   : > { %v4969_v29 = vpop.f32.mrf.mxu1 }
0x14b9   : > { %v2857_v30 = vpop.f32.mrf.mxu1 }
0x14ba   : > { %v2858_v31 = vadd.f32 %v6586_v23, %v2857_v30 }
0x14bb   : > { %v4980_v32 = vpop.f32.mrf.mxu1 }
0x14bc   : > { %v2863_v44 = vsel %vm1249_vm3, %v2858_v31, -inf }
0x14bd   : > { %2864 = vmax.xlane.f32.xlu1 %v2863_v44  ;;  %v2860_v33 = vpop.f32.mrf.mxu1 }
0x14bf   : > { %v4981_v34 = vpop.f32.mrf.mxu1 }
0x14ce   : > { %2875 = vrot.lane.b32.xlu1 %v6561_v9, %s5810_s23 }
0x14d2   : > { %3016 = vrot.lane.b32.xlu1 %v6573_v18, %s5813_s15 }
0x14d3   : > { %v2752_v35 = vpop.xlane.xlu0 %2751 }
0x14d4   : > { %v2753_v36 = vsub.f32 %v2745_v59, %v2752_v35 }
0x14d6   : > { %v2754_v37 = vmul.f32 1.442695, %v2753_v36 }
0x14d8   : > { %5327 = vpow2.f32 %v2754_v37 }
0x14e5   : > { %v5328_v38 = vpop.eup %5327 }
0x14e6   : > { %v2756_v39 = vsel %vm1249_vm3, %v5328_v38, 0.0 }
0x14e7   : > { %2757 = vadd.xlane.f32.xlu0 %v2756_v39 }
0x1546   : > { %v2865_v40 = vpop.xlane.xlu1 %2864 }
0x1547   : > { %v2866_v6 = vsub.f32 %v2858_v31, %v2865_v40 }
0x1549   : > { %v2867_v41 = vmul.f32 1.442695, %v2866_v6 }
0x154a   : > { %v2876_v51 = vpop.permute.xlu1 %2875 }
0x154b   : > { %5329 = vpow2.f32 %v2867_v41  ;;  %v2881_v54 = vsel %vm1313_vm4, %v2876_v51, 0 }
0x154e   : > { %v3017_v13 = vpop.permute.xlu1 %3016 }
0x1558   : > { %v5330_v42 = vpop.eup %5329 }
0x1559   : > { %v2869_v43 = vsel %vm1249_vm3, %v5330_v42, 0.0 }
0x155a   : > { %2870 = vadd.xlane.f32.xlu0 %v2869_v43 }
0x1570   : > { %2763 = vrot.lane.b32.xlu0 %v6561_v9, %s5809_s27  ;;  %v2758_v45 = vpop.xlane.xlu0 %2757 }
0x1571   : > { %5331 = vrcp.f32 %v2758_v45  ;;  %v2694_v45 = vld [vmem:[%s6267_s26 + $0x8] sm:$0xf] }
0x1574   : > { %3018 = vrot.lane.b32.xlu0 %v6561_v9, %s5813_s15 }
0x157e   : > { %v5332_v46 = vpop.eup %5331 }
0x157f   : > { %v2760_v48 = vmul.f32 %v5332_v46, %v5328_v38  ;;  %v6658_v46 = vsel %vm1313_vm4, %v2694_v45, 0 }
0x1581   : > { %v2761_v53 = vpack.c.bf16 %v2760_v48, %v2760_v48 }
0x15e3   : > { %v2871_v47 = vpop.xlane.xlu0 %2870 }
0x15e4   : > { %5333 = vrcp.f32 %v2871_v47 }
0x15e7   : > { %v2764_v49 = vpop.permute.xlu0 %2763 }
0x15e8   : > { %v2769_v50 = vsel %vm1313_vm4, %v2764_v49, 0 }
0x15e9   : > { %4971 = vmatpush3.bf16.msra.mxu0 %v2769_v50 }
0x15ea   : > { %4982 = vmatprep.subr.bf16.mxu0 %v5806_v3 }
0x15eb   : > { %v3019_v8 = vpop.permute.xlu0 %3018 }
0x15ec   : > { %4973 = vmatmul.mubr.msk.bf16.vlgmr.msra.gmra.mxu0 %vm1249_vm3, %v2761_v53  ;;  %v3024_v10 = vsel %vm1249_vm3, %v3019_v8, 0 }
0x15ed   : > { %4983 = vmatpush3.bf16.msra.mxu0 %v2881_v54  ;;  %4984 = vmatprep.mubr.msk.bf16.mxu0 %vm5807_vm1, %v5806_v3 }
0x15ee   : > { %4994 = vmatprep.subr.bf16.mxu0 %v5806_v3 }
0x15f1   : > { %v5334_v55 = vpop.eup %5333 }
0x15f2   : > { %v2873_v58 = vmul.f32 %v5334_v55, %v5330_v42 }
0x15f4   : > { %v2874_v60 = vpack.c.bf16 %v2873_v58, %v2873_v58 }
0x15f6   : > { %4985 = vmatmul.mubr.msk.bf16.vlgmr.msra.gmra.mxu0 %vm1249_vm3, %v2874_v60 }
0x15f7   : > { %4996 = vmatprep.mubr.msk.bf16.mxu0 %vm5807_vm1, %v5806_v3  ;;  %4995 = vmatpush3.bf16.msra.mxu0 %v6614_v61 }
0x15f8   : > { %5006 = vmatprep.subr.bf16.mxu0 %v5806_v3 }
0x16ac   : > { %v2805_v63 = vpop.f32.mrf.mxu0 }
0x16ad   : > { %v2811_v1 = vpack.c.bf16 %v2805_v63, %v2805_v63  ;;  %v6673_v63 = vrot.slane %v6573_v18, 4 }
0x16ae   : > { %v4974_v2 = vpop.f32.mrf.mxu0 }
0x16af   : > { %4997 = vmatmul.mubr.msk.bf16.vlgmr.msra.gmra.mxu0 %vm1249_vm3, %v2811_v1 }
0x16b0   : > { %v2808_v4 = vpop.f32.mrf.mxu0  ;;  %5008 = vmatprep.mubr.msk.bf16.mxu0 %vm5807_vm1, %v5806_v3 }
0x16b2   : > { %v4975_v7 = vpop.f32.mrf.mxu0 }
0x16b6   : > { %v2917_v52 = vpop.f32.mrf.mxu0 }
0x16b7   : > { %v2923_v25 = vpack.c.bf16 %v2917_v52, %v2917_v52 }
0x16b8   : > { %v4986_v5 = vpop.f32.mrf.mxu0 }
0x16b9   : > { %4991 = vmatmul.mubr.msk.bf16.vlgmr.msra.gmra.mxu1 %vm1249_vm3, %v2923_v25 }
0x16ba   : > { %5001 = vmatpush3.bf16.xpose.msra.mxu1 %v3024_v10  ;;  %v2920_v11 = vpop.f32.mrf.mxu0  ;;  %5002 = vmatprep.mubr.msk.bf16.mxu1 %vm5807_vm1, %v5806_v3 }
0x16bb   : > { %5012 = vmatprep.subr.bf16.mxu1 %v5806_v3 }
0x16bc   : > { %v4987_v12 = vpop.f32.mrf.mxu0 }
0x16c1   : > { %5003 = vmatmul.mubr.msk.bf16.vlgmr.msra.gmra.mxu1 %vm1249_vm3, %v3017_v13 }
0x16c2   : > { %5014 = vmatprep.mubr.msk.bf16.mxu1 %vm5807_vm1, %v5806_v3  ;;  %5013 = vmatpush3.bf16.msra.mxu1 %v6658_v46 }
0x16c3   : > { %5024 = vmatprep.subr.bf16.mxu1 %v5806_v3 }
0x176f   : > { %v3010_v14 = vpop.f32.mrf.mxu0 }
0x1771   : > { %v4998_v57 = vpop.f32.mrf.mxu0 }
0x1773   : > { %v3013_v16 = vpop.f32.mrf.mxu0 }
0x1775   : > { %v4999_v17 = vpop.f32.mrf.mxu0 }
0x1779   : > { %v2964_v56 = vpop.f32.mrf.mxu1 }
0x177a   : > { %v6635_v20 = vadd.f32 %v3010_v14, %v2964_v56 }
0x177b   : > { %v4992_v22 = vpop.f32.mrf.mxu1 }
0x177d   : > { %v2967_v24 = vpop.f32.mrf.mxu1 }
0x177f   : > { %v4993_v59 = vpop.f32.mrf.mxu1 }
0x1781   : > { %v3060_v26 = vpop.f32.mrf.mxu1 }
0x1782   : > { %v3061_v27 = vadd.f32 %v6586_v23, %v3060_v26 }
0x1783   : > { %v5004_v28 = vpop.f32.mrf.mxu1 }
0x1784   : > { %v3066_v29 = vsel %vm1249_vm3, %v3061_v27, -inf  ;;  %v6711_v28 = vld [vmem:[#allocation5 + $0x1] ss:$0 sm:$0xff] }
0x1785   : > { %3067 = vmax.xlane.f32.xlu0 %v3066_v29  ;;  %v3063_v30 = vpop.f32.mrf.mxu1 }
0x1787   : > { %v5005_v31 = vpop.f32.mrf.mxu1 }
0x179b   : > { %3078 = vrot.lane.b32.xlu0 %v6561_v9, %s5814_s25 }
0x179f   : > { %3174 = vrot.lane.b32.xlu0 %v6573_v18, %s5816_s6 }
0x180e   : > { %v3068_v32 = vpop.xlane.xlu0 %3067 }
0x180f   : > { %v3069_v44 = vsub.f32 %v3061_v27, %v3068_v32 }
0x1811   : > { %v3070_v33 = vmul.f32 1.442695, %v3069_v44 }
0x1812   : > { %v3079_v34 = vpop.permute.xlu0 %3078 }
0x1813   : > { %5335 = vpow2.f32 %v3070_v33  ;;  %v3084_v35 = vsel %vm1313_vm4, %v3079_v34, 0 }
0x1814   : > { %5007 = vmatpush3.bf16.msra.mxu0 %v3084_v35 }
0x1815   : > { %5018 = vmatprep.subr.bf16.mxu0 %v5806_v3 }
0x1816   : > { %v3175_v43 = vpop.permute.xlu0 %3174 }
0x1820   : > { %v5336_v36 = vpop.eup %5335 }
0x1821   : > { %v3072_v37 = vsel %vm1249_vm3, %v5336_v36, 0.0 }
0x1822   : > { %3073 = vadd.xlane.f32.xlu1 %v3072_v37 }
0x1833   : > { %3176 = vrot.lane.b32.xlu1 %v6561_v9, %s5816_s6 }
0x18ab   : > { %v3074_v38 = vpop.xlane.xlu1 %3073 }
0x18ac   : > { %5337 = vrcp.f32 %v3074_v38 }
0x18af   : > { %v3177_v6 = vpop.permute.xlu1 %3176 }
0x18b0   : > { %v3182_v42 = vsel %vm1249_vm3, %v3177_v6, 0 }
0x18b9   : > { %v5338_v39 = vpop.eup %5337 }
0x18ba   : > { %v3076_v40 = vmul.f32 %v5338_v39, %v5336_v36 }
0x18bc   : > { %v3077_v41 = vpack.c.bf16 %v3076_v40, %v3076_v40 }
0x18be   : > { %5009 = vmatmul.mubr.msk.bf16.vlgmr.msra.gmra.mxu0 %vm1249_vm3, %v3077_v41 }
0x18bf   : > { %5019 = vmatpush3.bf16.xpose.msra.mxu0 %v3182_v42  ;;  %5020 = vmatprep.mubr.msk.bf16.mxu0 %vm5807_vm1, %v5806_v3 }
0x18c0   : > { %5030 = vmatprep.subr.bf16.mxu0 %v5806_v3 }
0x18c6   : > { %5021 = vmatmul.mubr.msk.bf16.vlgmr.msra.gmra.mxu0 %vm1249_vm3, %v3175_v43 }
0x18c7   : > { %5032 = vmatprep.mubr.msk.bf16.mxu0 %vm5807_vm1, %v5806_v3 }
0x197e   : > { %v3120_v47 = vpop.f32.mrf.mxu0 }
0x197f   : > { %v3126_v48 = vpack.c.bf16 %v3120_v47, %v3120_v47 }
0x1980   : > { %v5010_v49 = vpop.f32.mrf.mxu0 }
0x1981   : > { %5015 = vmatmul.mubr.msk.bf16.vlgmr.msra.gmra.mxu1 %vm1249_vm3, %v3126_v48 }
0x1982   : > { %v3123_v50 = vpop.f32.mrf.mxu0  ;;  %5026 = vmatprep.mubr.msk.bf16.mxu1 %vm5807_vm1, %v5806_v3 }
0x1984   : > { %v5011_v51 = vpop.f32.mrf.mxu0 }
0x1986   : > { %v3218_v53 = vpop.f32.mrf.mxu0 }
0x1987   : > { %v3219_v54 = vadd.f32 %v6586_v23, %v3218_v53 }
0x1988   : > { %v5022_v55 = vpop.f32.mrf.mxu0 }
0x1989   : > { %v3224_v58 = vsel %vm1249_vm3, %v3219_v54, -inf }
0x198a   : > { %3225 = vmax.xlane.f32.xlu1 %v3224_v58  ;;  %v3221_v60 = vpop.f32.mrf.mxu0 }
0x198c   : > { %v5023_v19 = vpop.f32.mrf.mxu0 }
0x199b   : > { %3458 = vrot.lane.b32.xlu1 %v6668_v21, %s5808_s17 }
0x199f   : > { %3456 = vrot.lane.b32.xlu1 %v6673_v63, %s5808_s17 }
0x1a13   : > { %v3226_v1 = vpop.xlane.xlu1 %3225 }
0x1a14   : > { %v3227_v23 = vsub.f32 %v3219_v54, %v3226_v1 }
0x1a16   : > { %v3228_v2 = vmul.f32 1.442695, %v3227_v23 }
0x1a17   : > { %v3459_v16 = vpop.permute.xlu1 %3458 }
0x1a18   : > { %5339 = vpow2.f32 %v3228_v2  ;;  %v3464_v17 = vsel %vm1249_vm3, %v3459_v16, 0 }
0x1a1b   : > { %v3457_v56 = vpop.permute.xlu1 %3456 }
0x1a25   : > { %v5340_v4 = vpop.eup %5339 }
0x1a26   : > { %v3230_v7 = vsel %vm1249_vm3, %v5340_v4, 0.0 }
0x1a27   : > { %3231 = vadd.xlane.f32.xlu0 %v3230_v7 }
0x1a3d   : > { %3236 = vrot.lane.b32.xlu0 %v6561_v9, %s5815_s11  ;;  %v3353_v9 = vsel %vm1249_vm3, %v6668_v21, 0 }
0x1a41   : > { %v3167_v8 = vpop.f32.mrf.mxu1 }
0x1a42   : > { %v6681_v52 = vadd.f32 %v3167_v8, %v6635_v20  ;;  %v2695_v20 = vld [vmem:[%s6267_s26 + $0xc] sm:$0xf] }
0x1a43   : > { %v5016_v18 = vpop.f32.mrf.mxu1  ;;  %v6704_v22 = vsel %vm1313_vm4, %v2695_v20, 0 }
0x1a44   : > { %5031 = vmatpush3.bf16.msra.mxu0 %v6704_v22 }
0x1a45   : > { %v3170_v25 = vpop.f32.mrf.mxu1  ;;  %5042 = vmatprep.subr.bf16.mxu0 %v5806_v3 }
0x1a47   : > { %v5017_v5 = vpop.f32.mrf.mxu1 }
0x1ab0   : > { %v3232_v10 = vpop.xlane.xlu0 %3231 }
0x1ab1   : > { %5341 = vrcp.f32 %v3232_v10 }
0x1ab4   : > { %v3237_v11 = vpop.permute.xlu0 %3236 }
0x1ab5   : > { %v3242_v12 = vsel %vm1313_vm4, %v3237_v11, 0 }
0x1ab6   : > { %5025 = vmatpush3.bf16.msra.mxu1 %v3242_v12 }
0x1ab7   : > { %5036 = vmatprep.subr.bf16.mxu1 %v5806_v3 }
0x1abe   : > { %v5342_v13 = vpop.eup %5341 }
0x1abf   : > { %v3234_v14 = vmul.f32 %v5342_v13, %v5340_v4 }
0x1ac1   : > { %v3235_v57 = vpack.c.bf16 %v3234_v14, %v3234_v14 }
0x1ac3   : > { %5027 = vmatmul.mubr.msk.bf16.vlgmr.msra.gmra.mxu1 %vm1249_vm3, %v3235_v57 }
0x1ac4   : > { %5037 = vmatpush3.bf16.xpose.msra.mxu1 %v3353_v9  ;;  %5038 = vmatprep.mubr.msk.bf16.mxu1 %vm5807_vm1, %v5806_v3 }
0x1ac5   : > { %5048 = vmatprep.subr.bf16.mxu1 %v5806_v3 }
0x1acb   : > { %5039 = vmatmul.mubr.msk.bf16.vlgmr.msra.gmra.mxu1 %vm1249_vm3, %v6673_v63 }
0x1acc   : > { %5049 = vmatpush3.bf16.xpose.msra.mxu1 %v3464_v17  ;;  %5050 = vmatprep.mubr.msk.bf16.mxu1 %vm5807_vm1, %v5806_v3 }
0x1acd   : > { %5060 = vmatprep.subr.bf16.mxu1 %v5806_v3 }
0x1ad3   : > { %5051 = vmatmul.mubr.msk.bf16.vlgmr.msra.gmra.mxu1 %vm1249_vm3, %v3457_v56 }
0x1ad4   : > { %5061 = vmatpush3.bf16.msra.mxu1 %v6620_v62  ;;  %5062 = vmatprep.mubr.msk.bf16.mxu1 %vm5807_vm1, %v5806_v3 }
0x1ad5   : > { %5072 = vmatprep.subr.bf16.mxu1 %v5806_v3 }
0x1b83   : > { %v3278_v24 = vpop.f32.mrf.mxu1 }
0x1b84   : > { %v3284_v59 = vpack.c.bf16 %v3278_v24, %v3278_v24 }
0x1b85   : > { %v5028_v26 = vpop.f32.mrf.mxu1 }
0x1b86   : > { %5033 = vmatmul.mubr.msk.bf16.vlgmr.msra.gmra.mxu0 %vm1249_vm3, %v3284_v59 }
0x1b87   : > { %v3281_v27 = vpop.f32.mrf.mxu1  ;;  %5044 = vmatprep.mubr.msk.bf16.mxu0 %vm5807_vm1, %v5806_v3 }
0x1b89   : > { %v5029_v62 = vpop.f32.mrf.mxu1 }
0x1b8b   : > { %v3389_v29 = vpop.f32.mrf.mxu1 }
0x1b8c   : > { %v3390_v30 = vadd.f32 %v6711_v28, %v3389_v29 }
0x1b8d   : > { %v5040_v31 = vpop.f32.mrf.mxu1 }
0x1b8e   : > { %v3395_v32 = vsel %vm1249_vm3, %v3390_v30, -inf }
0x1b8f   : > { %3396 = vmax.xlane.f32.xlu0 %v3395_v32  ;;  %v3392_v44 = vpop.f32.mrf.mxu1 }
0x1b91   : > { %v5041_v33 = vpop.f32.mrf.mxu1 }
0x1b93   : > { %v3500_v34 = vpop.f32.mrf.mxu1 }
0x1b94   : > { %v3501_v35 = vadd.f32 %v6711_v28, %v3500_v34 }
0x1b95   : > { %v5052_v36 = vpop.f32.mrf.mxu1 }
0x1b96   : > { %v3506_v37 = vsel %vm1249_vm3, %v3501_v35, -inf }
0x1b97   : > { %3507 = vmax.xlane.f32.xlu1 %v3506_v37  ;;  %v3503_v38 = vpop.f32.mrf.mxu1 }
0x1b99   : > { %v5053_v39 = vpop.f32.mrf.mxu1 }
0x1ba8   : > { %3407 = vrot.lane.b32.xlu1 %v6668_v21, %s5809_s27 }
0x1bac   : > { %3655 = vrot.lane.b32.xlu1 %v6668_v21, %s5813_s15 }
0x1bb0   : > { %3653 = vrot.lane.b32.xlu1 %v6673_v63, %s5813_s15 }
0x1c18   : > { %v3397_v40 = vpop.xlane.xlu0 %3396 }
0x1c19   : > { %v3398_v6 = vsub.f32 %v3390_v30, %v3397_v40 }
0x1c1b   : > { %v3399_v41 = vmul.f32 1.442695, %v3398_v6 }
0x1c1d   : > { %5343 = vpow2.f32 %v3399_v41 }
0x1c20   : > { %v3508_v42 = vpop.xlane.xlu1 %3507 }
0x1c21   : > { %v3509_v43 = vsub.f32 %v3501_v35, %v3508_v42 }
0x1c23   : > { %v3510_v45 = vmul.f32 1.442695, %v3509_v43 }
0x1c24   : > { %v3408_v47 = vpop.permute.xlu1 %3407 }
0x1c25   : > { %5345 = vpow2.f32 %v3510_v45  ;;  %v3413_v48 = vsel %vm1313_vm4, %v3408_v47, 0 }
0x1c26   : > { %5043 = vmatpush3.bf16.msra.mxu0 %v3413_v48 }
0x1c27   : > { %5054 = vmatprep.subr.bf16.mxu0 %v5806_v3 }
0x1c28   : > { %v3656_v57 = vpop.permute.xlu1 %3655 }
0x1c2a   : > { %v5344_v49 = vpop.eup %5343 }
0x1c2b   : > { %v3401_v50 = vsel %vm1249_vm3, %v5344_v49, 0.0 }
0x1c2c   : > { %3402 = vadd.xlane.f32.xlu0 %v3401_v50  ;;  %v3654_v24 = vpop.permute.xlu1 %3653 }
0x1c32   : > { %v5346_v51 = vpop.eup %5345 }
0x1c33   : > { %v3512_v53 = vsel %vm1249_vm3, %v5346_v51, 0.0 }
0x1c34   : > { %3513 = vadd.xlane.f32.xlu0 %v3512_v53 }
0x1c46   : > { %v3325_v54 = vpop.f32.mrf.mxu0 }
0x1c47   : > { %v6728_v55 = vadd.f32 %v3325_v54, %v6681_v52 }
0x1c48   : > { %v5034_v58 = vpop.f32.mrf.mxu0 }
0x1c4a   : > { %3518 = vrot.lane.b32.xlu0 %v6668_v21, %s5810_s23  ;;  %v3328_v60 = vpop.f32.mrf.mxu0 }
0x1c4b   : > { %v4647_v60 = vld [vmem:[%s1122_s1] ss:$0 sm:$0xff] }
0x1c4c   : > { %v5035_v19 = vpop.f32.mrf.mxu0 }
0x1cb5   : > { %v3403_v1 = vpop.xlane.xlu0 %3402 }
0x1cb6   : > { %5347 = vrcp.f32 %v3403_v1  ;;  %v3338_v1 = vadd.f32 %v4647_v60, %v6728_v55 }
0x1cbd   : > { %v3514_v23 = vpop.xlane.xlu0 %3513 }
0x1cbe   : > { %5349 = vrcp.f32 %v3514_v23 }
0x1cc1   : > { %v3519_v7 = vpop.permute.xlu0 %3518 }
0x1cc2   : > { %v3524_v18 = vsel %vm1313_vm4, %v3519_v7, 0 }
0x1cc3   : > { %v5348_v2 = vpop.eup %5347 }
0x1cc4   : > { %v3405_v4 = vmul.f32 %v5348_v2, %v5344_v49 }
0x1cc6   : > { %v3406_v8 = vpack.c.bf16 %v3405_v4, %v3405_v4 }
0x1cc8   : > { %5045 = vmatmul.mubr.msk.bf16.vlgmr.msra.gmra.mxu0 %vm1249_vm3, %v3406_v8  ;;  %v3964_v8 = vadd.f32 %v3338_v1, %v6547_v0 }
0x1cc9   : > { %5055 = vmatpush3.bf16.msra.mxu0 %v3524_v18  ;;  %5056 = vmatprep.mubr.msk.bf16.mxu0 %vm5807_vm1, %v5806_v3 }
0x1cca   : > { %5066 = vmatprep.subr.bf16.mxu0 %v5806_v3 }
0x1ccb   : > { %v5350_v52 = vpop.eup %5349 }
0x1ccc   : > { %v3516_v25 = vmul.f32 %v5350_v52, %v5346_v51 }
0x1cce   : > { %v3517_v5 = vpack.c.bf16 %v3516_v25, %v3516_v25  ;;  %v3966_v25 = vsel %vm1188_vm2, %v3964_v8, 0.0 }
0x1cd0   : > { %5057 = vmatmul.mubr.msk.bf16.vlgmr.msra.gmra.mxu0 %vm1249_vm3, %v3517_v5 }
0x1cd1   : > { %5067 = vmatpush3.bf16.msra.mxu0 %v6614_v61  ;;  %5068 = vmatprep.mubr.msk.bf16.mxu0 %vm5807_vm1, %v5806_v3  ;;  %v3661_v61 = vsel %vm1249_vm3, %v3656_v57, 0 }
0x1cd2   : > { %5078 = vmatprep.subr.bf16.mxu0 %v5806_v3 }
0x1d88   : > { %v3449_v10 = vpop.f32.mrf.mxu0 }
0x1d89   : > { %v3455_v11 = vpack.c.bf16 %v3449_v10, %v3449_v10 }
0x1d8a   : > { %v5046_v12 = vpop.f32.mrf.mxu0 }
0x1d8b   : > { %5069 = vmatmul.mubr.msk.bf16.vlgmr.msra.gmra.mxu0 %vm1249_vm3, %v3455_v11 }
0x1d8c   : > { %v3452_v13 = vpop.f32.mrf.mxu0  ;;  %5080 = vmatprep.mubr.msk.bf16.mxu0 %vm5807_vm1, %v5806_v3 }
0x1d8e   : > { %v5047_v14 = vpop.f32.mrf.mxu0 }
0x1d90   : > { %v3560_v9 = vpop.f32.mrf.mxu0 }
0x1d91   : > { %v3566_v16 = vpack.c.bf16 %v3560_v9, %v3560_v9 }
0x1d92   : > { %v5058_v17 = vpop.f32.mrf.mxu0 }
0x1d93   : > { %5063 = vmatmul.mubr.msk.bf16.vlgmr.msra.gmra.mxu1 %vm1249_vm3, %v3566_v16 }
0x1d94   : > { %5073 = vmatpush3.bf16.xpose.msra.mxu1 %v3661_v61  ;;  %v3563_v56 = vpop.f32.mrf.mxu0  ;;  %5074 = vmatprep.mubr.msk.bf16.mxu1 %vm5807_vm1, %v5806_v3 }
0x1d95   : > { %5084 = vmatprep.subr.bf16.mxu1 %v5806_v3 }
0x1d96   : > { %v5059_v20 = vpop.f32.mrf.mxu0 }
0x1d9b   : > { %5075 = vmatmul.mubr.msk.bf16.vlgmr.msra.gmra.mxu1 %vm1249_vm3, %v3654_v24 }
0x1d9c   : > { %5085 = vmatpush3.bf16.msra.mxu1 %v6658_v46  ;;  %5086 = vmatprep.mubr.msk.bf16.mxu1 %vm5807_vm1, %v5806_v3 }
0x1d9d   : > { %5096 = vmatprep.subr.bf16.mxu1 %v5806_v3 }
0x1e4b   : > { %v3647_v59 = vpop.f32.mrf.mxu0 }
0x1e4d   : > { %v5070_v26 = vpop.f32.mrf.mxu0 }
0x1e4f   : > { %v3650_v27 = vpop.f32.mrf.mxu0 }
0x1e51   : > { %v5071_v62 = vpop.f32.mrf.mxu0 }
0x1e53   : > { %v3604_v29 = vpop.f32.mrf.mxu1 }
0x1e54   : > { %v6755_v30 = vadd.f32 %v3647_v59, %v3604_v29 }
0x1e55   : > { %v5064_v31 = vpop.f32.mrf.mxu1 }
0x1e57   : > { %v3607_v32 = vpop.f32.mrf.mxu1 }
0x1e59   : > { %v5065_v44 = vpop.f32.mrf.mxu1 }
0x1e5b   : > { %v3697_v33 = vpop.f32.mrf.mxu1 }
0x1e5c   : > { %v3698_v34 = vadd.f32 %v6711_v28, %v3697_v33 }
0x1e5d   : > { %v5076_v35 = vpop.f32.mrf.mxu1 }
0x1e5e   : > { %v3703_v46 = vsel %vm1249_vm3, %v3698_v34, -inf }
0x1e5f   : > { %3704 = vmax.xlane.f32.xlu0 %v3703_v46  ;;  %v3700_v36 = vpop.f32.mrf.mxu1 }
0x1e61   : > { %v5077_v37 = vpop.f32.mrf.mxu1 }
0x1e75   : > { %3715 = vrot.lane.b32.xlu0 %v6668_v21, %s5814_s25 }
0x1e79   : > { %3808 = vrot.lane.b32.xlu0 %v6673_v63, %s5816_s6 }
0x1ee8   : > { %v3705_v38 = vpop.xlane.xlu0 %3704 }
0x1ee9   : > { %v3706_v39 = vsub.f32 %v3698_v34, %v3705_v38 }
0x1eeb   : > { %v3707_v40 = vmul.f32 1.442695, %v3706_v39 }
0x1eec   : > { %v3716_v6 = vpop.permute.xlu0 %3715 }
0x1eed   : > { %5351 = vpow2.f32 %v3707_v40  ;;  %v3721_v41 = vsel %vm1313_vm4, %v3716_v6, 0 }
0x1eee   : > { %5079 = vmatpush3.bf16.msra.mxu0 %v3721_v41 }
0x1eef   : > { %5090 = vmatprep.subr.bf16.mxu0 %v5806_v3 }
0x1ef0   : > { %v3809_v51 = vpop.permute.xlu0 %3808 }
0x1efa   : > { %v5352_v42 = vpop.eup %5351 }
0x1efb   : > { %v3709_v43 = vsel %vm1249_vm3, %v5352_v42, 0.0 }
0x1efc   : > { %3710 = vadd.xlane.f32.xlu1 %v3709_v43  ;;  %v5287_v43 = vld [vmem:[%s983_s9 + $0x8] sm:$0xff]  }
0x1f0d   : > { %3810 = vrot.lane.b32.xlu1 %v6668_v21, %s5816_s6 }
0x1f85   : > { %v3711_v45 = vpop.xlane.xlu1 %3710 }
0x1f86   : > { %5353 = vrcp.f32 %v3711_v45 }
0x1f89   : > { %v3811_v48 = vpop.permute.xlu1 %3810 }
0x1f8a   : > { %v3816_v50 = vsel %vm1249_vm3, %v3811_v48, 0 }
0x1f93   : > { %v5354_v63 = vpop.eup %5353 }
0x1f94   : > { %v3713_v47 = vmul.f32 %v5354_v63, %v5352_v42 }
0x1f96   : > { %v3714_v49 = vpack.c.bf16 %v3713_v47, %v3713_v47 }
0x1f98   : > { %5081 = vmatmul.mubr.msk.bf16.vlgmr.msra.gmra.mxu0 %vm1249_vm3, %v3714_v49 }
0x1f99   : > { %5091 = vmatpush3.bf16.xpose.msra.mxu0 %v3816_v50  ;;  %5092 = vmatprep.mubr.msk.bf16.mxu0 %vm5807_vm1, %v5806_v3 }
0x1f9a   : > { %5102 = vmatprep.subr.bf16.mxu0 %v5806_v3 }
0x1fa0   : > { %5093 = vmatmul.mubr.msk.bf16.vlgmr.msra.gmra.mxu0 %vm1249_vm3, %v3809_v51 }
0x1fa1   : > { %5103 = vmatpush3.bf16.msra.mxu0 %v6704_v22  ;;  %5104 = vmatprep.mubr.msk.bf16.mxu0 %vm5807_vm1, %v5806_v3 }
0x1fa2   : > { %5116 = vmatprep.subr.bf16.mxu0 %v5806_v3 }
0x2058   : > { %v3757_v53 = vpop.f32.mrf.mxu0 }
0x2059   : > { %v3763_v54 = vpack.c.bf16 %v3757_v53, %v3757_v53 }
0x205a   : > { %v5082_v58 = vpop.f32.mrf.mxu0 }
0x205b   : > { %5087 = vmatmul.mubr.msk.bf16.vlgmr.msra.gmra.mxu1 %vm1249_vm3, %v3763_v54  ;;  %v4661_v54 = vld [vmem:[%s6252_s24 + $0x1] ss:$0 sm:$0xff] }
0x205c   : > { %v3760_v19 = vpop.f32.mrf.mxu0  ;;  %5098 = vmatprep.mubr.msk.bf16.mxu1 %vm5807_vm1, %v5806_v3 }
0x205e   : > { %v5083_v22 = vpop.f32.mrf.mxu0 }
0x205f   : > { %v4662_v22 = vld [vmem:[%s6257_s30 + $0x1] ss:$0 sm:$0xff] }
0x2060   : > { %v3852_v23 = vpop.f32.mrf.mxu0 }
0x2061   : > { %v3853_v2 = vadd.f32 %v6711_v28, %v3852_v23 }
0x2062   : > { %v5094_v4 = vpop.f32.mrf.mxu0 }
0x2063   : > { %v3858_v7 = vsel %vm1249_vm3, %v3853_v2, -inf }
0x2064   : > { %3859 = vmax.xlane.f32.xlu1 %v3858_v7  ;;  %v3855_v18 = vpop.f32.mrf.mxu0  ;;  %v5289_v7 = vld [vmem:[%s992_s29 + $0x8] sm:$0xff]  }
0x2065   : > { %v4663_v18 = vld [vmem:[%s1125_s28] ss:$0 sm:$0xff] }
0x2066   : > { %v5095_v52 = vpop.f32.mrf.mxu0 }
0x2068   : > { %3967 = vadd.xlane.f32.xlu1 %v3966_v25 }
0x20ed   : > { %v3860_v5 = vpop.xlane.xlu1 %3859 }
0x20ee   : > { %v3861_v10 = vsub.f32 %v3853_v2, %v3860_v5 }
0x20f0   : > { %v3862_v11 = vmul.f32 1.442695, %v3861_v10 }
0x20f1   : > { %v3968_v62 = vpop.xlane.xlu1 %3967 }
0x20f2   : > { %5355 = vpow2.f32 %v3862_v11  ;;  %v3972_v29 = vmul.f32 0.03125, %v3968_v62 }
0x20f4   : > { %v3974_v44 = vsub.f32 %v3964_v8, %v3972_v29  ;;  %v5290_v8 = vld [vmem:[%s992_s29] sm:$0xff]   ;;  %s6979_s29 = sld [smem:[#allocation43_spill]] }
0x20f6   : > { %v3976_v37 = vmul.f32 %v3974_v44, %v3974_v44 }
0x20f8   : > { %v3978_v38 = vsel %vm1188_vm2, %v3976_v37, 0.0  ;;  %v4671_v37 = vld [vmem:[%s6252_s24 + $0x2] ss:$0 sm:$0xff] }
0x20fa   : > { %s6980_s25 = scalar_lea.vmem %s6979_s29, %s6226_s22  ;;  %s6981_s22 = sld [smem:[#allocation25_spill]] }
0x20ff   : > { %v5356_v12 = vpop.eup %5355 }
0x2100   : > { %v3864_v55 = vsel %vm1249_vm3, %v5356_v12, 0.0  ;;  %p4673_p13 = scmp.ne.s32.totalorder %s6981_s22, 1 }
0x2101   : > { %3865 = vadd.xlane.f32.xlu0 %v3864_v55  ;;  %s5819_s28 = smov (!%p4673_p13), 32   ;;  %s6982_s6 = sld [smem:[#allocation46_spill]] (!%p4673_p13) }
0x2117   : > { %3870 = vrot.lane.b32.xlu0 %v6668_v21, %s5815_s11 }
0x211b   : > { %v3801_v28 = vpop.f32.mrf.mxu1 }
0x211c   : > { %v3807_v0 = vadd.f32 %v3801_v28, %v6755_v30 }
0x211d   : > { %v5088_v13 = vpop.f32.mrf.mxu1 }
0x211f   : > { %v3804_v14 = vpop.f32.mrf.mxu1 }
0x2121   : > { %v5089_v57 = vpop.f32.mrf.mxu1 }
0x218a   : > { %v3866_v9 = vpop.xlane.xlu0 %3865 }
0x218b   : > { %5357 = vrcp.f32 %v3866_v9 }
0x218e   : > { %v3871_v16 = vpop.permute.xlu0 %3870 }
0x218f   : > { %v3876_v17 = vsel %vm1313_vm4, %v3871_v16, 0 }
0x2190   : > { %5097 = vmatpush3.bf16.msra.mxu1 %v3876_v17 }
0x2191   : > { %5108 = vmatprep.subr.bf16.mxu1 %v5806_v3 }
0x2198   : > { %v5358_v61 = vpop.eup %5357 }
0x2199   : > { %v3868_v56 = vmul.f32 %v5358_v61, %v5356_v12 }
0x219b   : > { %v3869_v20 = vpack.c.bf16 %v3868_v56, %v3868_v56 }
0x219d   : > { %5099 = vmatmul.mubr.msk.bf16.vlgmr.msra.gmra.mxu1 %vm1249_vm3, %v3869_v20 }
0x219e   : > { %5112 = vmatprep.mubr.msk.bf16.mxu1 %vm5807_vm1, %v5806_v3  ;;  %5109 = vmatpush3.bf16.msra.mxu1 %v5287_v43 }
0x219f   : > { %5110 = vmatprep.subr.bf16.mxu1 %v5806_v3 }
0x225d   : > { %v3912_v21 = vpop.f32.mrf.mxu1 }
0x225e   : > { %v3918_v24 = vpack.c.bf16 %v3912_v21, %v3912_v21 }
0x225f   : > { %v5100_v59 = vpop.f32.mrf.mxu1 }
0x2260   : > { %5105 = vmatmul.mubr.msk.bf16.vlgmr.msra.gmra.mxu0 %vm1249_vm3, %v3918_v24 }
0x2261   : > { %v3915_v26 = vpop.f32.mrf.mxu1  ;;  %5120 = vmatprep.mubr.msk.bf16.mxu0 %vm5807_vm1, %v5806_v3  ;;  %5117 = vmatpush3.bf16.msra.mxu0 %v5289_v7 }
0x2262   : > { %5118 = vmatprep.subr.bf16.mxu0 %v5806_v3  ;;  %v4667_v3 = vld [vmem:[%s6980_s25] ss:$0 sm:$0xff] }
0x2263   : > { %v5101_v27 = vpop.f32.mrf.mxu1 }
0x2265   : > { %5119 = vmatpush3.bf16.msra.mxu0 %v5290_v8 }
0x2320   : > { %v3956_v30 = vpop.f32.mrf.mxu0 }
0x2321   : > { %v3962_v31 = vadd.f32 %v3956_v30, %v3807_v0 }
0x2322   : > { %v5106_v32 = vpop.f32.mrf.mxu0 }
0x2323   : > { %v3963_v33 = vadd.f32 %v4647_v60, %v3962_v31 }
0x2324   : > { %v3959_v34 = vpop.f32.mrf.mxu0 }
0x2325   : > { %v3965_v35 = vadd.f32 %v3963_v33, %v6549_v15  ;;  %v5288_v15 = vld [vmem:[%s983_s9] sm:$0xff]  }
0x2326   : > { %v5107_v46 = vpop.f32.mrf.mxu0  ;;  %5111 = vmatpush3.bf16.msra.mxu1 %v5288_v15 }
0x2327   : > { %v3969_v36 = vsel %vm1188_vm2, %v3965_v35, 0.0 }
0x2328   : > { %3970 = vadd.xlane.f32.xlu1 %v3969_v36 }
0x232c   : > { %3979 = vadd.xlane.f32.xlu1 %v3978_v38 }
0x23b1   : > { %v3971_v39 = vpop.xlane.xlu1 %3970 }
0x23b2   : > { %v3973_v40 = vmul.f32 0.03125, %v3971_v39  ;;  %v4672_v39 = vld [vmem:[%s6257_s30 + $0x2] ss:$0 sm:$0xff] }
0x23b4   : > { %v3975_v6 = vsub.f32 %v3965_v35, %v3973_v40 }
0x23b5   : > { %v3980_v45 = vpop.xlane.xlu1 %3979 }
0x23b6   : > { %v3977_v41 = vmul.f32 %v3975_v6, %v3975_v6  ;;  %v3984_v63 = vmul.f32 0.03125, %v3980_v45 }
0x23b8   : > { %v3981_v42 = vsel %vm1188_vm2, %v3977_v41, 0.0  ;;  %v3986_v47 = vadd.f32 1e-05, %v3984_v63 }
0x23b9   : > { %3982 = vadd.xlane.f32.xlu1 %v3981_v42 }
0x23ba   : > { %5359 = vrsqrt.f32 %v3986_v47 }
0x23c7   : > { %v5360_v51 = vpop.eup %5359 }
0x23c8   : > { %v3990_v53 = vmul.f32 %v5360_v51, %v3974_v44 }
0x23ca   : > { %v3998_v19 = vmul.f32 %v4661_v54, %v3990_v53 }
0x23cc   : > { %v4006_v23 = vadd.f32 %v4662_v22, %v3998_v19 }
0x2442   : > { %v3983_v48 = vpop.xlane.xlu1 %3982 }
0x2443   : > { %v3985_v49 = vmul.f32 0.03125, %v3983_v48 }
0x2445   : > { %v3987_v50 = vadd.f32 1e-05, %v3985_v49 }
0x2447   : > { %5361 = vrsqrt.f32 %v3987_v50 }
0x2454   : > { %v5362_v58 = vpop.eup %5361 }
0x2455   : > { %v3991_v60 = vmul.f32 %v5362_v58, %v3975_v6 }
0x2457   : > { %v3999_v1 = vmul.f32 %v4661_v54, %v3991_v60 }
0x2459   : > { %v4007_v2 = vadd.f32 %v4662_v22, %v3999_v1 }
0x245b   : > { %v4008_v4 = vpack.c.bf16 %v4007_v2, %v4006_v23 }
0x245d   : > { %5113 = vmatmul.mubr.msk.bf16.vlgmr.msra.gmra.mxu1 %vm1188_vm2, %v4008_v4 }
0x251d   : > { %v4069_v52 = vpop.f32.mrf.mxu1 }
0x251e   : > { %v4070_v5 = vadd.f32 %v4663_v18, %v4069_v52 }
0x251f   : > { %v5114_v25 = vpop.f32.mrf.mxu1 }
0x2520   : > { %v4076_v55 = vmax.f32 %v4070_v5, 0.0 }
0x2521   : > { %v4072_v10 = vpop.f32.mrf.mxu1 }
0x2522   : > { %v4073_v11 = vadd.f32 %v4663_v18, %v4072_v10 }
0x2523   : > { %v5115_v12 = vpop.f32.mrf.mxu1 }
0x2524   : > { %v4077_v28 = vmax.f32 %v4073_v11, 0.0 }
0x2526   : > { %v4078_v0 = vpack.c.bf16 %v4077_v28, %v4076_v55 }
0x2528   : > { %5121 = vmatmul.mubr.msk.bf16.vlgmr.msra.gmra.mxu0 %vm1188_vm2, %v4078_v0 }
0x25e8   : > { %v4139_v13 = vpop.f32.mrf.mxu0 }
0x25e9   : > { %v4140_v14 = vadd.f32 %v4667_v3, %v4139_v13 }
0x25ea   : > { %v5122_v57 = vpop.f32.mrf.mxu0 }
0x25eb   : > { %v4146_v9 = vsel %vm1188_vm2, %v4140_v14, 0.0 }
0x25ec   : > { %4147 = vadd.xlane.f32.xlu1 %v4146_v9  ;;  %v4142_v16 = vpop.f32.mrf.mxu0 }
0x25ed   : > { %v4143_v17 = vadd.f32 %v4667_v3, %v4142_v16 }
0x25ee   : > { %v5123_v61 = vpop.f32.mrf.mxu0 }
0x25ef   : > { %v4149_v56 = vsel %vm1188_vm2, %v4143_v17, 0.0 }
0x25f0   : > { %4150 = vadd.xlane.f32.xlu1 %v4149_v56 }
0x2675   : > { %v4148_v20 = vpop.xlane.xlu1 %4147 }
0x2676   : > { %v4152_v21 = vmul.f32 0.03125, %v4148_v20 }
0x2678   : > { %v4154_v24 = vsub.f32 %v4140_v14, %v4152_v21 }
0x2679   : > { %v4151_v59 = vpop.xlane.xlu1 %4150 }
0x267a   : > { %v4153_v26 = vmul.f32 0.03125, %v4151_v59  ;;  %v4156_v27 = vmul.f32 %v4154_v24, %v4154_v24 }
0x267c   : > { %v4155_v62 = vsub.f32 %v4143_v17, %v4153_v26  ;;  %v4158_v29 = vsel %vm1188_vm2, %v4156_v27, 0.0 }
0x267d   : > { %4159 = vadd.xlane.f32.xlu0 %v4158_v29 }
0x267e   : > { %v4157_v30 = vmul.f32 %v4155_v62, %v4155_v62 }
0x2680   : > { %v4161_v31 = vsel %vm1188_vm2, %v4157_v30, 0.0 }
0x2681   : > { %4162 = vadd.xlane.f32.xlu1 %v4161_v31 }
0x2706   : > { %v4160_v32 = vpop.xlane.xlu0 %4159 }
0x2707   : > { %v4164_v44 = vmul.f32 0.03125, %v4160_v32 }
0x2709   : > { %v4166_v33 = vadd.f32 1e-05, %v4164_v44 }
0x270a   : > { %v4163_v34 = vpop.xlane.xlu1 %4162 }
0x270b   : > { %5363 = vrsqrt.f32 %v4166_v33  ;;  %v4165_v35 = vmul.f32 0.03125, %v4163_v34 }
0x270d   : > { %v4167_v46 = vadd.f32 1e-05, %v4165_v35 }
0x270f   : > { %5365 = vrsqrt.f32 %v4167_v46 }
0x2718   : > { %v5364_v36 = vpop.eup %5363 }
0x2719   : > { %v4170_v38 = vmul.f32 %v5364_v36, %v4154_v24 }
0x271b   : > { %v4178_v40 = vmul.f32 %v4671_v37, %v4170_v38 }
0x271c   : > { %v5366_v6 = vpop.eup %5365 }
0x271d   : > { %v4186_v41 = vadd.f32 %v4672_v39, %v4178_v40  ;;  %v4171_v42 = vmul.f32 %v5366_v6, %v4155_v62 }
0x271f   : > { %4188 = vst.msk [vmem:[#allocation2] sm:$0xff] %vm1188_vm2, %v4186_v41  ;;  %v4179_v43 = vmul.f32 %v4671_v37, %v4171_v42  ;;  %4193 = sbr.rel (%p4673_p13) target bundleno = 10140 (0x279c), region = 160 }
0x2721   : > { %v4187_v15 = vadd.f32 %v4672_v39, %v4179_v43 }
0x2723   : > { %4189 = vst.msk [vmem:[#allocation2 + $0x8] sm:$0xff] %vm1188_vm2, %v4187_v15 }
0x2724   : > { %vm4194_vm5 = vcmask 260096   ;;  %4199 = vrot.lane.b32.xlu0 %v4186_v41, %s5819_s28  ;;  %vm4205_vm6 = vcmask 523521  }
0x2725   : > { %4195 = vst.msk [vmem:[%s6982_s6] sm:$0x7f] %vm4194_vm5, %v4186_v41  ;;  %4196 = vst.msk [vmem:[%s6982_s6 + $0x8] sm:$0x7f] %vm4194_vm5, %v4187_v15 }
0x2728   : > { %4201 = vrot.lane.b32.xlu0 %v4187_v15, %s5819_s28 }
0x2796   : > { %v4200_v45 = vpop.permute.xlu0 %4199 }
0x2797   : > { %4206 = vst.msk [vmem:[%s6982_s6 - $0x1] sm:$0xfe] %vm4205_vm6, %v4200_v45 }
0x279a   : > { %v4202_v63 = vpop.permute.xlu0 %4201 }
0x279b   : > { %4207 = vst.msk [vmem:[%s6982_s6 + $0x7] sm:$0xfe] %vm4205_vm6, %v4202_v63 }
0x279c PF: > { %s6983_s13 = sld [smem:[#allocation26_spill]]  ;;  %s6988_s24 = smov %s5781_s2 }
0x279d   : > { %s6984_s1 = sld [smem:[#allocation23_spill]] }
0x279e   : > { %s6985_s22 = sld [smem:[#allocation24_spill]] }
0x279f   : > { %s6986_s23 = sld [smem:[#allocation30_spill]] }
0x27a0   : > { %s6987_s21 = sld [smem:[#allocation27_spill]] }
0x27a2   : > { %s33_s25 = sadd.s32 1, %s6983_s13  }
0x27a3   : > { %p30_p2 = scmp.ge.s32.totalorder %s33_s25, 4  }
0x27a5   :  { %32 = sbr.rel (!%p30_p2) target bundleno = 22 (0x16), region = 278 }
0x27a6   : > { %s6989_s2 = smov %s6987_s21 }
0x27aa   :  { %4230 = vsyncpa [#allocation4], 1 }
0x27ab   :  { %4232 = vsyncpa [#allocation4 + $0x1], 1 }
0x27ac   :  { %4233 = vsyncpa [#allocation6], 1 }
0x27ad   :  { %4234 = vsyncpa [#allocation9], 1 }

</bundles_post_ra>
